<compile_context>
chip_gen: v6e
topology: v6e:2x2x1
jax: 0.10.0
libtpu: 0.0.40
codegen_flags: <defaults>
</compile_context>

<pallas_src>
import jax
import jax.numpy as jnp
import numpy as np
from jax.experimental import pallas as pl
from jax.experimental.pallas import tpu as pltpu


def _attn_kernel(h_ref, hT_ref, asp_ref, smask_ref, w_ref, out_ref):
    # Block shapes (one batch block of BB rows):
    #   h_ref    : (Lm1, BB, S, H)   stacked intermediate layer outputs
    #   hT_ref   : (BB, S, H)        final layer output
    #   asp_ref  : (BB, S)           aspect mask (1.0 at aspect tokens)
    #   smask_ref: (BB, S)           score mask  (1.0 => masked out)
    #   w_ref    : (H, H)            bilinear weight (resident: constant index_map)
    #   out_ref  : (BB, 2*H)         concat([context_weighted_vec, aspect], -1)
    h = h_ref[...].astype(jnp.float32)          # (Lm1, BB, S, H)
    hT = hT_ref[...].astype(jnp.float32)        # (BB, S, H)

    # ---- layer-wise attention: softmax over the layer axis of <h_l, h_T> ----
    a0 = jnp.sum(h * hT[None], axis=-1, keepdims=True)       # (Lm1, BB, S, 1)
    a0 = a0 - jnp.max(a0, axis=0, keepdims=True)
    e0 = jnp.exp(a0)
    a0 = e0 / jnp.sum(e0, axis=0, keepdims=True)             # exact divide
    h_weighted = jnp.sum(a0 * h, axis=0) + hT                # (BB, S, H)

    # ---- aspect pooling: VPU multiply + sublane reduce (no degenerate matmul) ----
    asp = asp_ref[...]                                        # (BB, S)
    asp_sum = jnp.sum(asp[:, :, None] * h_weighted, axis=1)  # (BB, H)
    wn = jnp.sum(asp, axis=-1, keepdims=True)                 # (BB, 1)
    aspect = asp_sum / wn                                     # exact divide

    # context keeps only non-aspect tokens (exact "== 0" reference semantics)
    ctx_keep = (asp == 0.0).astype(jnp.float32)               # (BB, S)
    context = h_weighted * ctx_keep[:, :, None]               # (BB, S, H)

    # ---- bilinear scores: one real MXU matmul, then VPU mul + lane reduce ----
    aw = jnp.dot(aspect, w_ref[...],
                 preferred_element_type=jnp.float32,
                 precision=jax.lax.Precision.HIGHEST)         # (BB, H)
    scores = jnp.sum(context * aw[:, None, :], axis=-1)       # (BB, S)
    # additive mask bias (smask is exactly 0/1): equivalent to masked_fill(-1e10)
    scores = scores + smask_ref[...] * jnp.float32(-1e10)

    # ---- masked softmax over the sequence axis (exact denominator) ----
    scores = scores - jnp.max(scores, axis=-1, keepdims=True)
    es = jnp.exp(scores)
    a1 = es / jnp.sum(es, axis=-1, keepdims=True)             # (BB, S)

    # ---- weighted context sum (VPU mul + sublane reduce), one dense store ----
    cwv = jnp.sum(a1[:, :, None] * context, axis=1)           # (BB, H)
    # TODO(synk): for production H < 64 the (BB, 2H) store is lane-partial; fold
    # feature groups onto a >=128-wide lane dim (or emit a lane-dense slab) then.
    out_ref[...] = jnp.concatenate([cwv, aspect], axis=-1)    # (BB, 2H)


def _device_profile():
    """Per-generation (VMEM block budget in bytes, #TensorCores sharing the grid)."""
    kind = ""
    try:
        kind = jax.devices()[0].device_kind.lower()
    except Exception:
        pass
    if "v7" in kind:
        return 24 * 1024 * 1024, 2    # v7x: 64 MiB physical VMEM, 2 TCs share the grid
    if "v6" in kind:
        return 48 * 1024 * 1024, 1    # v6e: 128 MiB physical, 1 TC -> large blocks
    if "v5" in kind:
        return 12 * 1024 * 1024, 1    # v5e: 16 MiB default scoped VMEM, 1 TC
    return 12 * 1024 * 1024, 1        # unknown backend / interpret: conservative


def _row_bytes(lm1, S, H):
    # f32 bytes per batch row: h + h_T + two masks + output
    return 4 * ((lm1 + 1) * S * H + 2 * S + 2 * H)


def _choose_batch_block(B, lm1, S, H, vmem_budget_bytes, num_tensorcores):
    """Largest batch block that fits a double-buffered VMEM budget.

    On single-TensorCore chips (v5e/v6e) this collapses to grid=(1,) when
    possible (no per-step pipeline overhead).  On v7x it prefers a block size
    that leaves an even (TensorCore-balanced) number of grid steps.
    """
    cap = max(1, vmem_budget_bytes // (2 * _row_bytes(lm1, S, H)))   # 2x double-buffer
    # Candidates: divisors of B obeying the (8, 128) sublane rule for the 2-D
    # (BB, S) mask blocks (BB % 8 == 0, or the full batch).
    divisors = [d for d in range(1, B + 1)
                if B % d == 0 and (d == B or d % 8 == 0)]
    feasible = [d for d in divisors if d <= cap] or [min(divisors)]
    if num_tensorcores > 1:
        balanced = [d for d in feasible if (B // d) % num_tensorcores == 0]
        if balanced:
            return max(balanced)
    return max(feasible)


def time_wise_aspect_based_attn(h, h_T, asp_mask, score_mask, W, *,
                                batch_block=None, stream_dtype=jnp.float32):
    """Pallas implementation of TimeWiseAspectBasedAttn.forward."""
    Lm1, B, S, H = h.shape
    # h / h_T may be streamed in bf16 on v6e/v7x (halves HBM traffic; the kernel
    # always computes in f32).  Default f32 keeps numerics tight and suits v5e.
    h = h.astype(stream_dtype)
    h_T = h_T.astype(stream_dtype)
    W = W.astype(jnp.float32)
    asp_f = asp_mask.astype(jnp.float32)                    # (B, S), 0/1
    smask_f = score_mask[:, :, 0].astype(jnp.float32)       # (B, S), 0/1

    budget, num_tc = _device_profile()
    BB = batch_block if batch_block is not None else _choose_batch_block(
        B, Lm1, S, H, budget, num_tc)
    assert B % BB == 0, "batch block must divide the batch size"
    nb = B // BB

    # Explicit scoped-VMEM limit: double-buffered blocks + 2x W + headroom.
    vmem_limit = 2 * BB * _row_bytes(Lm1, S, H) + 2 * H * H * 4 + (4 << 20)
    vmem_limit = int(min(max(vmem_limit, 16 << 20), 100 << 20))

    out = pl.pallas_call(
        _attn_kernel,
        out_shape=jax.ShapeDtypeStruct((nb, BB, 2 * H), jnp.float32),
        grid=(nb,),
        in_specs=[
            pl.BlockSpec((Lm1, BB, S, H), lambda b: (0, b, 0, 0)),
            pl.BlockSpec((BB, S, H), lambda b: (b, 0, 0)),
            pl.BlockSpec((BB, S), lambda b: (b, 0)),
            pl.BlockSpec((BB, S), lambda b: (b, 0)),
            pl.BlockSpec((H, H), lambda b: (0, 0)),   # constant: W stays resident
        ],
        # Leading dim squeezed (None): one dense (BB, 2H) store per step.
        out_specs=pl.BlockSpec((None, BB, 2 * H), lambda b: (b, 0, 0)),
        compiler_params=pltpu.CompilerParams(
            dimension_semantics=("parallel",),
            vmem_limit_bytes=vmem_limit),
    )(h, h_T, asp_f, smask_f, W)
    return out.reshape(B, 2 * H)


def reference_forward(h, h_T, asp_mask, score_mask, W, hidden_dim):
    """Pure-JAX transcription of the PyTorch forward (ground truth)."""
    h_T_ = jnp.broadcast_to(h_T[None], h.shape)
    a0 = jnp.sum(h * h_T_, axis=-1, keepdims=True)
    a0 = jax.nn.softmax(a0, axis=0)
    h_weighted = jnp.sum(a0 * h, axis=0) + h_T
    asp_wn = asp_mask.sum(axis=1, keepdims=True)                      # (B, 1)
    asp_m = jnp.repeat(asp_mask[..., None], hidden_dim, axis=-1)      # (B, S, H)
    aspect = (h_weighted * asp_m).sum(axis=1) / asp_wn                # (B, H)
    context = h_weighted * (asp_m == 0).astype(jnp.float32)           # (B, S, H)
    a1 = jnp.matmul(aspect[:, None, :], W,
                    precision=jax.lax.Precision.HIGHEST)              # (B, 1, H)
    a1 = jnp.matmul(a1, jnp.swapaxes(context, 1, 2),
                    precision=jax.lax.Precision.HIGHEST)              # (B, 1, S)
    a1 = jnp.swapaxes(a1, 1, 2)                                       # (B, S, 1)
    a1 = jnp.where(score_mask[:, :, 0:1], jnp.float32(-1e10), a1)
    a1 = jax.nn.softmax(a1, axis=1)
    cwv = jnp.sum(a1 * context, axis=1)                               # (B, H)
    return jnp.concatenate([cwv, aspect], axis=-1)                    # (B, 2H)


if __name__ == "__main__":
    # Module hyperparameters (small, consistent with the forward pass).
    num_layers = 3          # -> h stacks num_layers - 1 = 2 layer outputs
    hidden_dim = 32
    B, S = 16, 16
    Lm1 = num_layers - 1

    key = jax.random.PRNGKey(0)
    k_w, k_h, k_ht, k_asp, k_sm = jax.random.split(key, 5)

    # Parameter: W ~ N(0, 1), shape (hidden_dim, hidden_dim) (as in __init__).
    W = jax.random.normal(k_w, (hidden_dim, hidden_dim), dtype=jnp.float32)

    h = jax.random.normal(k_h, (Lm1, B, S, hidden_dim), dtype=jnp.float32)
    h_T = jax.random.normal(k_ht, (B, S, hidden_dim), dtype=jnp.float32)

    # Aspect mask: 0/1 floats, at least one aspect token per batch row.
    asp_mask = (jax.random.uniform(k_asp, (B, S)) < 0.3).astype(jnp.float32)
    asp_mask = asp_mask.at[:, 0].set(1.0)

    # Score mask: bool (B, S, K); only the first column is used by forward().
    score_mask = jax.random.uniform(k_sm, (B, S, 3)) > 0.7
    score_mask = score_mask.at[:, 1, 0].set(False)  # keep >=1 unmasked position per row

    out = time_wise_aspect_based_attn(h, h_T, asp_mask, score_mask, W)
    out = jax.block_until_ready(out)

    ref = reference_forward(h, h_T, asp_mask, score_mask, W, hidden_dim)
    # Exact divisions + HIGHEST-precision bilinear matmul -> tight tolerance.
    np.testing.assert_allclose(np.asarray(out), np.asarray(ref), rtol=1e-3, atol=1e-3)

    print("KERNEL_OK")
</pallas_src>

<mosaic_0001>
module attributes {stable_mosaic.version = 11 : i64} {
  func.func @_attn_kernel(%arg0: i32, %arg1: memref<2x16x16x32xf32, #tpu.memory_space<vmem>>, %arg2: memref<16x16x32xf32, #tpu.memory_space<vmem>>, %arg3: memref<16x16xf32, #tpu.memory_space<vmem>>, %arg4: memref<16x16xf32, #tpu.memory_space<vmem>>, %arg5: memref<32x32xf32, #tpu.memory_space<vmem>>, %arg6: memref<1x16x64xf32, #tpu.memory_space<vmem>>) attributes {dimension_semantics = [#tpu.dimension_semantics<parallel>], iteration_bounds = array<i64: 1>, scalar_prefetch = 0 : i64, scratch_operands = 0 : i64, tpu.core_type = #tpu.core_type<tc>, window_params = [{transform_indices = @transform_0, window_bounds = array<i64: 2, 16, 16, 32>}, {transform_indices = @transform_1, window_bounds = array<i64: 16, 16, 32>}, {transform_indices = @transform_2, window_bounds = array<i64: 16, 16>}, {transform_indices = @transform_3, window_bounds = array<i64: 16, 16>}, {pipeline_mode = #tpu.pipeline_mode<synchronous>, transform_indices = @transform_4, window_bounds = array<i64: 32, 32>}, {transform_indices = @transform_5, window_bounds = array<i64: 1, 16, 64>}]} {
    %c0 = arith.constant 0 : index
    %c0_0 = arith.constant 0 : index
    %c0_1 = arith.constant 0 : index
    %c0_2 = arith.constant 0 : index
    %0 = vector.load %arg1[%c0, %c0_0, %c0_1, %c0_2] : memref<2x16x16x32xf32, #tpu.memory_space<vmem>>, vector<2x16x16x32xf32>
    %c0_3 = arith.constant 0 : index
    %c0_4 = arith.constant 0 : index
    %c0_5 = arith.constant 0 : index
    %1 = vector.load %arg2[%c0_3, %c0_4, %c0_5] : memref<16x16x32xf32, #tpu.memory_space<vmem>>, vector<16x16x32xf32>
    %2 = vector.shape_cast %1 : vector<16x16x32xf32> to vector<1x16x16x32xf32>
    %3 = vector.broadcast %2 : vector<1x16x16x32xf32> to vector<2x16x16x32xf32>
    %4 = arith.mulf %0, %3 : vector<2x16x16x32xf32>
    %cst = arith.constant dense<0.000000e+00> : vector<2x16x16xf32>
    %5 = vector.multi_reduction <add>, %4, %cst [3] : vector<2x16x16x32xf32> to vector<2x16x16xf32>
    %6 = vector.shape_cast %5 : vector<2x16x16xf32> to vector<2x16x16x1xf32>
    %cst_6 = arith.constant dense<0xFF800000> : vector<16x16x1xf32>
    %7 = vector.multi_reduction <maximumf>, %6, %cst_6 [0] : vector<2x16x16x1xf32> to vector<16x16x1xf32>
    %8 = vector.shape_cast %7 : vector<16x16x1xf32> to vector<1x16x16x1xf32>
    %9 = vector.broadcast %8 : vector<1x16x16x1xf32> to vector<2x16x16x1xf32>
    %10 = arith.subf %6, %9 : vector<2x16x16x1xf32>
    %11 = math.exp %10 : vector<2x16x16x1xf32>
    %cst_7 = arith.constant dense<0.000000e+00> : vector<16x16x1xf32>
    %12 = vector.multi_reduction <add>, %11, %cst_7 [0] : vector<2x16x16x1xf32> to vector<16x16x1xf32>
    %13 = vector.shape_cast %12 : vector<16x16x1xf32> to vector<1x16x16x1xf32>
    %14 = vector.broadcast %13 : vector<1x16x16x1xf32> to vector<2x16x16x1xf32>
    %15 = arith.divf %11, %14 : vector<2x16x16x1xf32>
    %16 = vector.broadcast %15 : vector<2x16x16x1xf32> to vector<2x16x16x32xf32>
    %17 = arith.mulf %16, %0 : vector<2x16x16x32xf32>
    %cst_8 = arith.constant dense<0.000000e+00> : vector<16x16x32xf32>
    %18 = vector.multi_reduction <add>, %17, %cst_8 [0] : vector<2x16x16x32xf32> to vector<16x16x32xf32>
    %19 = arith.addf %18, %1 : vector<16x16x32xf32>
    %c0_9 = arith.constant 0 : index
    %c0_10 = arith.constant 0 : index
    %20 = vector.load %arg3[%c0_9, %c0_10] : memref<16x16xf32, #tpu.memory_space<vmem>>, vector<16x16xf32>
    %21 = vector.shape_cast %20 : vector<16x16xf32> to vector<16x16x1xf32>
    %22 = vector.broadcast %21 : vector<16x16x1xf32> to vector<16x16x32xf32>
    %23 = arith.mulf %22, %19 : vector<16x16x32xf32>
    %cst_11 = arith.constant dense<0.000000e+00> : vector<16x32xf32>
    %24 = vector.multi_reduction <add>, %23, %cst_11 [1] : vector<16x16x32xf32> to vector<16x32xf32>
    %cst_12 = arith.constant dense<0.000000e+00> : vector<16xf32>
    %25 = vector.multi_reduction <add>, %20, %cst_12 [1] : vector<16x16xf32> to vector<16xf32>
    %26 = vector.shape_cast %25 : vector<16xf32> to vector<16x1xf32>
    %27 = vector.broadcast %26 : vector<16x1xf32> to vector<16x32xf32>
    %28 = arith.divf %24, %27 : vector<16x32xf32>
    %cst_13 = arith.constant 0.000000e+00 : f32
    %29 = vector.broadcast %cst_13 : f32 to vector<16x16xf32>
    %30 = arith.cmpf oeq, %20, %29 : vector<16x16xf32>
    %31 = arith.extui %30 : vector<16x16xi1> to vector<16x16xi32>
    %32 = arith.sitofp %31 : vector<16x16xi32> to vector<16x16xf32>
    %33 = vector.shape_cast %32 : vector<16x16xf32> to vector<16x16x1xf32>
    %34 = vector.broadcast %33 : vector<16x16x1xf32> to vector<16x16x32xf32>
    %35 = arith.mulf %19, %34 : vector<16x16x32xf32>
    %c0_14 = arith.constant 0 : index
    %c0_15 = arith.constant 0 : index
    %36 = vector.load %arg5[%c0_14, %c0_15] : memref<32x32xf32, #tpu.memory_space<vmem>>, vector<32x32xf32>
    %cst_16 = arith.constant dense<0.000000e+00> : vector<16x32xf32>
    %37 = tpu.matmul %28, %36, %cst_16 {dimension_numbers = #tpu.dot_dimension_numbers<[1], [0], [0], [1], [0, 0, 1, 1], [], []>, precision = #tpu.contract_precision<fp32>} : vector<16x32xf32>, vector<32x32xf32>, vector<16x32xf32> -> vector<16x32xf32>
    %38 = vector.shape_cast %37 : vector<16x32xf32> to vector<16x1x32xf32>
    %39 = vector.broadcast %38 : vector<16x1x32xf32> to vector<16x16x32xf32>
    %40 = arith.mulf %35, %39 : vector<16x16x32xf32>
    %cst_17 = arith.constant dense<0.000000e+00> : vector<16x16xf32>
    %41 = vector.multi_reduction <add>, %40, %cst_17 [2] : vector<16x16x32xf32> to vector<16x16xf32>
    %c0_18 = arith.constant 0 : index
    %c0_19 = arith.constant 0 : index
    %42 = vector.load %arg4[%c0_18, %c0_19] : memref<16x16xf32, #tpu.memory_space<vmem>>, vector<16x16xf32>
    %cst_20 = arith.constant -1.000000e+10 : f32
    %43 = vector.broadcast %cst_20 : f32 to vector<16x16xf32>
    %44 = arith.mulf %42, %43 : vector<16x16xf32>
    %45 = arith.addf %41, %44 : vector<16x16xf32>
    %cst_21 = arith.constant dense<0xFF800000> : vector<16xf32>
    %46 = vector.multi_reduction <maximumf>, %45, %cst_21 [1] : vector<16x16xf32> to vector<16xf32>
    %47 = vector.shape_cast %46 : vector<16xf32> to vector<16x1xf32>
    %48 = vector.broadcast %47 : vector<16x1xf32> to vector<16x16xf32>
    %49 = arith.subf %45, %48 : vector<16x16xf32>
    %50 = math.exp %49 : vector<16x16xf32>
    %cst_22 = arith.constant dense<0.000000e+00> : vector<16xf32>
    %51 = vector.multi_reduction <add>, %50, %cst_22 [1] : vector<16x16xf32> to vector<16xf32>
    %52 = vector.shape_cast %51 : vector<16xf32> to vector<16x1xf32>
    %53 = vector.broadcast %52 : vector<16x1xf32> to vector<16x16xf32>
    %54 = arith.divf %50, %53 : vector<16x16xf32>
    %55 = vector.shape_cast %54 : vector<16x16xf32> to vector<16x16x1xf32>
    %56 = vector.broadcast %55 : vector<16x16x1xf32> to vector<16x16x32xf32>
    %57 = arith.mulf %56, %35 : vector<16x16x32xf32>
    %cst_23 = arith.constant dense<0.000000e+00> : vector<16x32xf32>
    %58 = vector.multi_reduction <add>, %57, %cst_23 [1] : vector<16x16x32xf32> to vector<16x32xf32>
    %59 = tpu.concatenate %58, %28 in 1 : vector<16x32xf32>, vector<16x32xf32> -> vector<16x64xf32>
    %c0_24 = arith.constant 0 : index
    %c0_25 = arith.constant 0 : index
    %c0_26 = arith.constant 0 : index
    %60 = vector.load %arg6[%c0_24, %c0_25, %c0_26] : memref<1x16x64xf32, #tpu.memory_space<vmem>>, vector<1x16x64xf32>
    %61 = vector.shape_cast %60 : vector<1x16x64xf32> to vector<16x64xf32>
    %62 = vector.shape_cast %59 : vector<16x64xf32> to vector<1x16x64xf32>
    tpu.vector_store %arg6[%c0_24, %c0_25, %c0_26], %62 {strides = array<i32>} : memref<1x16x64xf32, #tpu.memory_space<vmem>>, vector<1x16x64xf32>,
    return
  }
  func.func @transform_0(%arg0: i32) -> (i32, i32, i32, i32) {
    %c0_i32 = arith.constant 0 : i32
    %c0_i32_0 = arith.constant 0 : i32
    %c0_i32_1 = arith.constant 0 : i32
    %c0_i32_2 = arith.constant 0 : i32
    return %c0_i32, %arg0, %c0_i32_0, %c0_i32_1 : i32, i32, i32, i32
  }
  func.func @transform_1(%arg0: i32) -> (i32, i32, i32) {
    %c0_i32 = arith.constant 0 : i32
    %c0_i32_0 = arith.constant 0 : i32
    %c0_i32_1 = arith.constant 0 : i32
    return %arg0, %c0_i32, %c0_i32_0 : i32, i32, i32
  }
  func.func @transform_2(%arg0: i32) -> (i32, i32) {
    %c0_i32 = arith.constant 0 : i32
    %c0_i32_0 = arith.constant 0 : i32
    return %arg0, %c0_i32 : i32, i32
  }
  func.func @transform_3(%arg0: i32) -> (i32, i32) {
    %c0_i32 = arith.constant 0 : i32
    %c0_i32_0 = arith.constant 0 : i32
    return %arg0, %c0_i32 : i32, i32
  }
  func.func @transform_4(%arg0: i32) -> (i32, i32) {
    %c0_i32 = arith.constant 0 : i32
    %c0_i32_0 = arith.constant 0 : i32
    %c0_i32_1 = arith.constant 0 : i32
    return %c0_i32, %c0_i32_0 : i32, i32
  }
  func.func @transform_5(%arg0: i32) -> (i32, i32, i32) {
    %c0_i32 = arith.constant 0 : i32
    %c0_i32_0 = arith.constant 0 : i32
    %c0_i32_1 = arith.constant 0 : i32
    return %arg0, %c0_i32, %c0_i32_0 : i32, i32, i32
  }
}

</mosaic_0001>

<bundles_post_ra>
// kernel: tpu_custom_call.1
= control target key start
LH: loop header
LB: loop body
LE: loop exit
PB: predicated region body
PF: predicated region fallthrough
CT: control target
= control target key end

     0   :  { %10 = vsyncpa [#allocation3], 0  ;;  %s7084_s0 = inlined_call_operand.hbm [shape: f32[2,16,16,32], index: 0, kind: input, shape index: {}]   ;;  %s7085_s1 = inlined_call_operand.hbm [shape: f32[16,16,32], index: 1, kind: input, shape index: {}]   ;;  %s7086_s2 = inlined_call_operand.hbm [shape: f32[16,16], index: 2, kind: input, shape index: {}]   ;;  %s7087_s3 = inlined_call_operand.hbm [shape: f32[16,16], index: 3, kind: input, shape index: {}]   ;;  %s7088_s4 = inlined_call_operand.hbm [shape: f32[32,32], index: 4, kind: input, shape index: {}]   ;;  %s7089_s5 = inlined_call_operand.hbm [shape: f32[1,16,64], index: 5, kind: output, shape index: {}]  }
   0x1   :  { %11 = vsyncpa [#allocation6], 0 }
   0x2   :  { %12 = vsyncpa [#allocation9], 0 }
   0x3   :  { %13 = vsyncpa [#allocation4], 0  ;;  %s4725_s18 = smov [#allocation5]   ;;  %s4726_s20 = smov [#allocation8]  }
   0x4   :  { %s31_s19 = sshll.u32 %s4725_s18, 4  ;;  %s55_s21 = sshll.u32 %s4726_s20, 4  ;;  %s32_s19 = int_to_ptr.vmem [resolvable:$true] %s31_s19  ;;  %s56_s21 = int_to_ptr.vmem [resolvable:$true] %s55_s21 }
   0x5   :  { %s4605_s22 = scalar_lea.vmem %s32_s19, 4096  ;;  %p4610_p1 = scmp.lt.s32.totalorder %s32_s19, %s32_s19 }
   0x6   :  { %p4606_p0 = scmp.ne.s32.totalorder %s32_s19, %s4605_s22  ;;  %p4611_p2 = scmp.lt.s32.totalorder %s4605_s22, %s4605_s22 }
   0x8   :  { %p4612_p3 = por %p4611_p2, %p4610_p1 }
   0xa   :  { %p4613_p4 = pnand %p4612_p3, %p4606_p0 }
   0xc   :  { %4616 = shalt.err (!%p4613_p4)
}
   0xd   :  { %s4727_s23 = smov 128   ;;  %s4728_s24 = smov 8  }
   0xe   :  { %37 = dma.hbm_to_vmem [thread:$0]  %s7085_s1, 4096, %s32_s19, [#allocation6], %s4727_s23, %s4727_s23, %s4728_s24  }
   0xf   :  { %s4625_s27 = scalar_lea.vmem %s56_s21, 256  ;;  %p4630_p6 = scmp.lt.s32.totalorder %s56_s21, %s56_s21 }
  0x10   :  { %p4626_p5 = scmp.ne.s32.totalorder %s56_s21, %s4625_s27  ;;  %p4631_p7 = scmp.lt.s32.totalorder %s4625_s27, %s4625_s27 }
  0x12   :  { %p4632_p8 = por %p4631_p7, %p4630_p6 }
  0x14   :  { %p4633_p9 = pnand %p4632_p8, %p4626_p5 }
  0x16   :  { %4636 = shalt.err (!%p4633_p9)
}
  0x17   :  { %61 = dma.hbm_to_vmem [thread:$0]  %s7087_s3, 256, %s56_s21, [#allocation9], %s4727_s23, %s4727_s23, %s4728_s24  }
  0x18   :  { %s4729_s30 = smov [#allocation2]   ;;  %s4730_s7 = smov [#allocation7]  }
  0x19   :  { %s19_s6 = sshll.u32 %s4729_s30, 4  ;;  %s43_s8 = sshll.u32 %s4730_s7, 4  ;;  %s20_s6 = int_to_ptr.vmem [resolvable:$true] %s19_s6  ;;  %s44_s8 = int_to_ptr.vmem [resolvable:$true] %s43_s8 }
  0x1a   :  { %s4645_s1 = scalar_lea.vmem %s20_s6, 8192  ;;  %p4650_p11 = scmp.lt.s32.totalorder %s20_s6, %s20_s6 }
  0x1b   :  { %p4646_p10 = scmp.ne.s32.totalorder %s20_s6, %s4645_s1  ;;  %p4651_p12 = scmp.lt.s32.totalorder %s4645_s1, %s4645_s1 }
  0x1d   :  { %p4652_p13 = por %p4651_p12, %p4650_p11 }
  0x1f   :  { %p4653_p0 = pnand %p4652_p13, %p4646_p10 }
  0x21   :  { %4656 = shalt.err (!%p4653_p0)
}
  0x22   :  { %25 = dma.hbm_to_vmem [thread:$0]  %s7084_s0, 8192, %s20_s6, [#allocation3], %s4727_s23, %s4727_s23, %s4728_s24  }
  0x23   :  { %s4665_s3 = scalar_lea.vmem %s44_s8, 256  ;;  %p4670_p2 = scmp.lt.s32.totalorder %s44_s8, %s44_s8 }
  0x24   :  { %p4666_p1 = scmp.ne.s32.totalorder %s44_s8, %s4665_s3  ;;  %p4671_p3 = scmp.lt.s32.totalorder %s4665_s3, %s4665_s3 }
  0x26   :  { %p4672_p4 = por %p4671_p3, %p4670_p2 }
  0x28   :  { %p4673_p5 = pnand %p4672_p4, %p4666_p1 }
  0x2a   :  { %4676 = shalt.err (!%p4673_p5)
}
  0x2b   :  { %49 = dma.hbm_to_vmem [thread:$0]  %s7086_s2, 256, %s44_s8, [#allocation6], %s4727_s23, %s4727_s23, %s4728_s24  }
  0x2c   :  { %s4731_s13 = smov [#allocation10]  }
  0x2d   :  { %s67_s14 = sshll.u32 %s4731_s13, 4  ;;  %s68_s14 = int_to_ptr.vmem [resolvable:$true] %s67_s14 }
  0x2e   :  { %s4685_s15 = scalar_lea.vmem %s68_s14, 512  ;;  %p4690_p7 = scmp.lt.s32.totalorder %s68_s14, %s68_s14 }
  0x2f   :  { %p4686_p6 = scmp.ne.s32.totalorder %s68_s14, %s4685_s15  ;;  %p4691_p8 = scmp.lt.s32.totalorder %s4685_s15, %s4685_s15 }
  0x31   :  { %p4692_p9 = por %p4691_p8, %p4690_p7 }
  0x33   :  { %p4693_p10 = pnand %p4692_p9, %p4686_p6 }
  0x35   :  { %4696 = shalt.err (!%p4693_p10)
}
  0x36   :  { %73 = dma.hbm_to_vmem [thread:$0]  %s7088_s4, 512, %s68_s14, [#allocation9], %s4727_s23, %s4727_s23, %s4728_s24  }
  0x37   :  { %4717 = dma.done.wait [#allocation3], 8192  }
  0x38   :  { %4718 = vsyncadd [#allocation3], 4294959104 }
  0x39   :  { %4719 = dma.done.wait [#allocation6], 4352  }
  0x3a   :  { %4720 = vsyncadd [#allocation6], 4294962944 }
  0x3b   :  { %4721 = dma.done.wait [#allocation9], 768  }
  0x3c   :  { %4722 = vsyncadd [#allocation9], 4294966528  ;;  %v91_v0 = vld [vmem:[#allocation2 + $0x10] sm:$0xff]  ;;  %vm249_vm0 = vcmask 261120   ;;  %v89_v2 = vld [vmem:[#allocation2] sm:$0xff]  ;;  %vm1340_vm1 = vcmask 130048  }
  0x3d   :  { %v4797_v1 = vld [vmem:[#allocation5 + $0x10] sm:$0xff]  ;;  %v4800_v4 = vld [vmem:[#allocation5] sm:$0xff]  ;;  %v92_v5 = vld [vmem:[#allocation2 + $0x18] sm:$0xff]  ;;  %vm1646_vm4 = vcmask 1041409   ;;  %vm1649_vm5 = vcmask 1042434   ;;  %vm1652_vm6 = vcmask 1043459  }
  0x3e   :  { %v187_v3 = vmul.f32 %v4797_v1, %v91_v0  ;;  %v4802_v6 = vld [vmem:[#allocation5 + $0x18] sm:$0xff]  ;;  %v185_v7 = vmul.f32 %v4800_v4, %v89_v2  ;;  %v90_v9 = vld [vmem:[#allocation2 + $0x8] sm:$0xff]  ;;  %v93_v15 = vld [vmem:[#allocation2 + $0x20] sm:$0xff]  ;;  %vm1655_vm7 = vcmask 1044484   ;;  %vm1658_vm8 = vcmask 1045509   ;;  %s4735_s2 = smov 32  }
  0x3f   :  { %v188_v8 = vmul.f32 %v4802_v6, %v92_v5  ;;  %v4806_v10 = vld [vmem:[#allocation5 + $0x8] sm:$0xff]  ;;  %v4812_v16 = vld [vmem:[#allocation5 + $0x20] sm:$0xff]  ;;  %v96_v22 = vld [vmem:[#allocation2 + $0x38] sm:$0xff]  ;;  %vm1661_vm9 = vcmask 1046534   ;;  %vm1664_vm10 = vcmask 1047559   ;;  %vm2905_vm11 = vcmask 130112  }
  0x40   :  { %v94_v11 = vld [vmem:[#allocation2 + $0x28] sm:$0xff]  ;;  %v256_v12 = vsel %vm249_vm0, %v187_v3, 0.0  ;;  %v186_v13 = vmul.f32 %v4806_v10, %v90_v9  ;;  %v250_v17 = vsel %vm249_vm0, %v185_v7, 0.0  ;;  %v189_v21 = vmul.f32 %v4812_v16, %v93_v15  ;;  %v4819_v23 = vld [vmem:[#allocation5 + $0x38] sm:$0xff]  ;;  %v95_v24 = vld [vmem:[#allocation2 + $0x30] sm:$0xff]  ;;  %s4736_s4 = smov [#allocation11]  }
  0x41   :  { %v4810_v14 = vld [vmem:[#allocation5 + $0x28] sm:$0xff]  ;;  %257 = vadd.xlane.f32.xlu1 %v256_v12  ;;  %251 = vadd.xlane.f32.xlu0 %v250_v17  ;;  %v259_v18 = vsel %vm249_vm0, %v188_v8, 0.0  ;;  %v4821_v25 = vld [vmem:[#allocation5 + $0x30] sm:$0xff]  ;;  %v192_v27 = vmul.f32 %v4819_v23, %v96_v22  ;;  %v97_v32 = vld [vmem:[#allocation2 + $0x40] sm:$0xff]  ;;  %vm4042_vm12 = vcmask 523264   ;;  %s4050_s17 = sshll.u32 %s4736_s4, 4  ;;  %s4051_s17 = int_to_ptr.vmem [resolvable:$true] %s4050_s17 }
  0x42   :  { %v190_v19 = vmul.f32 %v4810_v14, %v94_v11  ;;  %v253_v20 = vsel %vm249_vm0, %v186_v13, 0.0  ;;  %v262_v28 = vsel %vm249_vm0, %v189_v21, 0.0  ;;  %v191_v29 = vmul.f32 %v4821_v25, %v95_v24  ;;  %v98_v30 = vld [vmem:[#allocation2 + $0x48] sm:$0xff]  ;;  %v4829_v33 = vld [vmem:[#allocation5 + $0x40] sm:$0xff]  ;;  %v100_v38 = vld [vmem:[#allocation2 + $0x58] sm:$0xff]  ;;  %s4697_s18 = scalar_lea.vmem %s4051_s17, 256  ;;  %p4702_p12 = scmp.lt.s32.totalorder %s4051_s17, %s4051_s17 }
  0x43   :  { %v4827_v31 = vld [vmem:[#allocation5 + $0x48] sm:$0xff]  ;;  %v271_v34 = vsel %vm249_vm0, %v192_v27, 0.0  ;;  %v193_v37 = vmul.f32 %v4829_v33, %v97_v32  ;;  %v4835_v39 = vld [vmem:[#allocation5 + $0x58] sm:$0xff]  ;;  %v99_v40 = vld [vmem:[#allocation2 + $0x50] sm:$0xff]  ;;  %p4698_p11 = scmp.ne.s32.totalorder %s4051_s17, %s4697_s18  ;;  %p4703_p13 = scmp.lt.s32.totalorder %s4697_s18, %s4697_s18 }
  0x44   :  { %v265_v26 = vsel %vm249_vm0, %v190_v19, 0.0  ;;  %v194_v35 = vmul.f32 %v4827_v31, %v98_v30  ;;  %v268_v36 = vsel %vm249_vm0, %v191_v29, 0.0  ;;  %v4837_v41 = vld [vmem:[#allocation5 + $0x50] sm:$0xff]  ;;  %v196_v43 = vmul.f32 %v4835_v39, %v100_v38  ;;  %v102_v46 = vld [vmem:[#allocation2 + $0x68] sm:$0xff]  ;;  %v101_v48 = vld [vmem:[#allocation2 + $0x60] sm:$0xff] }
  0x45   :  { %260 = vadd.xlane.f32.xlu1 %v259_v18  ;;  %254 = vadd.xlane.f32.xlu0 %v253_v20  ;;  %v274_v44 = vsel %vm249_vm0, %v193_v37, 0.0  ;;  %v195_v45 = vmul.f32 %v4837_v41, %v99_v40  ;;  %v4843_v47 = vld [vmem:[#allocation5 + $0x68] sm:$0xff]  ;;  %v4845_v49 = vld [vmem:[#allocation5 + $0x60] sm:$0xff]  ;;  %v104_v54 = vld [vmem:[#allocation2 + $0x78] sm:$0xff]  ;;  %p4704_p0 = por %p4703_p13, %p4702_p12 }
  0x46   :  { %v277_v42 = vsel %vm249_vm0, %v194_v35, 0.0  ;;  %v283_v50 = vsel %vm249_vm0, %v196_v43, 0.0  ;;  %v198_v51 = vmul.f32 %v4843_v47, %v102_v46  ;;  %v197_v53 = vmul.f32 %v4845_v49, %v101_v48  ;;  %v4851_v55 = vld [vmem:[#allocation5 + $0x78] sm:$0xff]  ;;  %v103_v56 = vld [vmem:[#allocation2 + $0x70] sm:$0xff]  ;;  %v106_v62 = vld [vmem:[#allocation2 + $0x88] sm:$0xff] }
  0x47   :  { %v280_v52 = vsel %vm249_vm0, %v195_v45, 0.0  ;;  %v4853_v57 = vld [vmem:[#allocation5 + $0x70] sm:$0xff]  ;;  %v200_v59 = vmul.f32 %v4851_v55, %v104_v54  ;;  %v4859_v63 = vld [vmem:[#allocation5 + $0x88] sm:$0xff]  ;;  %v105_v0 = vld [vmem:[#allocation2 + $0x80] sm:$0xff]  ;;  %p4705_p1 = pnand %p4704_p0, %p4698_p11 }
  0x48   :  { %v289_v58 = vsel %vm249_vm0, %v198_v51, 0.0  ;;  %v286_v60 = vsel %vm249_vm0, %v197_v53, 0.0  ;;  %v199_v61 = vmul.f32 %v4853_v57, %v103_v56  ;;  %v4861_v2 = vld [vmem:[#allocation5 + $0x80] sm:$0xff]  ;;  %v202_v5 = vmul.f32 %v4859_v63, %v106_v62  ;;  %v4867_v9 = vld [vmem:[#allocation2 + $0x118] sm:$0xff]  ;;  %v123_v11 = vld [vmem:[#allocation2 + $0x110] sm:$0xff] }
  0x49   :  { %266 = vadd.xlane.f32.xlu1 %v265_v26  ;;  %263 = vadd.xlane.f32.xlu0 %v262_v28  ;;  %v295_v3 = vsel %vm249_vm0, %v200_v59, 0.0  ;;  %v201_v8 = vmul.f32 %v4861_v2, %v105_v0  ;;  %v220_v13 = vmul.f32 %v4802_v6, %v4867_v9  ;;  %v219_v17 = vmul.f32 %v4797_v1, %v123_v11  ;;  %v108_v18 = vld [vmem:[#allocation2 + $0x98] sm:$0xff]  ;;  %v107_v20 = vld [vmem:[#allocation2 + $0x90] sm:$0xff]  ;;  %v126_v28 = vld [vmem:[#allocation2 + $0x128] sm:$0xff] }
  0x4a   :  { %v292_v7 = vsel %vm249_vm0, %v199_v61, 0.0  ;;  %v301_v12 = vsel %vm249_vm0, %v202_v5, 0.0  ;;  %v172_v19 = vld [vmem:[#allocation5 + $0x98] sm:$0xff]  ;;  %v171_v21 = vld [vmem:[#allocation5 + $0x90] sm:$0xff]  ;;  %v125_v29 = vld [vmem:[#allocation2 + $0x120] sm:$0xff]  ;;  %v222_v1 = vmul.f32 %v4810_v14, %v126_v28 }
  0x4b   :  { %v298_v15 = vsel %vm249_vm0, %v201_v8, 0.0  ;;  %v355_v22 = vsel %vm249_vm0, %v220_v13, 0.0  ;;  %v204_v24 = vmul.f32 %v172_v19, %v108_v18  ;;  %v352_v26 = vsel %vm249_vm0, %v219_v17, 0.0  ;;  %v139_v35 = vld [vmem:[#allocation2 + $0x190] sm:$0xff]  ;;  %v174_v43 = vld [vmem:[#allocation5 + $0xa8] sm:$0xff]  ;;  %v173_v45 = vld [vmem:[#allocation5 + $0xa0] sm:$0xff] }
  0x4c   :  { %v203_v27 = vmul.f32 %v171_v21, %v107_v20  ;;  %v221_v32 = vmul.f32 %v4812_v16, %v125_v29  ;;  %v235_v40 = vmul.f32 %v171_v21, %v139_v35  ;;  %v121_v51 = vld [vmem:[#allocation2 + $0x100] sm:$0xff]  ;;  %v127_v59 = vld [vmem:[#allocation2 + $0x130] sm:$0xff]  ;;  %v112_v11 = vld [vmem:[#allocation2 + $0xb8] sm:$0xff] }
  0x4d   :  { %272 = vadd.xlane.f32.xlu1 %v271_v34  ;;  %269 = vadd.xlane.f32.xlu0 %v268_v36  ;;  %v307_v6 = vsel %vm249_vm0, %v204_v24, 0.0  ;;  %v140_v34 = vld [vmem:[#allocation2 + $0x198] sm:$0xff]  ;;  %v361_v36 = vsel %vm249_vm0, %v222_v1, 0.0  ;;  %v217_v56 = vmul.f32 %v4800_v4, %v121_v51  ;;  %v223_v0 = vmul.f32 %v4821_v25, %v127_v59  ;;  %v141_v5 = vld [vmem:[#allocation2 + $0x1a0] sm:$0xff]  ;;  %v111_v13 = vld [vmem:[#allocation2 + $0xb0] sm:$0xff] }
  0x4e   :  { %v304_v30 = vsel %vm249_vm0, %v203_v27, 0.0  ;;  %v236_v37 = vmul.f32 %v172_v19, %v140_v34  ;;  %v358_v38 = vsel %vm249_vm0, %v221_v32, 0.0  ;;  %v400_v16 = vsel %vm249_vm0, %v235_v40, 0.0  ;;  %v130_v19 = vld [vmem:[#allocation2 + $0x148] sm:$0xff]  ;;  %v129_v20 = vld [vmem:[#allocation2 + $0x140] sm:$0xff]  ;;  %v144_v32 = vld [vmem:[#allocation2 + $0x1b8] sm:$0xff] }
  0x4f   :  { %v346_v62 = vsel %vm249_vm0, %v217_v56, 0.0  ;;  %v364_v4 = vsel %vm249_vm0, %v223_v0, 0.0  ;;  %v237_v8 = vmul.f32 %v173_v45, %v141_v5  ;;  %v138_v27 = vld [vmem:[#allocation2 + $0x188] sm:$0xff]  ;;  %v137_v28 = vld [vmem:[#allocation2 + $0x180] sm:$0xff]  ;;  %v143_v34 = vld [vmem:[#allocation2 + $0x1b0] sm:$0xff] }
  0x50   :  { %v403_v14 = vsel %vm249_vm0, %v236_v37, 0.0  ;;  %v114_v37 = vld [vmem:[#allocation2 + $0xc8] sm:$0xff]  ;;  %v113_v40 = vld [vmem:[#allocation2 + $0xc0] sm:$0xff]  ;;  %v116_v59 = vld [vmem:[#allocation2 + $0xd8] sm:$0xff] }
  0x51   :  { %278 = vadd.xlane.f32.xlu1 %v277_v42  ;;  %275 = vadd.xlane.f32.xlu0 %v274_v44  ;;  %v110_v42 = vld [vmem:[#allocation2 + $0xa8] sm:$0xff]  ;;  %v109_v44 = vld [vmem:[#allocation2 + $0xa0] sm:$0xff]  ;;  %v406_v25 = vsel %vm249_vm0, %v237_v8, 0.0 }
  0x52   :  { %v206_v46 = vmul.f32 %v174_v43, %v110_v42  ;;  %v205_v48 = vmul.f32 %v173_v45, %v109_v44  ;;  %v177_v42 = vld [vmem:[#allocation5 + $0xc0] sm:$0xff]  ;;  %v132_v45 = vld [vmem:[#allocation2 + $0x158] sm:$0xff]  ;;  %v146_v51 = vld [vmem:[#allocation2 + $0x1c8] sm:$0xff] }
  0x53   :  { %v209_v44 = vmul.f32 %v177_v42, %v113_v40  ;;  %v134_v5 = vld [vmem:[#allocation2 + $0x168] sm:$0xff]  ;;  %v183_v40 = vld [vmem:[#allocation5 + $0xf0] sm:$0xff] }
  0x54   :  { %v310_v54 = vsel %vm249_vm0, %v205_v48, 0.0 }
  0x55   :  { %284 = vadd.xlane.f32.xlu1 %v283_v50  ;;  %281 = vadd.xlane.f32.xlu0 %v280_v52  ;;  %v122_v50 = vld [vmem:[#allocation2 + $0x108] sm:$0xff]  ;;  %v313_v52 = vsel %vm249_vm0, %v206_v46, 0.0  ;;  %v322_v48 = vsel %vm249_vm0, %v209_v44, 0.0 }
  0x56   :  { %v218_v53 = vmul.f32 %v4806_v10, %v122_v50 }
  0x59   :  { %290 = vadd.xlane.f32.xlu1 %v289_v58  ;;  %287 = vadd.xlane.f32.xlu0 %v286_v60  ;;  %v128_v58 = vld [vmem:[#allocation2 + $0x138] sm:$0xff]  ;;  %v349_v60 = vsel %vm249_vm0, %v218_v53, 0.0 }
  0x5a   :  { %v224_v61 = vmul.f32 %v4819_v23, %v128_v58 }
  0x5c   :  { %v367_v10 = vsel %vm249_vm0, %v224_v61, 0.0  ;;  %v115_v61 = vld [vmem:[#allocation2 + $0xd0] sm:$0xff] }
  0x5d   :  { %296 = vadd.xlane.f32.xlu1 %v295_v3  ;;  %293 = vadd.xlane.f32.xlu0 %v292_v7  ;;  %v142_v3 = vld [vmem:[#allocation2 + $0x1a8] sm:$0xff] }
  0x5e   :  { %v238_v7 = vmul.f32 %v174_v43, %v142_v3 }
  0x60   :  { %v409_v23 = vsel %vm249_vm0, %v238_v7, 0.0 }
  0x61   :  { %302 = vadd.xlane.f32.xlu1 %v301_v12  ;;  %299 = vadd.xlane.f32.xlu0 %v298_v15  ;;  %v176_v12 = vld [vmem:[#allocation5 + $0xb8] sm:$0xff]  ;;  %v175_v15 = vld [vmem:[#allocation5 + $0xb0] sm:$0xff] }
  0x62   :  { %v208_v17 = vmul.f32 %v176_v12, %v112_v11  ;;  %v207_v18 = vmul.f32 %v175_v15, %v111_v13  ;;  %v240_v35 = vmul.f32 %v176_v12, %v144_v32  ;;  %v148_v12 = vld [vmem:[#allocation2 + $0x1d8] sm:$0xff]  ;;  %v147_v13 = vld [vmem:[#allocation2 + $0x1d0] sm:$0xff]  ;;  %v149_v32 = vld [vmem:[#allocation2 + $0x1e0] sm:$0xff] }
  0x64   :  { %v319_v21 = vsel %vm249_vm0, %v208_v17, 0.0  ;;  %v316_v24 = vsel %vm249_vm0, %v207_v18, 0.0  ;;  %v118_v18 = vld [vmem:[#allocation2 + $0xe8] sm:$0xff] }
  0x65   :  { %356 = vadd.xlane.f32.xlu1 %v355_v22  ;;  %353 = vadd.xlane.f32.xlu0 %v352_v26  ;;  %v226_v22 = vmul.f32 %v4827_v31, %v130_v19  ;;  %v225_v26 = vmul.f32 %v4829_v33, %v129_v20  ;;  %v182_v19 = vld [vmem:[#allocation5 + $0xe8] sm:$0xff]  ;;  %v117_v20 = vld [vmem:[#allocation2 + $0xe0] sm:$0xff] }
  0x67   :  { %v373_v29 = vsel %vm249_vm0, %v226_v22, 0.0  ;;  %v370_v1 = vsel %vm249_vm0, %v225_v26, 0.0  ;;  %v214_v22 = vmul.f32 %v182_v19, %v118_v18  ;;  %v136_v26 = vld [vmem:[#allocation2 + $0x178] sm:$0xff] }
  0x69   :  { %308 = vadd.xlane.f32.xlu1 %v307_v6  ;;  %305 = vadd.xlane.f32.xlu0 %v304_v30  ;;  %v234_v6 = vmul.f32 %v4859_v63, %v138_v27  ;;  %v233_v30 = vmul.f32 %v4861_v2, %v137_v28  ;;  %v415_v63 = vsel %vm249_vm0, %v240_v35, 0.0  ;;  %v135_v27 = vld [vmem:[#allocation2 + $0x170] sm:$0xff]  ;;  %v337_v28 = vsel %vm249_vm0, %v214_v22, 0.0 }
  0x6b   :  { %v397_v31 = vsel %vm249_vm0, %v234_v6, 0.0  ;;  %v394_v33 = vsel %vm249_vm0, %v233_v30, 0.0  ;;  %v150_v30 = vld [vmem:[#allocation2 + $0x1e8] sm:$0xff] }
  0x6d   :  { %362 = vadd.xlane.f32.xlu1 %v361_v36  ;;  %359 = vadd.xlane.f32.xlu0 %v358_v38  ;;  %v239_v36 = vmul.f32 %v175_v15, %v143_v34  ;;  %v178_v38 = vld [vmem:[#allocation5 + $0xc8] sm:$0xff] }
  0x6e   :  { %v210_v43 = vmul.f32 %v178_v38, %v114_v37  ;;  %v184_v37 = vld [vmem:[#allocation5 + $0xf8] sm:$0xff] }
  0x6f   :  { %v412_v2 = vsel %vm249_vm0, %v239_v36, 0.0  ;;  %v120_v36 = vld [vmem:[#allocation2 + $0xf8] sm:$0xff] }
  0x70   :  { %v325_v46 = vsel %vm249_vm0, %v210_v43, 0.0  ;;  %v152_v43 = vld [vmem:[#allocation2 + $0x1f8] sm:$0xff] }
  0x71   :  { %404 = vadd.xlane.f32.xlu1 %v403_v14  ;;  %401 = vadd.xlane.f32.xlu0 %v400_v16  ;;  %v131_v14 = vld [vmem:[#allocation2 + $0x150] sm:$0xff]  ;;  %v228_v16 = vmul.f32 %v4835_v39, %v132_v45  ;;  %v248_v45 = vmul.f32 %v184_v37, %v152_v43 }
  0x72   :  { %v227_v50 = vmul.f32 %v4837_v41, %v131_v14 }
  0x73   :  { %v379_v53 = vsel %vm249_vm0, %v228_v16, 0.0  ;;  %v439_v16 = vsel %vm249_vm0, %v248_v45, 0.0 }
  0x74   :  { %v376_v56 = vsel %vm249_vm0, %v227_v50, 0.0  ;;  %v4936_v50 = vld [vmem:[#allocation7 + $0x8] sm:$0xff] }
  0x75   :  { %314 = vadd.xlane.f32.xlu1 %v313_v52  ;;  %311 = vadd.xlane.f32.xlu0 %v310_v54  ;;  %v145_v52 = vld [vmem:[#allocation2 + $0x1c0] sm:$0xff]  ;;  %v242_v54 = vmul.f32 %v178_v38, %v146_v51  ;;  %v119_v38 = vld [vmem:[#allocation2 + $0xf0] sm:$0xff]  ;;  %vm1412_vm3 = vcmp.eq.f32.partialorder %v4936_v50, 0.0 }
  0x76   :  { %v241_v58 = vmul.f32 %v177_v42, %v145_v52  ;;  %v216_v42 = vmul.f32 %v184_v37, %v120_v36  ;;  %v4938_v51 = vld [vmem:[#allocation7] sm:$0xff]  ;;  %v1344_v52 = vsel %vm1340_vm1, %v4936_v50, 0.0 }
  0x77   :  { %v421_v39 = vsel %vm249_vm0, %v242_v54, 0.0  ;;  %v7090_v54 = vlaneseq  ;;  %vm1411_vm2 = vcmp.eq.f32.partialorder %v4938_v51, 0.0 }
  0x78   :  { %v418_v41 = vsel %vm249_vm0, %v241_v58, 0.0  ;;  %v343_v44 = vsel %vm249_vm0, %v216_v42, 0.0 }
  0x79   :  { %350 = vadd.xlane.f32.xlu1 %v349_v60  ;;  %347 = vadd.xlane.f32.xlu0 %v346_v62  ;;  %v180_v60 = vld [vmem:[#allocation5 + $0xd8] sm:$0xff]  ;;  %v179_v62 = vld [vmem:[#allocation5 + $0xd0] sm:$0xff] }
  0x7a   :  { %v212_v0 = vmul.f32 %v180_v60, %v116_v59  ;;  %v211_v3 = vmul.f32 %v179_v62, %v115_v61 }
  0x7c   :  { %v331_v7 = vsel %vm249_vm0, %v212_v0, 0.0  ;;  %v328_v8 = vsel %vm249_vm0, %v211_v3, 0.0 }
  0x7d   :  { %368 = vadd.xlane.f32.xlu1 %v367_v10  ;;  %365 = vadd.xlane.f32.xlu0 %v364_v4  ;;  %v133_v10 = vld [vmem:[#allocation2 + $0x160] sm:$0xff]  ;;  %v230_v4 = vmul.f32 %v4843_v47, %v134_v5 }
  0x7e   :  { %v229_v11 = vmul.f32 %v4845_v49, %v133_v10 }
  0x7f   :  { %v385_v15 = vsel %vm249_vm0, %v230_v4, 0.0 }
  0x80   :  { %v382_v17 = vsel %vm249_vm0, %v229_v11, 0.0 }
  0x81   :  { %410 = vadd.xlane.f32.xlu1 %v409_v23  ;;  %407 = vadd.xlane.f32.xlu0 %v406_v25  ;;  %v244_v23 = vmul.f32 %v180_v60, %v148_v12  ;;  %v243_v25 = vmul.f32 %v179_v62, %v147_v13 }
  0x83   :  { %v427_v47 = vsel %vm249_vm0, %v244_v23, 0.0  ;;  %v424_v49 = vsel %vm249_vm0, %v243_v25, 0.0 }
  0x85   :  { %320 = vadd.xlane.f32.xlu1 %v319_v21  ;;  %317 = vadd.xlane.f32.xlu0 %v316_v24  ;;  %v181_v21 = vld [vmem:[#allocation5 + $0xe0] sm:$0xff] }
  0x86   :  { %v213_v24 = vmul.f32 %v181_v21, %v117_v20 }
  0x88   :  { %v334_v6 = vsel %vm249_vm0, %v213_v24, 0.0 }
  0x89   :  { %374 = vadd.xlane.f32.xlu1 %v373_v29  ;;  %371 = vadd.xlane.f32.xlu0 %v370_v1  ;;  %v232_v29 = vmul.f32 %v4851_v55, %v136_v26  ;;  %v231_v1 = vmul.f32 %v4853_v57, %v135_v27 }
  0x8b   :  { %v391_v34 = vsel %vm249_vm0, %v232_v29, 0.0  ;;  %v388_v35 = vsel %vm249_vm0, %v231_v1, 0.0 }
  0x8d   :  { %398 = vadd.xlane.f32.xlu1 %v397_v31  ;;  %395 = vadd.xlane.f32.xlu0 %v394_v33  ;;  %v246_v31 = vmul.f32 %v182_v19, %v150_v30  ;;  %v245_v33 = vmul.f32 %v181_v21, %v149_v32 }
  0x8f   :  { %v433_v55 = vsel %vm249_vm0, %v246_v31, 0.0  ;;  %v430_v57 = vsel %vm249_vm0, %v245_v33, 0.0 }
  0x91   :  { %416 = vadd.xlane.f32.xlu1 %v415_v63  ;;  %413 = vadd.xlane.f32.xlu0 %v412_v2  ;;  %v215_v63 = vmul.f32 %v183_v40, %v119_v38  ;;  %v151_v2 = vld [vmem:[#allocation2 + $0x1f0] sm:$0xff] }
  0x93   :  { %v340_v14 = vsel %vm249_vm0, %v215_v63, 0.0 }
  0x95   :  { %326 = vadd.xlane.f32.xlu1 %v325_v46  ;;  %323 = vadd.xlane.f32.xlu0 %v322_v48  ;;  %v247_v46 = vmul.f32 %v183_v40, %v151_v2 }
  0x97   :  { %v436_v48 = vsel %vm249_vm0, %v247_v46, 0.0 }
  0x99   :  { %380 = vadd.xlane.f32.xlu1 %v379_v53  ;;  %377 = vadd.xlane.f32.xlu0 %v376_v56  ;;  %v1341_v53 = vsel %vm1340_vm1, %v4938_v51, 0.0  ;;  %v4945_v56 = vshrl.u32 %v7090_v54, 7 }
  0x9b   :  { %7213 = vst [vmem:[#allocation16_spill] sm:$0xff] %v4945_v56  ;;  %v4950_v59 = vsub.s32 1, %v4945_v56  ;;  %v4972_v4 = vsub.s32 0, %v4945_v56  ;;  %v4998_v21 = vsub.s32 4, %v4945_v56  ;;  %v5016_v32 = vsub.s32 5, %v4945_v56 }
  0x9c   :  { %v5023_v43 = vsub.s32 6, %v4945_v56 }
  0x9d   :  { %422 = vadd.xlane.f32.xlu1 %v421_v39  ;;  %419 = vadd.xlane.f32.xlu0 %v418_v41  ;;  %7214 = vst [vmem:[#allocation17_spill] sm:$0xff] %v4950_v59  ;;  %v1002_v62 = vrot.slane %v4938_v51, %v4950_v59  ;;  %v4957_v39 = vsub.s32 2, %v4945_v56  ;;  %7216 = vst [vmem:[#allocation19_spill] sm:$0xff] %v4972_v4  ;;  %v991_v13 = vrot.slane %v4938_v51, %v4972_v4 }
  0x9e   :  { %7218 = vst [vmem:[#allocation21_spill] sm:$0xff] %v4998_v21  ;;  %v1079_v27 = vrot.slane %v4936_v50, %v4972_v4  ;;  %7219 = vst [vmem:[#allocation22_spill] sm:$0xff] %v5016_v32  ;;  %v1046_v38 = vrot.slane %v4938_v51, %v5016_v32  ;;  %v1123_v45 = vrot.slane %v4936_v50, %v4998_v21 }
  0x9f   :  { %7215 = vst [vmem:[#allocation18_spill] sm:$0xff] %v4957_v39  ;;  %v1013_v3 = vrot.slane %v4938_v51, %v4957_v39  ;;  %v1101_v20 = vrot.slane %v4936_v50, %v4957_v39  ;;  %7220 = vst [vmem:[#allocation23_spill] sm:$0xff] %v5023_v43 }
  0xa1   :  { %332 = vadd.xlane.f32.xlu1 %v331_v7  ;;  %329 = vadd.xlane.f32.xlu0 %v328_v8  ;;  %v1090_v8 = vrot.slane %v4936_v50, %v4950_v59 }
  0xa5   :  { %386 = vadd.xlane.f32.xlu1 %v385_v15  ;;  %383 = vadd.xlane.f32.xlu0 %v382_v17  ;;  %v4983_v15 = vsub.s32 3, %v4945_v56 }
  0xa7   :  { %7217 = vst [vmem:[#allocation20_spill] sm:$0xff] %v4983_v15  ;;  %v1024_v25 = vrot.slane %v4938_v51, %v4983_v15  ;;  %v1112_v30 = vrot.slane %v4936_v50, %v4983_v15 }
  0xa9   :  { %428 = vadd.xlane.f32.xlu1 %v427_v47  ;;  %425 = vadd.xlane.f32.xlu0 %v424_v49  ;;  %v1035_v49 = vrot.slane %v4938_v51, %v4998_v21 }
  0xad   :  { %338 = vadd.xlane.f32.xlu1 %v337_v28  ;;  %335 = vadd.xlane.f32.xlu0 %v334_v6 }
  0xb1   :  { %392 = vadd.xlane.f32.xlu1 %v391_v34  ;;  %389 = vadd.xlane.f32.xlu0 %v388_v35 }
  0xb5   :  { %434 = vadd.xlane.f32.xlu1 %v433_v55  ;;  %431 = vadd.xlane.f32.xlu0 %v430_v57 }
  0xb9   :  { %344 = vadd.xlane.f32.xlu1 %v343_v44  ;;  %341 = vadd.xlane.f32.xlu0 %v340_v14 }
  0xbd   :  { %440 = vadd.xlane.f32.xlu1 %v439_v16  ;;  %437 = vadd.xlane.f32.xlu0 %v436_v48 }
  0xc1   :  { %1345 = vadd.xlane.f32.xlu1 %v1344_v52  ;;  %1342 = vadd.xlane.f32.xlu0 %v1341_v53 }
  0xca   :  { %v4947_v58 = vpop.xlane.xlu1 %257  ;;  %v4952_v60 = vpop.xlane.xlu0 %251 }
  0xce   :  { %v261_v61 = vpop.xlane.xlu1 %260  ;;  %v4959_v0 = vpop.xlane.xlu0 %254 }
  0xd2   :  { %v4961_v41 = vpop.xlane.xlu1 %266  ;;  %1008 = vbcast.lane.b32.xlu1 %v1002_v62, 264  ;;  %v4965_v5 = vpop.xlane.xlu0 %263 }
  0xd6   :  { %v4967_v10 = vpop.xlane.xlu1 %272  ;;  %1015 = vbcast.lane.b32.xlu1 %v1013_v3, 256  ;;  %v4969_v7 = vpop.xlane.xlu0 %269 }
  0xd7   :  { %1004 = vbcast.lane.b32.xlu0 %v1002_v62, 256  ;;  %v1057_v62 = vrot.slane %v4938_v51, %v5023_v43 }
  0xda   :  { %v4976_v11 = vpop.xlane.xlu1 %278  ;;  %1019 = vbcast.lane.b32.xlu1 %v1013_v3, 264  ;;  %v4978_v12 = vpop.xlane.xlu0 %275 }
  0xdb   :  { %1092 = vbcast.lane.b32.xlu0 %v1090_v8, 256 }
  0xde   :  { %v4985_v23 = vpop.xlane.xlu1 %284  ;;  %1096 = vbcast.lane.b32.xlu1 %v1090_v8, 264  ;;  %v4987_v17 = vpop.xlane.xlu0 %281 }
  0xdf   :  { %993 = vbcast.lane.b32.xlu0 %v991_v13, 256 }
  0xe2   :  { %v4991_v18 = vpop.xlane.xlu1 %290  ;;  %997 = vbcast.lane.b32.xlu1 %v991_v13, 264  ;;  %v4993_v19 = vpop.xlane.xlu0 %287 }
  0xe3   :  { %1026 = vbcast.lane.b32.xlu0 %v1024_v25, 256 }
  0xe6   :  { %v5000_v47 = vpop.xlane.xlu1 %296  ;;  %1030 = vbcast.lane.b32.xlu1 %v1024_v25, 264  ;;  %v5002_v22 = vpop.xlane.xlu0 %293 }
  0xe7   :  { %1103 = vbcast.lane.b32.xlu0 %v1101_v20, 256 }
  0xea   :  { %v5006_v24 = vpop.xlane.xlu1 %302  ;;  %1107 = vbcast.lane.b32.xlu1 %v1101_v20, 264  ;;  %v5008_v26 = vpop.xlane.xlu0 %299 }
  0xeb   :  { %1037 = vbcast.lane.b32.xlu0 %v1035_v49, 256 }
  0xee   :  { %v357_v28 = vpop.xlane.xlu1 %356  ;;  %1041 = vbcast.lane.b32.xlu1 %v1035_v49, 264  ;;  %v354_v6 = vpop.xlane.xlu0 %353 }
  0xef   :  { %v445_v29 = vmax.f32 %v261_v61, %v357_v28  ;;  %v444_v1 = vmax.f32 %v4947_v58, %v354_v6  ;;  %1081 = vbcast.lane.b32.xlu0 %v1079_v27, 256 }
  0xf1   :  { %v477_v34 = vsub.f32 %v261_v61, %v445_v29  ;;  %v509_v31 = vsub.f32 %v357_v28, %v445_v29  ;;  %v476_v37 = vsub.f32 %v4947_v58, %v444_v1  ;;  %v508_v55 = vsub.f32 %v354_v6, %v444_v1 }
  0xf2   :  { %v309_v35 = vpop.xlane.xlu1 %308  ;;  %1085 = vbcast.lane.b32.xlu1 %v1079_v27, 264  ;;  %v306_v33 = vpop.xlane.xlu0 %305  ;;  %v1134_v28 = vrot.slane %v4936_v50, %v5016_v32  ;;  %v5039_v1 = vsub.s32 7, %v4945_v56 }
  0xf3   :  { %v544_v36 = vmul.f32 1.442695, %v477_v34  ;;  %1114 = vbcast.lane.b32.xlu0 %v1112_v30, 256  ;;  %v608_v40 = vmul.f32 1.442695, %v509_v31 }
  0xf4   :  { %v542_v2 = vmul.f32 1.442695, %v476_v37  ;;  %v606_v14 = vmul.f32 1.442695, %v508_v55  ;;  %7221 = vst [vmem:[#allocation24_spill] sm:$0xff] %v5039_v1 }
  0xf5   :  { %4182 = vpow2.f32 %v544_v36 }
  0xf6   :  { %v363_v42 = vpop.xlane.xlu1 %362  ;;  %1118 = vbcast.lane.b32.xlu1 %v1112_v30, 264  ;;  %v360_v63 = vpop.xlane.xlu0 %359  ;;  %4184 = vpow2.f32 %v608_v40  ;;  %v1068_v40 = vrot.slane %v4938_v51, %v5039_v1 }
  0xf7   :  { %v447_v57 = vmax.f32 %v4961_v41, %v363_v42  ;;  %v446_v44 = vmax.f32 %v4965_v5, %v360_v63  ;;  %1048 = vbcast.lane.b32.xlu0 %v1046_v38, 256  ;;  %4186 = vpow2.f32 %v542_v2 }
  0xf8   :  { %4188 = vpow2.f32 %v606_v14 }
  0xf9   :  { %v479_v46 = vsub.f32 %v4961_v41, %v447_v57  ;;  %v511_v16 = vsub.f32 %v363_v42, %v447_v57  ;;  %v478_v53 = vsub.f32 %v4965_v5, %v446_v44  ;;  %v510_v8 = vsub.f32 %v360_v63, %v446_v44 }
  0xfa   :  { %v405_v48 = vpop.xlane.xlu1 %404  ;;  %1052 = vbcast.lane.b32.xlu1 %v1046_v38, 264  ;;  %v402_v61 = vpop.xlane.xlu0 %401  ;;  %v1145_v63 = vrot.slane %v4936_v50, %v5023_v43 }
  0xfb   :  { %v548_v52 = vmul.f32 1.442695, %v479_v46  ;;  %v461_v58 = vmax.f32 %v309_v35, %v405_v48  ;;  %v612_v3 = vmul.f32 1.442695, %v511_v16  ;;  %v460_v13 = vmax.f32 %v306_v33, %v402_v61  ;;  %1125 = vbcast.lane.b32.xlu0 %v1123_v45, 256 }
  0xfc   :  { %v546_v49 = vmul.f32 1.442695, %v478_v53  ;;  %v610_v29 = vmul.f32 1.442695, %v510_v8 }
  0xfd   :  { %v493_v25 = vsub.f32 %v309_v35, %v461_v58  ;;  %v525_v20 = vsub.f32 %v405_v48, %v461_v58  ;;  %4190 = vpow2.f32 %v548_v52  ;;  %v492_v27 = vsub.f32 %v306_v33, %v460_v13 }
  0xfe   :  { %v5032_v41 = vpop.xlane.xlu1 %314  ;;  %1129 = vbcast.lane.b32.xlu1 %v1123_v45, 264  ;;  %v5034_v5 = vpop.xlane.xlu0 %311  ;;  %4192 = vpow2.f32 %v612_v3  ;;  %v524_v6 = vsub.f32 %v402_v61, %v460_v13 }
  0xff   :  { %1059 = vbcast.lane.b32.xlu0 %v1057_v62, 256  ;;  %v576_v30 = vmul.f32 1.442695, %v493_v25  ;;  %v640_v34 = vmul.f32 1.442695, %v525_v20  ;;  %4194 = vpow2.f32 %v546_v49 }
 0x100   :  { %v574_v35 = vmul.f32 1.442695, %v492_v27  ;;  %4196 = vpow2.f32 %v610_v29  ;;  %v638_v37 = vmul.f32 1.442695, %v524_v6 }
 0x101   :  { %4198 = vpow2.f32 %v576_v30 }
 0x102   :  { %v351_v31 = vpop.xlane.xlu1 %350  ;;  %1063 = vbcast.lane.b32.xlu1 %v1057_v62, 264  ;;  %v348_v36 = vpop.xlane.xlu0 %347  ;;  %4200 = vpow2.f32 %v640_v34 }
 0x103   :  { %v443_v33 = vmax.f32 %v4959_v0, %v351_v31  ;;  %v442_v38 = vmax.f32 %v4952_v60, %v348_v36  ;;  %1136 = vbcast.lane.b32.xlu0 %v1134_v28, 256  ;;  %v5045_v55 = vpop.eup %4182  ;;  %4202 = vpow2.f32 %v574_v35 }
 0x104   :  { %v5050_v2 = vpop.eup %4184  ;;  %4204 = vpow2.f32 %v638_v37 }
 0x105   :  { %v475_v42 = vsub.f32 %v4959_v0, %v443_v33  ;;  %v507_v57 = vsub.f32 %v351_v31, %v443_v33  ;;  %v474_v44 = vsub.f32 %v4952_v60, %v442_v38  ;;  %v506_v45 = vsub.f32 %v348_v36, %v442_v38  ;;  %v5056_v61 = vpop.eup %4186 }
 0x106   :  { %v369_v14 = vpop.xlane.xlu1 %368  ;;  %1140 = vbcast.lane.b32.xlu1 %v1134_v28, 264  ;;  %v366_v0 = vpop.xlane.xlu0 %365  ;;  %v669_v60 = vadd.f32 %v5050_v2, %v5045_v55  ;;  %v4732_v31 = vmov 0.0  }
 0x107   :  { %v540_v46 = vmul.f32 1.442695, %v475_v42  ;;  %v604_v16 = vmul.f32 1.442695, %v507_v57  ;;  %v449_v48 = vmax.f32 %v4967_v10, %v369_v14  ;;  %v538_v52 = vmul.f32 1.442695, %v474_v44  ;;  %v5061_v8 = vpop.eup %4188 }
 0x108   :  { %v602_v53 = vmul.f32 1.442695, %v506_v45  ;;  %v448_v58 = vmax.f32 %v4969_v7, %v366_v0  ;;  %1070 = vbcast.lane.b32.xlu0 %v1068_v40, 256  ;;  %v4064_v35 = vsel %vm1411_vm2, 1.0, %v4732_v31 }
 0x109   :  { %4206 = vpow2.f32 %v540_v46  ;;  %v481_v62 = vsub.f32 %v4967_v10, %v449_v48  ;;  %v513_v3 = vsub.f32 %v369_v14, %v449_v48  ;;  %v1156_v10 = vrot.slane %v4936_v50, %v5039_v1 }
 0x10a   :  { %4208 = vpow2.f32 %v604_v16  ;;  %v480_v13 = vsub.f32 %v4969_v7, %v448_v58  ;;  %v512_v25 = vsub.f32 %v366_v0, %v448_v58  ;;  %v411_v20 = vpop.xlane.xlu1 %410  ;;  %1074 = vbcast.lane.b32.xlu1 %v1068_v40, 264  ;;  %v408_v29 = vpop.xlane.xlu0 %407  ;;  %v668_v7 = vadd.f32 %v5061_v8, %v5056_v61 }
 0x10b   :  { %4210 = vpow2.f32 %v538_v52  ;;  %v552_v49 = vmul.f32 1.442695, %v481_v62  ;;  %v616_v27 = vmul.f32 1.442695, %v513_v3  ;;  %v463_v28 = vmax.f32 %v5032_v41, %v411_v20  ;;  %v5065_v6 = vpop.eup %4190 }
 0x10c   :  { %4212 = vpow2.f32 %v602_v53  ;;  %1147 = vbcast.lane.b32.xlu0 %v1145_v63, 256  ;;  %v5069_v30 = vpop.eup %4192  ;;  %v462_v34 = vmax.f32 %v5034_v5, %v408_v29  ;;  %v550_v33 = vmul.f32 1.442695, %v480_v13  ;;  %v614_v38 = vmul.f32 1.442695, %v512_v25 }
 0x10d   :  { %4214 = vrcp.f32 %v669_v60  ;;  %v495_v36 = vsub.f32 %v5032_v41, %v463_v28  ;;  %v527_v40 = vsub.f32 %v411_v20, %v463_v28  ;;  %v5081_v57 = vpop.eup %4194  ;;  %v671_v44 = vadd.f32 %v5069_v30, %v5065_v6 }
 0x10e   :  { %4216 = vpow2.f32 %v552_v49  ;;  %v5077_v37 = vpop.xlane.xlu1 %320  ;;  %1151 = vbcast.lane.b32.xlu1 %v1145_v63, 264  ;;  %v5079_v42 = vpop.xlane.xlu0 %317  ;;  %v494_v51 = vsub.f32 %v5034_v5, %v462_v34  ;;  %v1420_v45 = vrot.slane %v4064_v35, %v4972_v4  ;;  %v526_v41 = vsub.f32 %v408_v29, %v462_v34 }
 0x10f   :  { %4218 = vpow2.f32 %v616_v27  ;;  %v5087_v14 = vpop.eup %4196  ;;  %v580_v46 = vmul.f32 1.442695, %v495_v36  ;;  %v1431_v48 = vrot.slane %v4064_v35, %v4950_v59  ;;  %v644_v52 = vmul.f32 1.442695, %v527_v40 }
 0x110   :  { %1158 = vbcast.lane.b32.xlu0 %v1156_v10, 256  ;;  %4220 = vrcp.f32 %v668_v7  ;;  %v5089_v63 = vpop.eup %4198  ;;  %v578_v60 = vmul.f32 1.442695, %v494_v51  ;;  %v1442_v62 = vrot.slane %v4064_v35, %v4957_v39  ;;  %v5100_v3 = vrot.slane %v4064_v35, %v4983_v15 }
 0x111   :  { %4222 = vpow2.f32 %v550_v33  ;;  %v5092_v0 = vpop.eup %4200  ;;  %v642_v25 = vmul.f32 1.442695, %v526_v41  ;;  %v5110_v29 = vsel %vm1412_vm3, 1.0, %v4732_v31  ;;  %v5116_v7 = vrot.slane %v4064_v35, %v5016_v32 }
 0x112   :  { %v375_v16 = vpop.xlane.xlu1 %374  ;;  %1162 = vbcast.lane.b32.xlu1 %v1156_v10, 264  ;;  %4224 = vpow2.f32 %v614_v38  ;;  %v372_v53 = vpop.xlane.xlu0 %371  ;;  %v5113_v10 = vrot.slane %v4064_v35, %v4998_v21  ;;  %v5123_v38 = vrot.slane %v4064_v35, %v5023_v43  ;;  %v670_v31 = vadd.f32 %v5087_v14, %v5081_v57 }
 0x113   :  { %v451_v5 = vmax.f32 %v4976_v11, %v375_v16  ;;  %v5096_v58 = vpop.eup %4202  ;;  %4226 = vrcp.f32 %v671_v44  ;;  %v450_v27 = vmax.f32 %v4978_v12, %v372_v53  ;;  %v5132_v51 = vrot.slane %v4064_v35, %v5039_v1 }
 0x114   :  { %1422 = vbcast.lane.b32.xlu0 %v1420_v45, 256  ;;  %v5102_v13 = vpop.eup %4204  ;;  %4228 = vpow2.f32 %v580_v46  ;;  %v685_v41 = vadd.f32 %v5092_v0, %v5089_v63  ;;  %v5157_v54 = vrot.slane %v5110_v29, %v4950_v59 }
 0x115   :  { %v483_v20 = vsub.f32 %v4976_v11, %v451_v5  ;;  %v515_v49 = vsub.f32 %v375_v16, %v451_v5  ;;  %4230 = vpow2.f32 %v644_v52  ;;  %v482_v46 = vsub.f32 %v4978_v12, %v450_v27 }
 0x116   :  { %v5106_v28 = vpop.eup %4206  ;;  %v5108_v50 = vpop.xlane.xlu1 %398  ;;  %1426 = vbcast.lane.b32.xlu1 %v1420_v45, 264  ;;  %4232 = vpow2.f32 %v578_v60  ;;  %v5141_v16 = vrot.slane %v5110_v29, %v4972_v4  ;;  %v684_v5 = vadd.f32 %v5102_v13, %v5096_v58  ;;  %v514_v60 = vsub.f32 %v372_v53, %v450_v27 }
 0x117   :  { %7222 = vst [vmem:[#allocation25_spill] sm:$0xff] %v5106_v28  ;;  %v5118_v34 = vpop.eup %4208  ;;  %v556_v11 = vmul.f32 1.442695, %v483_v20  ;;  %v620_v33 = vmul.f32 1.442695, %v515_v49  ;;  %v5120_v36 = vpop.xlane.xlu0 %395  ;;  %v459_v44 = vmax.f32 %v5006_v24, %v5108_v50  ;;  %4234 = vpow2.f32 %v642_v25 }
 0x118   :  { %7223 = vst [vmem:[#allocation26_spill] sm:$0xff] %v5118_v34  ;;  %v5125_v40 = vpop.eup %4210  ;;  %1433 = vbcast.lane.b32.xlu0 %v1431_v48, 256  ;;  %v458_v35 = vmax.f32 %v5008_v26, %v5120_v36  ;;  %v667_v12 = vadd.f32 %v5118_v34, %v5106_v28  ;;  %v5161_v53 = vrot.slane %v5110_v29, %v4957_v39  ;;  %v554_v56 = vmul.f32 1.442695, %v482_v46 }
 0x119   :  { %v5134_v45 = vpop.eup %4212  ;;  %4236 = vpow2.f32 %v556_v11  ;;  %v491_v11 = vsub.f32 %v5006_v24, %v459_v44  ;;  %v523_v59 = vsub.f32 %v5108_v50, %v459_v44 }
 0x11a   :  { %v4215_v52 = vpop.eup %4214  ;;  %v5147_v20 = vpop.xlane.xlu1 %416  ;;  %1437 = vbcast.lane.b32.xlu1 %v1431_v48, 264  ;;  %4238 = vpow2.f32 %v620_v33  ;;  %v666_v48 = vadd.f32 %v5134_v45, %v5125_v40  ;;  %v5170_v33 = vrot.slane %v5110_v29, %v4983_v15  ;;  %v490_v34 = vsub.f32 %v5008_v26, %v458_v35 }
 0x11b   :  { %v5149_v49 = vpop.eup %4216  ;;  %v5153_v25 = vpop.xlane.xlu0 %413  ;;  %4240 = vrcp.f32 %v670_v31  ;;  %v465_v39 = vmax.f32 %v5077_v37, %v5147_v20  ;;  %v618_v31 = vmul.f32 1.442695, %v514_v60  ;;  %v705_v24 = vmul.f32 %v4215_v52, %v5045_v55 }
 0x11c   :  { %v5163_v27 = vpop.eup %4218  ;;  %1444 = vbcast.lane.b32.xlu0 %v1442_v62, 256  ;;  %4242 = vrcp.f32 %v685_v41  ;;  %v464_v44 = vmax.f32 %v5079_v42, %v5153_v25  ;;  %v765_v46 = vmul.f32 %v4215_v52, %v5050_v2  ;;  %v572_v26 = vmul.f32 1.442695, %v491_v11 }
 0x11d   :  { %7224 = vst [vmem:[#allocation27_spill] sm:$0xff] %v5163_v27  ;;  %v5175_v4 = vpop.eup %4220  ;;  %4244 = vrcp.f32 %v684_v5  ;;  %v673_v50 = vadd.f32 %v5163_v27, %v5149_v49  ;;  %v5196_v55 = vrot.slane %v5110_v29, %v4998_v21  ;;  %v497_v27 = vsub.f32 %v5077_v37, %v465_v39 }
 0x11e   :  { %v5178_v28 = vpop.xlane.xlu1 %326  ;;  %1448 = vbcast.lane.b32.xlu1 %v1442_v62, 264  ;;  %v5181_v15 = vpop.eup %4222  ;;  %4246 = vrcp.f32 %v667_v12  ;;  %v522_v62 = vsub.f32 %v5120_v36, %v458_v35  ;;  %v636_v12 = vmul.f32 1.442695, %v523_v59  ;;  %v5203_v2 = vrot.slane %v5110_v29, %v5016_v32 }
 0x11f   :  { %v5187_v41 = vpop.xlane.xlu0 %323  ;;  %v5190_v5 = vpop.eup %4224  ;;  %4248 = vrcp.f32 %v666_v48  ;;  %v570_v52 = vmul.f32 1.442695, %v490_v34  ;;  %v529_v36 = vsub.f32 %v5147_v20, %v465_v39  ;;  %v4502_v48 = vld [vmem:[#allocation2 + $0x18] sm:$0xff]  ;;  %v496_v59 = vsub.f32 %v5079_v42, %v464_v44 }
 0x120   :  { %1455 = vbcast.lane.b32.xlu0 %v5100_v3, 256  ;;  %v5198_v60 = vpop.eup %4226  ;;  %4250 = vpow2.f32 %v554_v56  ;;  %v797_v11 = vmul.f32 %v4502_v48, %v705_v24  ;;  %v672_v56 = vadd.f32 %v5190_v5, %v5181_v15  ;;  %v829_v34 = vmul.f32 %v765_v46, %v4867_v9 }
 0x121   :  { %4252 = vpow2.f32 %v618_v31  ;;  %v5209_v21 = vpop.eup %4228  ;;  %v634_v39 = vmul.f32 1.442695, %v522_v62  ;;  %v5227_v42 = vrot.slane %v5110_v29, %v5023_v43  ;;  %v5231_v9 = vrot.slane %v5110_v29, %v5039_v1 }
 0x122   :  { %v5206_v35 = vpop.xlane.xlu1 %380  ;;  %1459 = vbcast.lane.b32.xlu1 %v5100_v3, 264  ;;  %7225 = vst [vmem:[#allocation28_spill] sm:$0xff] %v5209_v21  ;;  %4254 = vrcp.f32 %v673_v50  ;;  %v5217_v31 = vpop.eup %4230  ;;  %v528_v3 = vsub.f32 %v5153_v25, %v464_v44  ;;  %v584_v50 = vmul.f32 1.442695, %v497_v27  ;;  %v648_v25 = vmul.f32 1.442695, %v529_v36 }
 0x123   :  { %v5214_v37 = vpop.xlane.xlu0 %377  ;;  %7226 = vst [vmem:[#allocation29_spill] sm:$0xff] %v5217_v31  ;;  %4256 = vpow2.f32 %v572_v26  ;;  %v453_v20 = vmax.f32 %v4985_v23, %v5206_v35  ;;  %v5223_v24 = vpop.eup %4232  ;;  %v867_v27 = vsel %vm249_vm0, %v797_v11, 0.0  ;;  %v868_v29 = vsel %vm249_vm0, %v829_v34, 0.0 }
 0x124   :  { %1466 = vbcast.lane.b32.xlu0 %v5113_v10, 256  ;;  %4258 = vpow2.f32 %v636_v12  ;;  %v5233_v46 = vpop.eup %4234  ;;  %v452_v44 = vmax.f32 %v4987_v17, %v5214_v37  ;;  %v582_v12 = vmul.f32 1.442695, %v496_v59  ;;  %v646_v1 = vmul.f32 1.442695, %v528_v3 }
 0x125   :  { %7227 = vst [vmem:[#allocation30_spill] sm:$0xff] %v5233_v46  ;;  %4260 = vpow2.f32 %v570_v52  ;;  %v703_v52 = vmul.f32 %v5175_v4, %v5056_v61  ;;  %v485_v43 = vsub.f32 %v4985_v23, %v453_v20  ;;  %v517_v59 = vsub.f32 %v5206_v35, %v453_v20 }
 0x126   :  { %v5237_v26 = vpop.xlane.xlu1 %422  ;;  %1470 = vbcast.lane.b32.xlu1 %v5113_v10, 264  ;;  %v5241_v62 = vpop.eup %4236  ;;  %4262 = vrcp.f32 %v672_v56  ;;  %v687_v56 = vadd.f32 %v5217_v31, %v5209_v21  ;;  %v764_v61 = vmul.f32 %v5175_v4, %v5061_v8  ;;  %v686_v23 = vadd.f32 %v5233_v46, %v5223_v24 }
 0x127   :  { %7228 = vst [vmem:[#allocation31_spill] sm:$0xff] %v5241_v62  ;;  %v5243_v48 = vpop.xlane.xlu0 %419  ;;  %v5248_v36 = vpop.eup %4238  ;;  %4264 = vpow2.f32 %v634_v39  ;;  %v467_v10 = vmax.f32 %v5178_v28, %v5237_v26  ;;  %v484_v39 = vsub.f32 %v4987_v17, %v452_v44  ;;  %v5267_v32 = vadd.f32 %v868_v29, %v867_v27  ;;  %v4503_v27 = vld [vmem:[#allocation2 + $0x10] sm:$0xff] }
 0x128   :  { %7229 = vst [vmem:[#allocation32_spill] sm:$0xff] %v5248_v36  ;;  %1477 = vbcast.lane.b32.xlu0 %v5116_v7, 256  ;;  %v4241_v11 = vpop.eup %4240  ;;  %4266 = vpow2.f32 %v584_v50  ;;  %v675_v35 = vadd.f32 %v5248_v36, %v5241_v62  ;;  %v516_v4 = vsub.f32 %v5214_v37, %v452_v44  ;;  %v466_v8 = vmax.f32 %v5187_v41, %v5243_v48  ;;  %v4504_v44 = vld [vmem:[#allocation2 + $0x110] sm:$0xff] }
 0x129   :  { %v5259_v34 = vpop.eup %4242  ;;  %4268 = vpow2.f32 %v648_v25  ;;  %v560_v25 = vmul.f32 1.442695, %v485_v43  ;;  %v796_v29 = vmul.f32 %v4503_v27, %v703_v52  ;;  %v531_v37 = vsub.f32 %v5237_v26, %v467_v10 }
 0x12a   :  { %v5264_v3 = vpop.xlane.xlu1 %332  ;;  %1481 = vbcast.lane.b32.xlu1 %v5116_v7, 264  ;;  %v5269_v50 = vpop.eup %4244  ;;  %4270 = vpow2.f32 %v582_v12  ;;  %v499_v7 = vsub.f32 %v5178_v28, %v467_v10  ;;  %v624_v12 = vmul.f32 1.442695, %v517_v59  ;;  %v828_v36 = vmul.f32 %v4504_v44, %v764_v61 }
 0x12b   :  { %v5276_v20 = vpop.xlane.xlu0 %329  ;;  %v5278_v17 = vpop.eup %4246  ;;  %4272 = vpow2.f32 %v646_v1  ;;  %v558_v21 = vmul.f32 1.442695, %v484_v39  ;;  %v707_v43 = vmul.f32 %v4241_v11, %v5081_v57  ;;  %v766_v28 = vmul.f32 %v4241_v11, %v5087_v14 }
 0x12c   :  { %1488 = vbcast.lane.b32.xlu0 %v5123_v38, 256  ;;  %v5282_v31 = vpop.eup %4248  ;;  %4274 = vrcp.f32 %v687_v56  ;;  %v622_v56 = vmul.f32 1.442695, %v516_v4  ;;  %v498_v59 = vsub.f32 %v5187_v41, %v466_v8  ;;  %v530_v39 = vsub.f32 %v5243_v48, %v466_v8 }
 0x12d   :  { %v5285_v62 = vpop.eup %4250  ;;  %4276 = vrcp.f32 %v686_v23  ;;  %v588_v23 = vmul.f32 1.442695, %v499_v7  ;;  %v652_v14 = vmul.f32 1.442695, %v531_v37  ;;  %v864_v11 = vsel %vm249_vm0, %v796_v29, 0.0  ;;  %v4506_v37 = vld [vmem:[#allocation2 + $0x120] sm:$0xff] }
 0x12e   :  { %v387_v1 = vpop.xlane.xlu1 %386  ;;  %1492 = vbcast.lane.b32.xlu1 %v5123_v38, 264  ;;  %v5290_v52 = vpop.eup %4252  ;;  %4278 = vrcp.f32 %v675_v35  ;;  %v865_v41 = vsel %vm249_vm0, %v828_v36, 0.0  ;;  %v586_v29 = vmul.f32 1.442695, %v498_v59  ;;  %v830_v44 = vmul.f32 %v4506_v37, %v766_v28 }
 0x12f   :  { %7230 = vst [vmem:[#allocation33_spill] sm:$0xff] %v5290_v52  ;;  %v455_v26 = vmax.f32 %v4991_v18, %v387_v1  ;;  %v384_v10 = vpop.xlane.xlu0 %383  ;;  %v5294_v61 = vpop.eup %4254  ;;  %4280 = vpow2.f32 %v560_v25  ;;  %v674_v4 = vadd.f32 %v5290_v52, %v5285_v62  ;;  %v4505_v25 = vld [vmem:[#allocation2 + $0x20] sm:$0xff]  ;;  %v780_v37 = vmul.f32 %v5269_v50, %v5102_v13 }
 0x130   :  { %v454_v38 = vmax.f32 %v4993_v19, %v384_v10  ;;  %1499 = vbcast.lane.b32.xlu0 %v5132_v51, 256  ;;  %v5299_v57 = vpop.eup %4256  ;;  %4282 = vpow2.f32 %v624_v12  ;;  %v798_v7 = vmul.f32 %v4505_v25, %v707_v43  ;;  %v735_v25 = vmul.f32 %v5269_v50, %v5096_v58 }
 0x131   :  { %v5303_v35 = vpop.eup %4258  ;;  %4284 = vpow2.f32 %v558_v21  ;;  %v487_v48 = vsub.f32 %v4991_v18, %v455_v26  ;;  %v519_v12 = vsub.f32 %v387_v1, %v455_v26  ;;  %v650_v21 = vmul.f32 1.442695, %v530_v39 }
 0x132   :  { %v5308_v8 = vpop.xlane.xlu1 %428  ;;  %1503 = vbcast.lane.b32.xlu1 %v5132_v51, 264  ;;  %v5311_v27 = vpop.eup %4260  ;;  %4286 = vpow2.f32 %v622_v56  ;;  %v486_v18 = vsub.f32 %v4993_v19, %v454_v38  ;;  %v866_v51 = vadd.f32 %v865_v41, %v864_v11  ;;  %v683_v43 = vadd.f32 %v5303_v35, %v5299_v57  ;;  %v4507_v19 = vld [vmem:[#allocation5 + $0x18] sm:$0xff] }
 0x133   :  { %v5313_v36 = vpop.xlane.xlu0 %425  ;;  %v5315_v46 = vpop.eup %4262  ;;  %4288 = vpow2.f32 %v588_v23  ;;  %v518_v1 = vsub.f32 %v384_v10, %v454_v38  ;;  %v469_v56 = vmax.f32 %v5264_v3, %v5308_v8  ;;  %v564_v59 = vmul.f32 1.442695, %v487_v48 }
 0x134   :  { %1510 = vbcast.lane.b32.xlu0 %v5141_v16, 256  ;;  %v5319_v52 = vpop.eup %4264  ;;  %4290 = vpow2.f32 %v652_v14  ;;  %v5331_v23 = vadd.f32 %v4507_v19, %v5267_v32  ;;  %v870_v39 = vsel %vm249_vm0, %v798_v7, 0.0  ;;  %v628_v10 = vmul.f32 1.442695, %v519_v12  ;;  %v4508_v32 = vld [vmem:[#allocation5 + $0x10] sm:$0xff] }
 0x135   :  { %v5325_v28 = vpop.eup %4266  ;;  %4292 = vrcp.f32 %v674_v4  ;;  %v468_v38 = vmax.f32 %v5276_v20, %v5313_v36  ;;  %v871_v41 = vsel %vm249_vm0, %v830_v44, 0.0  ;;  %v5344_v48 = vadd.f32 %v4508_v32, %v866_v51 }
 0x136   :  { %7231 = vst [vmem:[#allocation34_spill] sm:$0xff] %v5325_v28  ;;  %v5327_v26 = vpop.xlane.xlu1 %338  ;;  %1514 = vbcast.lane.b32.xlu1 %v5141_v16, 264  ;;  %7232 = vst [vmem:[#allocation35_spill] sm:$0xff] %v5331_v23  ;;  %v5334_v11 = vpop.eup %4268  ;;  %4294 = vpow2.f32 %v586_v29  ;;  %v562_v16 = vmul.f32 1.442695, %v486_v18  ;;  %v501_v12 = vsub.f32 %v5264_v3, %v469_v56  ;;  %v533_v18 = vsub.f32 %v5308_v8, %v469_v56  ;;  %v4509_v56 = vld [vmem:[#allocation2 + $0x90] sm:$0xff] }
 0x137   :  { %7233 = vst [vmem:[#allocation36_spill] sm:$0xff] %v5334_v11  ;;  %v5338_v14 = vpop.xlane.xlu0 %335  ;;  %v5341_v4 = vpop.eup %4270  ;;  %4296 = vpow2.f32 %v650_v21  ;;  %7234 = vst [vmem:[#allocation37_spill] sm:$0xff] %v5344_v48  ;;  %v626_v29 = vmul.f32 1.442695, %v518_v1  ;;  %v682_v21 = vadd.f32 %v5319_v52, %v5311_v27  ;;  %v872_v58 = vadd.f32 %v871_v41, %v870_v39 }
 0x138   :  { %1521 = vbcast.lane.b32.xlu0 %v5157_v54, 256  ;;  %v5348_v7 = vpop.eup %4272  ;;  %4298 = vrcp.f32 %v683_v43  ;;  %v689_v3 = vadd.f32 %v5334_v11, %v5325_v28  ;;  %v500_v13 = vsub.f32 %v5276_v20, %v468_v38  ;;  %v592_v20 = vmul.f32 1.442695, %v501_v12 }
 0x139   :  { %v5353_v44 = vpop.eup %4274  ;;  %4300 = vpow2.f32 %v564_v59  ;;  %v688_v8 = vadd.f32 %v5348_v7, %v5341_v4  ;;  %v812_v59 = vmul.f32 %v4509_v56, %v735_v25  ;;  %v709_v32 = vmul.f32 %v5198_v60, %v5065_v6  ;;  %v4511_v6 = vld [vmem:[#allocation5 + $0x20] sm:$0xff] }
 0x13a   :  { %v393_v51 = vpop.xlane.xlu1 %392  ;;  %1525 = vbcast.lane.b32.xlu1 %v5157_v54, 264  ;;  %v5359_v19 = vpop.eup %4276  ;;  %4302 = vpow2.f32 %v628_v10  ;;  %v532_v54 = vsub.f32 %v5313_v36, %v468_v38  ;;  %v4510_v10 = vld [vmem:[#allocation2 + $0x190] sm:$0xff]  ;;  %v656_v28 = vmul.f32 1.442695, %v533_v18  ;;  %v5389_v56 = vadd.f32 %v4511_v6, %v872_v58  ;;  %v4513_v6 = vld [vmem:[#allocation2 + $0x128] sm:$0xff] }
 0x13b   :  { %v457_v50 = vmax.f32 %v5000_v47, %v393_v51  ;;  %v5365_v43 = vpop.xlane.xlu0 %389  ;;  %v5367_v1 = vpop.eup %4278  ;;  %4304 = vpow2.f32 %v562_v16  ;;  %v844_v41 = vmul.f32 %v4510_v10, %v780_v37  ;;  %v912_v18 = vsel %vm249_vm0, %v812_v59, 0.0 }
 0x13c   :  { %1532 = vbcast.lane.b32.xlu0 %v5161_v53, 256  ;;  %v5373_v39 = vpop.eup %4280  ;;  %4306 = vpow2.f32 %v626_v29  ;;  %v456_v36 = vmax.f32 %v5002_v22, %v5365_v43  ;;  %v590_v29 = vmul.f32 1.442695, %v500_v13  ;;  %7237 = vst [vmem:[#allocation40_spill] sm:$0xff] %v5389_v56 }
 0x13d   :  { %7235 = vst [vmem:[#allocation38_spill] sm:$0xff] %v5373_v39  ;;  %v5377_v11 = vpop.eup %4282  ;;  %4308 = vrcp.f32 %v682_v21  ;;  %v489_v16 = vsub.f32 %v5000_v47, %v457_v50  ;;  %v521_v12 = vsub.f32 %v393_v51, %v457_v50  ;;  %v654_v47 = vmul.f32 1.442695, %v532_v54 }
 0x13e   :  { %7236 = vst [vmem:[#allocation39_spill] sm:$0xff] %v5377_v11  ;;  %v5382_v38 = vpop.xlane.xlu1 %434  ;;  %1536 = vbcast.lane.b32.xlu1 %v5161_v53, 264  ;;  %v5385_v25 = vpop.eup %4284  ;;  %4310 = vrcp.f32 %v689_v3  ;;  %v767_v53 = vmul.f32 %v5198_v60, %v5069_v30  ;;  %v677_v51 = vadd.f32 %v5377_v11, %v5373_v39  ;;  %v913_v58 = vsel %vm249_vm0, %v844_v41, 0.0  ;;  %v4512_v3 = vld [vmem:[#allocation2 + $0x28] sm:$0xff] }
 0x13f   :  { %v5387_v37 = vpop.xlane.xlu0 %431  ;;  %v5391_v21 = vpop.eup %4286  ;;  %4312 = vrcp.f32 %v688_v8  ;;  %v799_v13 = vmul.f32 %v4512_v3, %v709_v32  ;;  %v568_v8 = vmul.f32 1.442695, %v489_v16  ;;  %v488_v54 = vsub.f32 %v5002_v22, %v456_v36 }
 0x140   :  { %1543 = vbcast.lane.b32.xlu0 %v5170_v33, 256  ;;  %v5397_v10 = vpop.eup %4288  ;;  %4314 = vpow2.f32 %v592_v20  ;;  %v471_v59 = vmax.f32 %v5327_v26, %v5382_v38  ;;  %v632_v20 = vmul.f32 1.442695, %v521_v12  ;;  %v520_v41 = vsub.f32 %v5365_v43, %v456_v36 }
 0x141   :  { %7238 = vst [vmem:[#allocation41_spill] sm:$0xff] %v5397_v10  ;;  %v5402_v50 = vpop.eup %4290  ;;  %4316 = vpow2.f32 %v656_v28  ;;  %v5415_v32 = vmax.f32 %v5338_v14, %v5387_v37  ;;  %v676_v16 = vadd.f32 %v5391_v21, %v5385_v25  ;;  %v699_v36 = vmul.f32 %v5282_v31, %v5125_v40 }
 0x142   :  { %7239 = vst [vmem:[#allocation42_spill] sm:$0xff] %v5402_v50  ;;  %v5407_v30 = vpop.xlane.xlu1 %344  ;;  %1547 = vbcast.lane.b32.xlu1 %v5170_v33, 264  ;;  %v5410_v60 = vpop.eup %4292  ;;  %4318 = vpow2.f32 %v590_v29  ;;  %v914_v33 = vadd.f32 %v913_v58, %v912_v18  ;;  %v831_v29 = vmul.f32 %v4513_v6, %v767_v53  ;;  %v691_v43 = vadd.f32 %v5402_v50, %v5397_v10 }
 0x143   :  { %v5417_v28 = vpop.xlane.xlu0 %341  ;;  %v5419_v22 = vpop.eup %4294  ;;  %4320 = vpow2.f32 %v654_v47  ;;  %v762_v3 = vmul.f32 %v5282_v31, %v5134_v45  ;;  %v566_v47 = vmul.f32 1.442695, %v488_v54  ;;  %v503_v18 = vsub.f32 %v5327_v26, %v471_v59 }
 0x144   :  { %1554 = vbcast.lane.b32.xlu0 %v5196_v55, 256  ;;  %v5424_v12 = vpop.eup %4296  ;;  %4322 = vrcp.f32 %v677_v51  ;;  %v873_v53 = vsel %vm249_vm0, %v799_v13, 0.0  ;;  %v630_v6 = vmul.f32 1.442695, %v520_v41  ;;  %v535_v40 = vsub.f32 %v5382_v38, %v471_v59  ;;  %v4514_v38 = vld [vmem:[#allocation5 + $0x90] sm:$0xff]  ;;  %v4515_v59 = vld [vmem:[#allocation2] sm:$0xff] }
 0x145   :  { %7240 = vst [vmem:[#allocation43_spill] sm:$0xff] %v5424_v12  ;;  %v5432_v11 = vpop.eup %4298  ;;  %4324 = vpow2.f32 %v568_v8  ;;  %v502_v45 = vsub.f32 %v5338_v14, %v5415_v32  ;;  %v690_v26 = vadd.f32 %v5424_v12, %v5419_v22  ;;  %v874_v13 = vsel %vm249_vm0, %v831_v29, 0.0  ;;  %v4516_v41 = vld [vmem:[#allocation2 + $0x100] sm:$0xff] }
 0x146   :  { %v5435_v58 = vpop.xlane.xlu1 %440  ;;  %1558 = vbcast.lane.b32.xlu1 %v5196_v55, 264  ;;  %v5439_v51 = vpop.eup %4300  ;;  %4326 = vpow2.f32 %v632_v20  ;;  %v5456_v14 = vadd.f32 %v4514_v38, %v914_v33  ;;  %v794_v20 = vmul.f32 %v4515_v59, %v699_v36  ;;  %v596_v10 = vmul.f32 1.442695, %v503_v18 }
 0x147   :  { %v5444_v31 = vpop.xlane.xlu0 %437  ;;  %v5446_v8 = vpop.eup %4302  ;;  %4328 = vrcp.f32 %v676_v16  ;;  %v473_v55 = vmax.f32 %v5407_v30, %v5435_v58  ;;  %v826_v16 = vmul.f32 %v4516_v41, %v762_v3  ;;  %v534_v39 = vsub.f32 %v5387_v37, %v5415_v32 }
 0x148   :  { %7241 = vst [vmem:[#allocation44_spill] sm:$0xff] %v5446_v8  ;;  %1565 = vbcast.lane.b32.xlu0 %v5203_v2, 256  ;;  %v5454_v54 = vpop.eup %4304  ;;  %4330 = vrcp.f32 %v691_v43  ;;  %7242 = vst [vmem:[#allocation45_spill] sm:$0xff] %v5456_v14  ;;  %v472_v29 = vmax.f32 %v5417_v28, %v5444_v31  ;;  %v660_v43 = vmul.f32 1.442695, %v535_v40  ;;  %v875_v38 = vadd.f32 %v874_v13, %v873_v53 }
 0x149   :  { %v5458_v50 = vpop.eup %4306  ;;  %4332 = vpow2.f32 %v566_v47  ;;  %v594_v36 = vmul.f32 1.442695, %v502_v45  ;;  %v679_v37 = vadd.f32 %v5446_v8, %v5439_v51  ;;  %v505_v32 = vsub.f32 %v5407_v30, %v473_v55  ;;  %v4519_v8 = vld [vmem:[#allocation2 + $0x198] sm:$0xff] }
 0x14a   :  { %v5464_v12 = vpop.xlane.xlu1 %1345  ;;  %1569 = vbcast.lane.b32.xlu1 %v5203_v2, 264  ;;  %v5467_v33 = vpop.eup %4308  ;;  %4334 = vpow2.f32 %v630_v6  ;;  %v737_v2 = vmul.f32 %v5259_v34, %v5089_v63  ;;  %v678_v6 = vadd.f32 %v5458_v50, %v5454_v54  ;;  %v537_v53 = vsub.f32 %v5435_v58, %v473_v55 }
 0x14b   :  { %v5469_v3 = vpop.xlane.xlu0 %1342  ;;  %v5471_v47 = vpop.eup %4310  ;;  %4336 = vrcp.f32 %v690_v26  ;;  %v858_v40 = vsel %vm249_vm0, %v794_v20, 0.0  ;;  %v859_v45 = vsel %vm249_vm0, %v826_v16, 0.0  ;;  %v658_v30 = vmul.f32 1.442695, %v534_v39  ;;  %v4517_v20 = vld [vmem:[#allocation5 + $0x28] sm:$0xff] }
 0x14c   :  { %1576 = vbcast.lane.b32.xlu0 %v5227_v42, 256  ;;  %v5479_v18 = vpop.eup %4312  ;;  %4338 = vpow2.f32 %v596_v10  ;;  %v504_v13 = vsub.f32 %v5417_v28, %v472_v29  ;;  %v781_v63 = vmul.f32 %v5259_v34, %v5092_v0  ;;  %v536_v58 = vsub.f32 %v5444_v31, %v472_v29  ;;  %v4518_v34 = vld [vmem:[#allocation2 + $0x98] sm:$0xff] }
 0x14d   :  { %v5486_v26 = vpop.eup %4314  ;;  %4340 = vpow2.f32 %v660_v43  ;;  %v5495_v16 = vadd.f32 %v4517_v20, %v875_v38  ;;  %v5499_v39 = vmul.f32 %v5315_v46, %v5181_v15  ;;  %v5504_v0 = vadd.f32 %v859_v45, %v858_v40 }
 0x14e   :  { %v1009_v59 = vpop.permute.xlu1 %1008  ;;  %1580 = vbcast.lane.b32.xlu1 %v5227_v42, 264  ;;  %v5492_v41 = vpop.eup %4316  ;;  %4342 = vrcp.f32 %v679_v37  ;;  %v600_v42 = vmul.f32 1.442695, %v505_v32  ;;  %v813_v28 = vmul.f32 %v4518_v34, %v737_v2  ;;  %v664_v31 = vmul.f32 1.442695, %v537_v53 }
 0x14f   :  { %7243 = vst [vmem:[#allocation46_spill] sm:$0xff] %v5492_v41  ;;  %v1005_v55 = vpop.permute.xlu0 %1004  ;;  %7244 = vst [vmem:[#allocation47_spill] sm:$0xff] %v5495_v16  ;;  %v5501_v10 = vpop.eup %4318  ;;  %4344 = vrcp.f32 %v678_v6  ;;  %v1167_v38 = vmul.f32 %v1009_v59, %v5331_v23  ;;  %v598_v20 = vmul.f32 1.442695, %v504_v13  ;;  %v845_v40 = vmul.f32 %v4519_v8, %v781_v63 }
 0x150   :  { %1587 = vbcast.lane.b32.xlu0 %v5231_v9, 256  ;;  %v5506_v43 = vpop.eup %4320  ;;  %4346 = vpow2.f32 %v594_v36  ;;  %v1166_v37 = vmul.f32 %v1005_v55, %v5344_v48  ;;  %v693_v6 = vadd.f32 %v5492_v41, %v5486_v26  ;;  %v662_v53 = vmul.f32 1.442695, %v536_v58 }
 0x151   :  { %v5510_v15 = vpop.eup %4322  ;;  %4348 = vpow2.f32 %v658_v30  ;;  %v1206_v45 = vsel %vm249_vm0, %v1167_v38, 0.0  ;;  %v692_v36 = vadd.f32 %v5506_v43, %v5501_v10  ;;  %v916_v58 = vsel %vm249_vm0, %v845_v40, 0.0 }
 0x152   :  { %v1016_v32 = vpop.permute.xlu1 %1015  ;;  %1591 = vbcast.lane.b32.xlu1 %v5231_v9, 264  ;;  %v5514_v2 = vpop.eup %4324  ;;  %v1205_v8 = vsel %vm249_vm0, %v1166_v37, 0.0  ;;  %v915_v9 = vsel %vm249_vm0, %v813_v28, 0.0  ;;  %4350 = vpow2.f32 %v600_v42 }
 0x153   :  { %7245 = vst [vmem:[#allocation48_spill] sm:$0xff] %v5514_v2  ;;  %v5519_v59 = vpop.eup %4326  ;;  %v1207_v30 = vadd.f32 %v1206_v45, %v1205_v8  ;;  %4352 = vpow2.f32 %v664_v31  ;;  %v1093_v13 = vpop.permute.xlu0 %1092  ;;  %v917_v37 = vadd.f32 %v916_v58, %v915_v9  ;;  %v1168_v29 = vmul.f32 %v1016_v32, %v5389_v56  ;;  %v4520_v58 = vld [vmem:[#allocation5 + $0x98] sm:$0xff] }
 0x154   :  { %7246 = vst [vmem:[#allocation49_spill] sm:$0xff] %v5519_v59  ;;  %v5526_v63 = vpop.eup %4328  ;;  %4354 = vrcp.f32 %v693_v6  ;;  %v681_v42 = vadd.f32 %v5519_v59, %v5514_v2  ;;  %v1182_v9 = vmul.f32 %v1093_v13, %v5456_v14  ;;  %v768_v31 = vmul.f32 %v5315_v46, %v5190_v5 }
 0x155   :  { %v5530_v34 = vpop.eup %4330  ;;  %4356 = vrcp.f32 %v692_v36  ;;  %v1208_v8 = vrot.slane %v1207_v30, 4  ;;  %v5548_v55 = vadd.f32 %v4520_v58, %v917_v37 }
 0x156   :  { %v1020_v23 = vpop.permute.xlu1 %1019  ;;  %v5534_v48 = vpop.eup %4332  ;;  %4358 = vpow2.f32 %v598_v20  ;;  %v1277_v13 = vsel %vm249_vm0, %v1182_v9, 0.0 }
 0x157   :  { %v1169_v40 = vmul.f32 %v1020_v23, %v5495_v16  ;;  %v5540_v45 = vpop.eup %4334  ;;  %7247 = vst [vmem:[#allocation50_spill] sm:$0xff] %v5548_v55  ;;  %4360 = vpow2.f32 %v662_v53  ;;  %v1209_v53 = vadd.f32 %v1208_v8, %v1207_v30  ;;  %v4521_v23 = vld [vmem:[#allocation5] sm:$0xff]  ;;  %v4522_v8 = vld [vmem:[#allocation2 + $0x30] sm:$0xff] }
 0x158   :  { %v5544_v38 = vpop.eup %4336  ;;  %4362 = vrcp.f32 %v681_v42  ;;  %v680_v20 = vadd.f32 %v5540_v45, %v5534_v48  ;;  %v5565_v5 = vadd.f32 %v4521_v23, %v5504_v0  ;;  %v7251_v42 = vrot.slane %v5464_v12, 1  ;;  %v7252_v23 = vld [vmem:[#allocation25_spill] sm:$0xff] }
 0x159   :  { %v1215_v36 = vsel %vm249_vm0, %v1169_v40, 0.0  ;;  %v5554_v32 = vpop.eup %4338  ;;  %4364 = vrcp.f32 %v5464_v12  ;;  %v1214_v40 = vsel %vm249_vm0, %v1168_v29, 0.0  ;;  %v800_v29 = vmul.f32 %v4522_v8, %v5499_v39 }
 0x15a   :  { %v1097_v28 = vpop.permute.xlu1 %1096  ;;  %7248 = vst [vmem:[#allocation51_spill] sm:$0xff] %v5554_v32  ;;  %v5560_v58 = vpop.eup %4340  ;;  %7250 = vst [vmem:[#allocation53_spill] sm:$0xff] %v5565_v5  ;;  %4366 = vrcp.f32 %v7251_v42  ;;  %v1216_v6 = vadd.f32 %v1215_v36, %v1214_v40  ;;  %v701_v14 = vmul.f32 %v5278_v17, %v7252_v23  ;;  %v7256_v42 = vrot.slane %v5464_v12, 2  ;;  %v4524_v23 = vld [vmem:[#allocation2 + $0x8] sm:$0xff] }
 0x15b   :  { %v1183_v37 = vmul.f32 %v1097_v28, %v5548_v55  ;;  %7249 = vst [vmem:[#allocation52_spill] sm:$0xff] %v5560_v58  ;;  %v5567_v46 = vpop.eup %4342  ;;  %v994_v28 = vpop.permute.xlu0 %993  ;;  %v4523_v55 = vld [vmem:[#allocation2 + $0x130] sm:$0xff]  ;;  %4368 = vrcp.f32 %v680_v20  ;;  %v695_v9 = vadd.f32 %v5560_v58, %v5554_v32  ;;  %v7261_v20 = vrot.slane %v5464_v12, 4 }
 0x15c   :  { %v5573_v16 = vpop.eup %4344  ;;  %v832_v0 = vmul.f32 %v4523_v55, %v768_v31  ;;  %v1164_v39 = vmul.f32 %v994_v28, %v5565_v5  ;;  %v7255_v55 = vld [vmem:[#allocation26_spill] sm:$0xff]  ;;  %4370 = vrcp.f32 %v7256_v42  ;;  %v1217_v8 = vrot.slane %v1216_v6, 4 }
 0x15d   :  { %v1278_v56 = vsel %vm249_vm0, %v1183_v37, 0.0  ;;  %v5578_v59 = vpop.eup %4346  ;;  %v763_v31 = vmul.f32 %v5278_v17, %v7255_v55  ;;  %v795_v58 = vmul.f32 %v4524_v23, %v701_v14  ;;  %v7258_v37 = vrot.slane %v5464_v12, 3  ;;  %v4525_v55 = vld [vmem:[#allocation2 + $0x108] sm:$0xff] }
 0x15e   :  { %v1279_v30 = vadd.f32 %v1278_v56, %v1277_v13  ;;  %7253 = vst [vmem:[#allocation25_spill] sm:$0xff] %v5578_v59  ;;  %v5584_v40 = vpop.eup %4348  ;;  %v1210_v56 = vrot.slane %v1209_v53, 2  ;;  %v876_v28 = vsel %vm249_vm0, %v800_v29, 0.0  ;;  %v877_v5 = vsel %vm249_vm0, %v832_v0, 0.0 }
 0x15f   :  { %7254 = vst [vmem:[#allocation54_spill] sm:$0xff] %v5584_v40  ;;  %v5592_v36 = vpop.eup %4350  ;;  %4372 = vrcp.f32 %v7258_v37  ;;  %v694_v17 = vadd.f32 %v5584_v40, %v5578_v59  ;;  %v827_v42 = vmul.f32 %v4525_v55, %v763_v31  ;;  %v861_v14 = vsel %vm249_vm0, %v795_v58, 0.0 }
 0x160   :  { %v1280_v13 = vrot.slane %v1279_v30, 4  ;;  %7257 = vst [vmem:[#allocation26_spill] sm:$0xff] %v5592_v36  ;;  %v5598_v2 = vpop.eup %4352  ;;  %4374 = vrcp.f32 %v695_v9  ;;  %v5608_v29 = vadd.f32 %v1210_v56, %v1209_v53  ;;  %v1196_v0 = vsel %vm249_vm0, %v1164_v39, 0.0 }
 0x161   :  { %7259 = vst [vmem:[#allocation55_spill] sm:$0xff] %v5598_v2  ;;  %v5603_v23 = vpop.eup %4354  ;;  %4376 = vrcp.f32 %v7261_v20  ;;  %v1218_v9 = vadd.f32 %v1217_v8, %v1216_v6  ;;  %v862_v40 = vsel %vm249_vm0, %v827_v42, 0.0  ;;  %v713_v58 = vmul.f32 %v5294_v61, %v5149_v49  ;;  %v998_v6 = vpop.permute.xlu1 %997  ;;  %v7263_v8 = vld [vmem:[#allocation30_spill] sm:$0xff] }
 0x162   :  { %v1281_v32 = vadd.f32 %v1280_v13, %v1279_v30  ;;  %7260 = vst [vmem:[#allocation56_spill] sm:$0xff] %v5603_v23  ;;  %v5611_v37 = vpop.eup %4356  ;;  %v878_v13 = vadd.f32 %v877_v5, %v876_v28  ;;  %v697_v20 = vadd.f32 %v5598_v2, %v5592_v36  ;;  %v7262_v55 = vrot.slane %v5464_v12, 5  ;;  %v7264_v28 = vld [vmem:[#allocation27_spill] sm:$0xff] }
 0x163   :  { %v5616_v31 = vpop.eup %4358  ;;  %v863_v56 = vadd.f32 %v862_v40, %v861_v14  ;;  %v739_v5 = vmul.f32 %v5359_v19, %v5223_v24  ;;  %v782_v49 = vmul.f32 %v5359_v19, %v7263_v8  ;;  %v769_v42 = vmul.f32 %v5294_v61, %v7264_v28  ;;  %v4526_v14 = vld [vmem:[#allocation5 + $0x8] sm:$0xff]  ;;  %v4528_v8 = vld [vmem:[#allocation5 + $0x30] sm:$0xff]  ;;  %v1027_v28 = vpop.permute.xlu0 %1026 }
 0x164   :  { %4378 = vrcp.f32 %v7262_v55  ;;  %v1282_v53 = vrot.slane %v1281_v32, 2  ;;  %v5622_v39 = vpop.eup %4360  ;;  %v7266_v2 = vrot.slane %v5464_v12, 6  ;;  %v1212_v40 = vrot.slane %v5608_v29, 1 }
 0x165   :  { %4380 = vrcp.f32 %v694_v17  ;;  %v5630_v30 = vpop.eup %4362  ;;  %v5635_v55 = vadd.f32 %v4526_v14, %v863_v56  ;;  %v4527_v17 = vld [vmem:[#allocation2 + $0x38] sm:$0xff]  ;;  %v7269_v24 = vrot.slane %v5464_v12, 7  ;;  %v1219_v19 = vrot.slane %v1218_v9, 2  ;;  %v4531_v12 = vld [vmem:[#allocation2 + $0x1a0] sm:$0xff] }
 0x166   :  { %7265 = vst [vmem:[#allocation30_spill] sm:$0xff] %v5630_v30  ;;  %4382 = vrcp.f32 %v7266_v2  ;;  %v801_v36 = vmul.f32 %v4527_v17, %v713_v58  ;;  %v5637_v59 = vpop.eup %4364  ;;  %v5641_v61 = vadd.f32 %v4528_v8, %v878_v13  ;;  %v4529_v30 = vld [vmem:[#allocation2 + $0x138] sm:$0xff]  ;;  %v696_v56 = vadd.f32 %v5622_v39, %v5616_v31  ;;  %v4530_v17 = vld [vmem:[#allocation2 + $0xa0] sm:$0xff] }
 0x167   :  { %7267 = vst [vmem:[#allocation27_spill] sm:$0xff] %v5635_v55  ;;  %7268 = vst [vmem:[#allocation57_spill] sm:$0xff] %v5637_v59  ;;  %4384 = vrcp.f32 %v7269_v24  ;;  %v833_v41 = vmul.f32 %v4529_v30, %v769_v42  ;;  %v5643_v2 = vpop.eup %4366  ;;  %v1283_v14 = vadd.f32 %v1282_v53, %v1281_v32  ;;  %v1165_v58 = vmul.f32 %v998_v6, %v5635_v55 }
 0x168   :  { %7270 = vst [vmem:[#allocation58_spill] sm:$0xff] %v5641_v61  ;;  %4386 = vrcp.f32 %v697_v20  ;;  %v814_v59 = vmul.f32 %v4530_v17, %v739_v5  ;;  %v846_v24 = vmul.f32 %v4531_v12, %v782_v49  ;;  %v879_v23 = vsel %vm249_vm0, %v801_v36, 0.0  ;;  %v5650_v8 = vpop.eup %4368  ;;  %v1031_v5 = vpop.permute.xlu1 %1030  ;;  %v7272_v49 = vld [vmem:[#allocation28_spill] sm:$0xff]  ;;  %v4532_v12 = vld [vmem:[#allocation5 + $0x38] sm:$0xff] }
 0x169   :  { %v880_v13 = vsel %vm249_vm0, %v833_v41, 0.0  ;;  %4388 = vrcp.f32 %v5469_v3  ;;  %v1170_v30 = vmul.f32 %v1027_v28, %v5641_v61  ;;  %v1197_v20 = vsel %vm249_vm0, %v1165_v58, 0.0  ;;  %v5661_v41 = vpop.eup %4370  ;;  %v7274_v28 = vld [vmem:[#allocation29_spill] sm:$0xff] }
 0x16a   :  { %v881_v42 = vadd.f32 %v880_v13, %v879_v23  ;;  %v7271_v32 = vrot.slane %v5469_v3, 1  ;;  %v5657_v53 = vadd.f32 %v1219_v19, %v1218_v9  ;;  %v1198_v6 = vadd.f32 %v1197_v20, %v1196_v0  ;;  %v4533_v19 = vld [vmem:[#allocation2 + $0xa8] sm:$0xff] }
 0x16b   :  { %v741_v36 = vmul.f32 %v5353_v44, %v7272_v49  ;;  %v1284_v17 = vrot.slane %v1283_v14, 1  ;;  %v783_v23 = vmul.f32 %v5353_v44, %v7274_v28  ;;  %v918_v9 = vsel %vm249_vm0, %v814_v59, 0.0  ;;  %v7277_v49 = vld [vmem:[#allocation33_spill] sm:$0xff]  ;;  %v4534_v44 = vld [vmem:[#allocation2 + $0x1a8] sm:$0xff] }
 0x16c   :  { %4390 = vrcp.f32 %v7271_v32  ;;  %v5663_v55 = vadd.f32 %v4532_v12, %v881_v42  ;;  %v5667_v58 = vpop.eup %4372  ;;  %v1199_v13 = vrot.slane %v1198_v6, 4  ;;  %v919_v0 = vsel %vm249_vm0, %v846_v24, 0.0 }
 0x16d   :  { %4392 = vrcp.f32 %v696_v56  ;;  %7275 = vst [vmem:[#allocation29_spill] sm:$0xff] %v5667_v58  ;;  %v815_v20 = vmul.f32 %v4533_v19, %v741_v36  ;;  %v5671_v32 = vpop.eup %4374  ;;  %v715_v42 = vmul.f32 %v5410_v60, %v5285_v62  ;;  %v770_v12 = vmul.f32 %v5410_v60, %v7277_v49 }
 0x16e   :  { %7273 = vst [vmem:[#allocation28_spill] sm:$0xff] %v5663_v55  ;;  %7276 = vst [vmem:[#allocation59_spill] sm:$0xff] %v5671_v32  ;;  %v1171_v56 = vmul.f32 %v1031_v5, %v5663_v55  ;;  %v847_v28 = vmul.f32 %v4534_v44, %v783_v23  ;;  %v5678_v61 = vpop.eup %4376  ;;  %v7279_v59 = vrot.slane %v5469_v3, 2  ;;  %v5683_v24 = vadd.f32 %v1212_v40, %v5608_v29 }
 0x16f   :  { %7278 = vst [vmem:[#allocation33_spill] sm:$0xff] %v5678_v61  ;;  %v1223_v36 = vsel %vm249_vm0, %v1170_v30, 0.0  ;;  %v921_v5 = vsel %vm249_vm0, %v815_v20, 0.0  ;;  %v1200_v19 = vadd.f32 %v1199_v13, %v1198_v6  ;;  %v920_v55 = vadd.f32 %v919_v0, %v918_v9  ;;  %v4535_v6 = vld [vmem:[#allocation2 + $0x40] sm:$0xff]  ;;  %v1108_v61 = vpop.permute.xlu1 %1107 }
 0x170   :  { %4394 = vrcp.f32 %v7279_v59  ;;  %v1224_v62 = vsel %vm249_vm0, %v1171_v56, 0.0  ;;  %v922_v60 = vsel %vm249_vm0, %v847_v28, 0.0  ;;  %v7281_v23 = vrot.slane %v5469_v3, 3  ;;  %v4536_v9 = vld [vmem:[#allocation2 + $0x140] sm:$0xff]  ;;  %v1104_v28 = vpop.permute.xlu0 %1103 }
 0x171   :  { %v5689_v49 = vpop.eup %4378  ;;  %v1221_v44 = vrot.slane %v5657_v53, 1  ;;  %v1285_v59 = vadd.f32 %v1284_v17, %v1283_v14  ;;  %v1225_v29 = vadd.f32 %v1224_v62, %v1223_v36  ;;  %v7282_v30 = vrot.slane %v5469_v3, 4  ;;  %v7284_v17 = vld [vmem:[#allocation31_spill] sm:$0xff] }
 0x172   :  { %7280 = vst [vmem:[#allocation60_spill] sm:$0xff] %v5689_v49  ;;  %4396 = vrcp.f32 %v7281_v23  ;;  %v5694_v40 = vpop.eup %4380  ;;  %v802_v13 = vmul.f32 %v4535_v6, %v715_v42  ;;  %v834_v0 = vmul.f32 %v4536_v9, %v770_v12  ;;  %v923_v20 = vadd.f32 %v922_v60, %v921_v5  ;;  %v4537_v5 = vld [vmem:[#allocation5 + $0xa0] sm:$0xff] }
 0x173   :  { %4398 = vrcp.f32 %v7282_v30  ;;  %v5698_v56 = vpop.eup %4382  ;;  %v1226_v49 = vrot.slane %v1225_v29, 4  ;;  %v731_v23 = vmul.f32 %v5467_v33, %v5311_v27  ;;  %v778_v14 = vmul.f32 %v5467_v33, %v5319_v52  ;;  %v4538_v30 = vld [vmem:[#allocation5 + $0xa8] sm:$0xff] }
 0x174   :  { %7283 = vst [vmem:[#allocation61_spill] sm:$0xff] %v5698_v56  ;;  %v717_v36 = vmul.f32 %v5367_v1, %v7284_v17  ;;  %v5706_v62 = vpop.eup %4384  ;;  %v7286_v42 = vrot.slane %v5469_v3, 5  ;;  %v1201_v12 = vrot.slane %v1200_v19, 2  ;;  %v5710_v60 = vadd.f32 %v4537_v5, %v920_v55  ;;  %v7289_v17 = vld [vmem:[#allocation32_spill] sm:$0xff] }
 0x175   :  { %7285 = vst [vmem:[#allocation31_spill] sm:$0xff] %v5706_v62  ;;  %v5712_v6 = vadd.f32 %v4538_v30, %v923_v20  ;;  %v5714_v9 = vpop.eup %4386  ;;  %v7288_v27 = vrot.slane %v5469_v3, 6  ;;  %v5719_v52 = vmul.f32 %v5643_v2, %v1285_v59  ;;  %v1227_v33 = vadd.f32 %v1226_v49, %v1225_v29  ;;  %v4539_v20 = vld [vmem:[#allocation2 + $0x48] sm:$0xff]  ;;  %v4541_v2 = vld [vmem:[#allocation2 + $0x180] sm:$0xff] }
 0x176   :  { %4400 = vrcp.f32 %v7286_v42  ;;  %7287 = vst [vmem:[#allocation62_spill] sm:$0xff] %v5714_v9  ;;  %v771_v62 = vmul.f32 %v5367_v1, %v7289_v17  ;;  %v1184_v42 = vmul.f32 %v1104_v28, %v5710_v60  ;;  %v882_v55 = vsel %vm249_vm0, %v802_v13, 0.0  ;;  %v5726_v56 = vpop.eup %4388  ;;  %v4542_v49 = vld [vmem:[#allocation2 + $0x148] sm:$0xff] }
 0x177   :  { %4402 = vrcp.f32 %v7288_v27  ;;  %v1185_v5 = vmul.f32 %v1108_v61, %v5712_v6  ;;  %v803_v30 = vmul.f32 %v4539_v20, %v717_v36  ;;  %v883_v58 = vsel %vm249_vm0, %v834_v0, 0.0  ;;  %v4540_v27 = vld [vmem:[#allocation2 + $0x80] sm:$0xff] }
 0x178   :  { %v810_v9 = vmul.f32 %v4540_v27, %v731_v23  ;;  %v842_v59 = vmul.f32 %v4541_v2, %v778_v14  ;;  %v835_v29 = vmul.f32 %v4542_v49, %v771_v62  ;;  %v7290_v1 = vrot.slane %v5469_v3, 7 }
 0x179   :  { %v4391_v32 = vpop.eup %4390  ;;  %v1222_v13 = vadd.f32 %v1221_v44, %v5657_v53  ;;  %v1202_v28 = vadd.f32 %v1201_v12, %v1200_v19  ;;  %v743_v61 = vmul.f32 %v5479_v18, %v5341_v4  ;;  %v1228_v17 = vrot.slane %v1227_v33, 2  ;;  %v1038_v44 = vpop.permute.xlu0 %1037 }
 0x17a   :  { %4404 = vrcp.f32 %v7290_v1  ;;  %v5734_v36 = vpop.eup %4392  ;;  %v885_v23 = vsel %vm249_vm0, %v803_v30, 0.0  ;;  %v784_v14 = vmul.f32 %v5479_v18, %v5348_v7  ;;  %v884_v62 = vadd.f32 %v883_v58, %v882_v55  ;;  %v4543_v58 = vld [vmem:[#allocation2 + $0xb0] sm:$0xff] }
 0x17b   :  { %v1287_v3 = vsel %vm249_vm0, %v1185_v5, 0.0  ;;  %v886_v20 = vsel %vm249_vm0, %v835_v29, 0.0  ;;  %v733_v53 = vmul.f32 %v5432_v11, %v5299_v57  ;;  %v5745_v4 = vmul.f32 %v4391_v32, %v5683_v24  ;;  %v1042_v32 = vpop.permute.xlu1 %1041  ;;  %v4544_v24 = vld [vmem:[#allocation2 + $0x1b0] sm:$0xff] }
 0x17c   :  { %v1286_v19 = vsel %vm249_vm0, %v1184_v42, 0.0  ;;  %v906_v12 = vsel %vm249_vm0, %v810_v9, 0.0  ;;  %v907_v30 = vsel %vm249_vm0, %v842_v59, 0.0  ;;  %v1203_v7 = vrot.slane %v1202_v28, 1  ;;  %v4545_v42 = vld [vmem:[#allocation2 + $0x88] sm:$0xff]  ;;  %v4546_v59 = vld [vmem:[#allocation5 + $0x40] sm:$0xff] }
 0x17d   :  { %v4395_v27 = vpop.eup %4394  ;;  %v887_v18 = vadd.f32 %v886_v20, %v885_v23  ;;  %v816_v55 = vmul.f32 %v4543_v58, %v743_v61  ;;  %v779_v5 = vmul.f32 %v5432_v11, %v5303_v35  ;;  %v1229_v57 = vadd.f32 %v1228_v17, %v1227_v33  ;;  %v4547_v23 = vld [vmem:[#allocation5 + $0x48] sm:$0xff] }
 0x17e   :  { %v1288_v2 = vadd.f32 %v1287_v3, %v1286_v19  ;;  %v848_v49 = vmul.f32 %v4544_v24, %v784_v14  ;;  %v811_v29 = vmul.f32 %v4545_v42, %v733_v53  ;;  %v5754_v9 = vmul.f32 %v4395_v27, %v1222_v13  ;;  %v4548_v20 = vld [vmem:[#allocation2 + $0x188] sm:$0xff] }
 0x17f   :  { %v5752_v1 = vpop.eup %4396  ;;  %v5756_v0 = vadd.f32 %v4546_v59, %v884_v62  ;;  %v5758_v61 = vadd.f32 %v4547_v23, %v887_v18  ;;  %v843_v35 = vmul.f32 %v4548_v20, %v779_v5  ;;  %v908_v33 = vadd.f32 %v907_v30, %v906_v12  ;;  %v1082_v12 = vpop.permute.xlu0 %1081  ;;  %v4551_v59 = vld [vmem:[#allocation2 + $0x150] sm:$0xff] }
 0x180   :  { %v5760_v11 = vpop.eup %4398  ;;  %v909_v17 = vsel %vm249_vm0, %v811_v29, 0.0  ;;  %v719_v14 = vmul.f32 %v5526_v63, %v5385_v25  ;;  %v772_v13 = vmul.f32 %v5526_v63, %v5391_v21  ;;  %v1204_v3 = vadd.f32 %v1203_v7, %v1202_v28  ;;  %v4550_v29 = vld [vmem:[#allocation2 + $0x50] sm:$0xff] }
 0x181   :  { %7291 = vst [vmem:[#allocation32_spill] sm:$0xff] %v5756_v0  ;;  %v1172_v62 = vmul.f32 %v1038_v44, %v5756_v0  ;;  %v1173_v53 = vmul.f32 %v1042_v32, %v5758_v61  ;;  %v910_v19 = vsel %vm249_vm0, %v843_v35, 0.0  ;;  %v1230_v18 = vrot.slane %v1229_v57, 1  ;;  %v7292_v44 = vld [vmem:[#allocation34_spill] sm:$0xff]  ;;  %v7293_v35 = vld [vmem:[#allocation36_spill] sm:$0xff] }
 0x182   :  { %v1289_v58 = vrot.slane %v1288_v2, 4  ;;  %v924_v30 = vsel %vm249_vm0, %v816_v55, 0.0  ;;  %v925_v5 = vsel %vm249_vm0, %v848_v49, 0.0  ;;  %v1645_v21 = vrot.slane %v5745_v4, 7  ;;  %v4549_v32 = vld [vmem:[#allocation5 + $0x80] sm:$0xff]  ;;  %v1086_v4 = vpop.permute.xlu1 %1085 }
 0x183   :  { %v5770_v27 = vpop.eup %4400  ;;  %v1648_v63 = vrot.slane %v5754_v9, 6  ;;  %v911_v28 = vadd.f32 %v910_v19, %v909_v17  ;;  %v745_v7 = vmul.f32 %v5471_v47, %v7292_v44  ;;  %v5780_v24 = vadd.f32 %v4549_v32, %v908_v33  ;;  %v4552_v17 = vld [vmem:[#allocation2 + $0xb8] sm:$0xff] }
 0x184   :  { %v5774_v25 = vpop.eup %4402  ;;  %v1233_v42 = vsel %vm249_vm0, %v1173_v53, 0.0  ;;  %v804_v55 = vmul.f32 %v4550_v29, %v719_v14  ;;  %v836_v49 = vmul.f32 %v4551_v59, %v772_v13  ;;  %v1380_v23 = vmul.f32 %v5726_v56, %v1204_v3  ;;  %v4553_v29 = vld [vmem:[#allocation5 + $0x88] sm:$0xff]  ;;  %v4554_v56 = vld [vmem:[#allocation2 + $0x1b8] sm:$0xff] }
 0x185   :  { %v926_v20 = vadd.f32 %v925_v5, %v924_v30  ;;  %v785_v9 = vmul.f32 %v5471_v47, %v7293_v35  ;;  %v817_v19 = vmul.f32 %v4552_v17, %v745_v7  ;;  %v1231_v44 = vadd.f32 %v1230_v18, %v1229_v57  ;;  %v1115_v5 = vpop.permute.xlu0 %1114 }
 0x186   :  { %v1232_v33 = vsel %vm249_vm0, %v1172_v62, 0.0  ;;  %v1290_v32 = vadd.f32 %v1289_v58, %v1288_v2  ;;  %v1180_v53 = vmul.f32 %v1082_v12, %v5780_v24  ;;  %v5790_v13 = vadd.f32 %v4553_v29, %v911_v28  ;;  %v7294_v62 = vld [vmem:[#allocation43_spill] sm:$0xff]  ;;  %v4555_v58 = vld [vmem:[#allocation5 + $0xb0] sm:$0xff]  ;;  %v1119_v17 = vpop.permute.xlu1 %1118  ;;  %v4558_v29 = vld [vmem:[#allocation2 + $0x1c0] sm:$0xff] }
 0x187   :  { %v5786_v0 = vpop.eup %4404  ;;  %v1234_v14 = vadd.f32 %v1233_v42, %v1232_v33  ;;  %v849_v3 = vmul.f32 %v4554_v56, %v785_v9  ;;  %v927_v30 = vsel %vm249_vm0, %v817_v19, 0.0  ;;  %v888_v47 = vsel %vm249_vm0, %v804_v55, 0.0 }
 0x188   :  { %v889_v7 = vsel %vm249_vm0, %v836_v49, 0.0  ;;  %v747_v57 = vmul.f32 %v5544_v38, %v5419_v22  ;;  %v786_v2 = vmul.f32 %v5544_v38, %v7294_v62  ;;  %v1647_v18 = vsel %vm1646_vm4, %v1645_v21, %v1380_v23  ;;  %v7295_v21 = vld [vmem:[#allocation38_spill] sm:$0xff] }
 0x189   :  { %v5800_v12 = vadd.f32 %v4555_v58, %v926_v20  ;;  %v1181_v28 = vmul.f32 %v1086_v4, %v5790_v13  ;;  %v928_v42 = vsel %vm249_vm0, %v849_v3, 0.0  ;;  %v5805_v59 = vmul.f32 %v5752_v1, %v1231_v44  ;;  %v4556_v20 = vld [vmem:[#allocation5 + $0xb8] sm:$0xff]  ;;  %v4557_v4 = vld [vmem:[#allocation2 + $0xc0] sm:$0xff]  ;;  %v7296_v44 = vld [vmem:[#allocation39_spill] sm:$0xff] }
 0x18a   :  { %v1291_v55 = vrot.slane %v1290_v32, 2  ;;  %v1268_v49 = vsel %vm249_vm0, %v1180_v53, 0.0  ;;  %v929_v35 = vadd.f32 %v928_v42, %v927_v30  ;;  %v1235_v22 = vrot.slane %v1234_v14, 4  ;;  %v4559_v3 = vld [vmem:[#allocation2 + $0x58] sm:$0xff] }
 0x18b   :  { %v1186_v9 = vmul.f32 %v1115_v5, %v5800_v12  ;;  %v890_v38 = vadd.f32 %v889_v7, %v888_v47  ;;  %v721_v23 = vmul.f32 %v5510_v15, %v7295_v21  ;;  %v818_v33 = vmul.f32 %v4557_v4, %v747_v57  ;;  %v1049_v57 = vpop.permute.xlu0 %1048  ;;  %v4560_v58 = vld [vmem:[#allocation2 + $0x158] sm:$0xff] }
 0x18c   :  { %v5811_v19 = vadd.f32 %v4556_v20, %v929_v35  ;;  %v850_v1 = vmul.f32 %v4558_v29, %v786_v2  ;;  %v773_v56 = vmul.f32 %v5510_v15, %v7296_v44  ;;  %v1269_v53 = vsel %vm249_vm0, %v1181_v28, 0.0  ;;  %v4563_v20 = vld [vmem:[#allocation2 + $0x160] sm:$0xff] }
 0x18d   :  { %v805_v30 = vmul.f32 %v4559_v3, %v721_v23  ;;  %v723_v5 = vmul.f32 %v5573_v16, %v5454_v54  ;;  %v774_v47 = vmul.f32 %v5573_v16, %v5458_v50  ;;  %v5821_v7 = vsel %vm1649_vm5, %v1648_v63, %v1647_v18  ;;  %v7298_v29 = vld [vmem:[#allocation42_spill] sm:$0xff] }
 0x18e   :  { %v5823_v62 = vadd.f32 %v1291_v55, %v1290_v32  ;;  %v1187_v2 = vmul.f32 %v1119_v17, %v5811_v19  ;;  %v837_v15 = vmul.f32 %v4560_v58, %v773_v56  ;;  %v1651_v28 = vrot.slane %v5805_v59, 5  ;;  %v4561_v32 = vld [vmem:[#allocation5 + $0x50] sm:$0xff]  ;;  %v4562_v17 = vld [vmem:[#allocation2 + $0x60] sm:$0xff]  ;;  %v4577_v59 = vld [vmem:[#allocation5 + $0x68] sm:$0xff] }
 0x18f   :  { %v1236_v42 = vadd.f32 %v1235_v22, %v1234_v14  ;;  %v1295_v35 = vsel %vm249_vm0, %v1186_v9, 0.0  ;;  %v891_v54 = vsel %vm249_vm0, %v805_v30, 0.0  ;;  %v1270_v21 = vadd.f32 %v1269_v53, %v1268_v49  ;;  %v1053_v9 = vpop.permute.xlu1 %1052  ;;  %v7297_v49 = vld [vmem:[#allocation41_spill] sm:$0xff] }
 0x190   :  { %v930_v50 = vsel %vm249_vm0, %v818_v33, 0.0  ;;  %v931_v16 = vsel %vm249_vm0, %v850_v1, 0.0  ;;  %v892_v63 = vsel %vm249_vm0, %v837_v15, 0.0  ;;  %v5832_v18 = vadd.f32 %v4561_v32, %v890_v38  ;;  %v4564_v53 = vld [vmem:[#allocation5 + $0x58] sm:$0xff]  ;;  %v4566_v15 = vld [vmem:[#allocation2 + $0x1c8] sm:$0xff] }
 0x191   :  { %v893_v55 = vadd.f32 %v892_v63, %v891_v54  ;;  %v806_v23 = vmul.f32 %v4562_v17, %v723_v5  ;;  %v838_v4 = vmul.f32 %v4563_v20, %v774_v47  ;;  %v1293_v14 = vrot.slane %v5823_v62, 1  ;;  %v1126_v5 = vpop.permute.xlu0 %1125  ;;  %v4565_v47 = vld [vmem:[#allocation2 + $0xc8] sm:$0xff]  ;;  %v4567_v17 = vld [vmem:[#allocation2 + $0xd0] sm:$0xff] }
 0x192   :  { %v1296_v22 = vsel %vm249_vm0, %v1187_v2, 0.0  ;;  %v749_v33 = vmul.f32 %v5530_v34, %v7297_v49  ;;  %v787_v1 = vmul.f32 %v5530_v34, %v7298_v29  ;;  %v1237_v44 = vrot.slane %v1236_v42, 2  ;;  %v4569_v29 = vld [vmem:[#allocation2 + $0x1d0] sm:$0xff] }
 0x193   :  { %v1174_v38 = vmul.f32 %v1049_v57, %v5832_v18  ;;  %v932_v56 = vadd.f32 %v931_v16, %v930_v50  ;;  %v5841_v3 = vadd.f32 %v4564_v53, %v893_v55  ;;  %v1271_v30 = vrot.slane %v1270_v21, 4 }
 0x194   :  { %v819_v58 = vmul.f32 %v4565_v47, %v749_v33  ;;  %v851_v2 = vmul.f32 %v4566_v15, %v787_v1  ;;  %v751_v54 = vmul.f32 %v5611_v37, %v5501_v10  ;;  %v1297_v63 = vadd.f32 %v1296_v22, %v1295_v35  ;;  %v4568_v33 = vld [vmem:[#allocation5 + $0xc0] sm:$0xff] }
 0x195   :  { %v1175_v34 = vmul.f32 %v1053_v9, %v5841_v3  ;;  %v894_v32 = vsel %vm249_vm0, %v806_v23, 0.0  ;;  %v895_v57 = vsel %vm249_vm0, %v838_v4, 0.0  ;;  %v788_v55 = vmul.f32 %v5611_v37, %v5506_v43  ;;  %v1130_v43 = vpop.permute.xlu1 %1129 }
 0x196   :  { %v933_v50 = vsel %vm249_vm0, %v819_v58, 0.0  ;;  %v934_v16 = vsel %vm249_vm0, %v851_v2, 0.0  ;;  %v820_v20 = vmul.f32 %v4567_v17, %v751_v54  ;;  %v1238_v49 = vadd.f32 %v1237_v44, %v1236_v42  ;;  %v1060_v44 = vpop.permute.xlu0 %1059  ;;  %v7299_v54 = vld [vmem:[#allocation44_spill] sm:$0xff] }
 0x197   :  { %v1241_v10 = vsel %vm249_vm0, %v1174_v38, 0.0  ;;  %v5853_v35 = vadd.f32 %v4568_v33, %v932_v56  ;;  %v1242_v22 = vsel %vm249_vm0, %v1175_v34, 0.0  ;;  %v1272_v23 = vadd.f32 %v1271_v30, %v1270_v21  ;;  %v4570_v38 = vld [vmem:[#allocation5 + $0xc8] sm:$0xff]  ;;  %v4573_v33 = vld [vmem:[#allocation5 + $0x60] sm:$0xff] }
 0x198   :  { %v1243_v9 = vadd.f32 %v1242_v22, %v1241_v10  ;;  %v935_v4 = vadd.f32 %v934_v16, %v933_v50  ;;  %v852_v1 = vmul.f32 %v4569_v29, %v788_v55  ;;  %v1298_v53 = vrot.slane %v1297_v63, 4  ;;  %v4571_v34 = vld [vmem:[#allocation2 + $0x68] sm:$0xff] }
 0x199   :  { %v1188_v47 = vmul.f32 %v1126_v5, %v5853_v35  ;;  %v896_v58 = vadd.f32 %v895_v57, %v894_v32  ;;  %v725_v37 = vmul.f32 %v5567_v46, %v5439_v51  ;;  %v936_v15 = vsel %vm249_vm0, %v820_v20, 0.0  ;;  %v4572_v20 = vld [vmem:[#allocation2 + $0x168] sm:$0xff] }
 0x19a   :  { %v1244_v42 = vrot.slane %v1243_v9, 4  ;;  %v5859_v56 = vadd.f32 %v4570_v38, %v935_v4  ;;  %v937_v21 = vsel %vm249_vm0, %v852_v1, 0.0  ;;  %v1294_v30 = vadd.f32 %v1293_v14, %v5823_v62  ;;  %v4574_v1 = vld [vmem:[#allocation2 + $0x70] sm:$0xff] }
 0x19b   :  { %v1239_v2 = vrot.slane %v1238_v49, 1  ;;  %v775_v5 = vmul.f32 %v5567_v46, %v7299_v54  ;;  %v807_v32 = vmul.f32 %v4571_v34, %v725_v37  ;;  %v1273_v57 = vrot.slane %v1272_v23, 2  ;;  %v1064_v54 = vpop.permute.xlu1 %1063 }
 0x19c   :  { %v1189_v51 = vmul.f32 %v1130_v43, %v5859_v56  ;;  %v727_v50 = vmul.f32 %v5650_v8, %v5534_v48  ;;  %v776_v16 = vmul.f32 %v5650_v8, %v5540_v45  ;;  %v1299_v55 = vadd.f32 %v1298_v53, %v1297_v63  ;;  %v4575_v45 = vld [vmem:[#allocation2 + $0x170] sm:$0xff] }
 0x19d   :  { %v938_v17 = vadd.f32 %v937_v21, %v936_v15  ;;  %v839_v10 = vmul.f32 %v4572_v20, %v775_v5  ;;  %v897_v62 = vsel %vm249_vm0, %v807_v32, 0.0  ;;  %v1304_v14 = vsel %vm249_vm0, %v1188_v47, 0.0  ;;  %v1137_v47 = vpop.permute.xlu0 %1136  ;;  %v4576_v15 = vld [vmem:[#allocation5 + $0xd0] sm:$0xff] }
 0x19e   :  { %v1245_v46 = vadd.f32 %v1244_v42, %v1243_v9  ;;  %v5873_v22 = vadd.f32 %v4573_v33, %v896_v58  ;;  %v1305_v4 = vsel %vm249_vm0, %v1189_v51, 0.0  ;;  %v808_v43 = vmul.f32 %v4574_v1, %v727_v50  ;;  %v4579_v50 = vld [vmem:[#allocation2 + $0x1d8] sm:$0xff] }
 0x19f   :  { %v1306_v29 = vadd.f32 %v1305_v4, %v1304_v14  ;;  %v898_v48 = vsel %vm249_vm0, %v839_v10, 0.0  ;;  %v840_v8 = vmul.f32 %v4575_v45, %v776_v16  ;;  %v5881_v63 = vsel %vm1652_vm6, %v1651_v28, %v5821_v7  ;;  %v7300_v7 = vld [vmem:[#allocation56_spill] sm:$0xff]  ;;  %v7301_v28 = vld [vmem:[#allocation46_spill] sm:$0xff] }
 0x1a0   :  { %v5884_v9 = vmul.f32 %v5661_v41, %v1294_v30  ;;  %v1240_v53 = vadd.f32 %v1239_v2, %v1238_v49  ;;  %v899_v58 = vadd.f32 %v898_v48, %v897_v62  ;;  %v5886_v37 = vadd.f32 %v1273_v57, %v1272_v23  ;;  %v4578_v57 = vld [vmem:[#allocation2 + $0xd8] sm:$0xff]  ;;  %v7303_v14 = vld [vmem:[#allocation54_spill] sm:$0xff] }
 0x1a1   :  { %v1300_v42 = vrot.slane %v1299_v55, 2  ;;  %v1176_v38 = vmul.f32 %v1060_v44, %v5873_v22  ;;  %v5889_v21 = vadd.f32 %v4576_v15, %v938_v17  ;;  %v1246_v5 = vrot.slane %v1245_v46, 2  ;;  %v7302_v17 = vld [vmem:[#allocation25_spill] sm:$0xff]  ;;  %v1141_v15 = vpop.permute.xlu1 %1140 }
 0x1a2   :  { %v5891_v34 = vadd.f32 %v4577_v59, %v899_v58  ;;  %v753_v41 = vmul.f32 %v7300_v7, %v5486_v26  ;;  %v789_v49 = vmul.f32 %v7300_v7, %v7301_v28  ;;  %v1307_v30 = vrot.slane %v1306_v29, 4  ;;  %v7304_v59 = vld [vmem:[#allocation48_spill] sm:$0xff]  ;;  %v1071_v28 = vpop.permute.xlu0 %1070 }
 0x1a3   :  { %v1190_v23 = vmul.f32 %v1137_v47, %v5889_v21  ;;  %v900_v2 = vsel %vm249_vm0, %v808_v43, 0.0  ;;  %v901_v44 = vsel %vm249_vm0, %v840_v8, 0.0  ;;  %v755_v20 = vmul.f32 %v5694_v40, %v7302_v17 }
 0x1a4   :  { %v1177_v32 = vmul.f32 %v1064_v54, %v5891_v34  ;;  %v821_v51 = vmul.f32 %v4578_v57, %v753_v41  ;;  %v853_v16 = vmul.f32 %v4579_v50, %v789_v49  ;;  %v5904_v26 = vmul.f32 %v5760_v11, %v1240_v53  ;;  %v4581_v49 = vld [vmem:[#allocation5 + $0xd8] sm:$0xff] }
 0x1a5   :  { %v1275_v10 = vrot.slane %v5886_v37, 1  ;;  %v1250_v62 = vsel %vm249_vm0, %v1176_v38, 0.0  ;;  %v790_v33 = vmul.f32 %v5694_v40, %v7303_v14  ;;  %v902_v48 = vadd.f32 %v901_v44, %v900_v2  ;;  %v4580_v38 = vld [vmem:[#allocation2 + $0xe0] sm:$0xff]  ;;  %v4585_v14 = vld [vmem:[#allocation2 + $0x178] sm:$0xff] }
 0x1a6   :  { %v1251_v4 = vsel %vm249_vm0, %v1177_v32, 0.0  ;;  %v939_v1 = vsel %vm249_vm0, %v821_v51, 0.0  ;;  %v940_v43 = vsel %vm249_vm0, %v853_v16, 0.0  ;;  %v1247_v45 = vadd.f32 %v1246_v5, %v1245_v46  ;;  %v7305_v40 = vld [vmem:[#allocation30_spill] sm:$0xff] }
 0x1a7   :  { %v1308_v8 = vadd.f32 %v1307_v30, %v1306_v29  ;;  %v1252_v47 = vadd.f32 %v1251_v4, %v1250_v62  ;;  %v941_v58 = vadd.f32 %v940_v43, %v939_v1  ;;  %v5913_v11 = vadd.f32 %v1300_v42, %v1299_v55  ;;  %v4582_v44 = vld [vmem:[#allocation2 + $0x1e0] sm:$0xff]  ;;  %v7306_v29 = vld [vmem:[#allocation49_spill] sm:$0xff]  ;;  %v4583_v55 = vld [vmem:[#allocation5 + $0x70] sm:$0xff] }
 0x1a8   :  { %v1313_v53 = vsel %vm249_vm0, %v1190_v23, 0.0  ;;  %v822_v54 = vmul.f32 %v4580_v38, %v755_v20  ;;  %v729_v7 = vmul.f32 %v7305_v40, %v7304_v59  ;;  %v854_v46 = vmul.f32 %v4582_v44, %v790_v33  ;;  %v4584_v30 = vld [vmem:[#allocation2 + $0x78] sm:$0xff]  ;;  %v4586_v43 = vld [vmem:[#allocation2 + $0xf0] sm:$0xff]  ;;  %v7307_v44 = vld [vmem:[#allocation51_spill] sm:$0xff] }
 0x1a9   :  { %v1253_v41 = vrot.slane %v1252_v47, 4  ;;  %v5918_v2 = vadd.f32 %v4581_v49, %v941_v58  ;;  %v777_v5 = vmul.f32 %v7305_v40, %v7306_v29  ;;  %v5922_v42 = vadd.f32 %v4583_v55, %v902_v48  ;;  %v4587_v38 = vld [vmem:[#allocation2 + $0x1f0] sm:$0xff]  ;;  %v7308_v29 = vld [vmem:[#allocation59_spill] sm:$0xff] }
 0x1aa   :  { %v809_v23 = vmul.f32 %v4584_v30, %v729_v7  ;;  %v759_v32 = vmul.f32 %v5734_v36, %v5616_v31  ;;  %v792_v57 = vmul.f32 %v5734_v36, %v5622_v39  ;;  %v1248_v51 = vrot.slane %v1247_v45, 1 }
 0x1ab   :  { %v1309_v50 = vrot.slane %v1308_v8, 2  ;;  %v1254_v16 = vadd.f32 %v1253_v41, %v1252_v47  ;;  %v1191_v17 = vmul.f32 %v1141_v15, %v5918_v2  ;;  %v1178_v20 = vmul.f32 %v1071_v28, %v5922_v42  ;;  %v1075_v15 = vpop.permute.xlu1 %1074 }
 0x1ac   :  { %v942_v62 = vsel %vm249_vm0, %v822_v54, 0.0  ;;  %v841_v33 = vmul.f32 %v4585_v14, %v777_v5  ;;  %v903_v4 = vsel %vm249_vm0, %v809_v23, 0.0  ;;  %v943_v31 = vsel %vm249_vm0, %v854_v46, 0.0  ;;  %v7309_v5 = vld [vmem:[#allocation52_spill] sm:$0xff] }
 0x1ad   :  { %v1255_v48 = vrot.slane %v1254_v16, 2  ;;  %v1314_v1 = vsel %vm249_vm0, %v1191_v17, 0.0  ;;  %v824_v39 = vmul.f32 %v4586_v43, %v759_v32  ;;  %v1276_v36 = vadd.f32 %v1275_v10, %v5886_v37  ;;  %v4590_v17 = vld [vmem:[#allocation2 + $0x1e8] sm:$0xff] }
 0x1ae   :  { %v1315_v47 = vadd.f32 %v1314_v1, %v1313_v53  ;;  %v904_v58 = vsel %vm249_vm0, %v841_v33, 0.0  ;;  %v856_v59 = vmul.f32 %v4587_v38, %v792_v57  ;;  %v1302_v54 = vrot.slane %v5913_v11, 1  ;;  %v4588_v53 = vld [vmem:[#allocation5 + $0x78] sm:$0xff] }
 0x1af   :  { %v1249_v40 = vadd.f32 %v1248_v51, %v1247_v45  ;;  %v1256_v7 = vadd.f32 %v1255_v48, %v1254_v16  ;;  %v905_v41 = vadd.f32 %v904_v58, %v903_v4  ;;  %v944_v49 = vadd.f32 %v943_v31, %v942_v62  ;;  %v1148_v45 = vpop.permute.xlu0 %1147  ;;  %v4589_v51 = vld [vmem:[#allocation2 + $0xe8] sm:$0xff]  ;;  %v7310_v4 = vld [vmem:[#allocation26_spill] sm:$0xff]  ;;  %v1152_v58 = vpop.permute.xlu1 %1151 }
 0x1b0   :  { %v1316_v28 = vrot.slane %v1315_v47, 4  ;;  %v757_v46 = vmul.f32 %v7308_v29, %v7307_v44  ;;  %v791_v55 = vmul.f32 %v7308_v29, %v7309_v5  ;;  %v1310_v37 = vadd.f32 %v1309_v50, %v1308_v8  ;;  %v7311_v8 = vld [vmem:[#allocation62_spill] sm:$0xff]  ;;  %v4593_v5 = vld [vmem:[#allocation2 + $0x1f8] sm:$0xff] }
 0x1b1   :  { %v1259_v10 = vsel %vm249_vm0, %v1178_v20, 0.0  ;;  %v5942_v30 = vadd.f32 %v4588_v53, %v905_v41  ;;  %v948_v23 = vsel %vm249_vm0, %v824_v39, 0.0  ;;  %v949_v57 = vsel %vm249_vm0, %v856_v59, 0.0  ;;  %v7312_v20 = vld [vmem:[#allocation55_spill] sm:$0xff]  ;;  %v4591_v31 = vld [vmem:[#allocation5 + $0xe0] sm:$0xff]  ;;  %v7313_v53 = vld [vmem:[#allocation57_spill] sm:$0xff] }
 0x1b2   :  { %v1317_v32 = vadd.f32 %v1316_v28, %v1315_v47  ;;  %v823_v16 = vmul.f32 %v4589_v51, %v757_v46  ;;  %v855_v62 = vmul.f32 %v4590_v17, %v791_v55  ;;  %v1257_v14 = vrot.slane %v1256_v7, 1  ;;  %v4594_v17 = vld [vmem:[#allocation5 + $0xe8] sm:$0xff] }
 0x1b3   :  { %v1179_v33 = vmul.f32 %v1075_v15, %v5942_v30  ;;  %v761_v50 = vmul.f32 %v7311_v8, %v7310_v4  ;;  %v793_v48 = vmul.f32 %v7311_v8, %v7312_v20  ;;  %v5951_v43 = vadd.f32 %v4591_v31, %v944_v49  ;;  %v4592_v15 = vld [vmem:[#allocation2 + $0xf8] sm:$0xff]  ;;  %v1159_v4 = vpop.permute.xlu0 %1158 }
 0x1b4   :  { %v1318_v1 = vrot.slane %v1317_v32, 2  ;;  %v945_v39 = vsel %vm249_vm0, %v823_v16, 0.0  ;;  %v946_v47 = vsel %vm249_vm0, %v855_v62, 0.0  ;;  %v950_v59 = vadd.f32 %v949_v57, %v948_v23 }
 0x1b5   :  { %v1260_v38 = vsel %vm249_vm0, %v1179_v33, 0.0  ;;  %v947_v41 = vadd.f32 %v946_v47, %v945_v39  ;;  %v825_v28 = vmul.f32 %v4592_v15, %v761_v50  ;;  %v1311_v44 = vrot.slane %v1310_v37, 1 }
 0x1b6   :  { %v1192_v29 = vmul.f32 %v1148_v45, %v5951_v43  ;;  %v1261_v46 = vadd.f32 %v1260_v38, %v1259_v10  ;;  %v857_v55 = vmul.f32 %v4593_v5, %v793_v48  ;;  %v1396_v49 = vmul.f32 %v7313_v53, %v1276_v36  ;;  %v4595_v10 = vld [vmem:[#allocation5 + $0xf0] sm:$0xff] }
 0x1b7   :  { %v1258_v51 = vadd.f32 %v1257_v14, %v1256_v7  ;;  %v5958_v16 = vadd.f32 %v4594_v17, %v947_v41  ;;  %v951_v62 = vsel %vm249_vm0, %v825_v28, 0.0  ;;  %v1303_v33 = vadd.f32 %v1302_v54, %v5913_v11  ;;  %v1163_v54 = vpop.permute.xlu1 %1162  ;;  %v1627_v5 = vld [vmem:[#allocation10 + $0x10] sm:$0xff] }
 0x1b8   :  { %v1319_v23 = vadd.f32 %v1318_v1, %v1317_v32  ;;  %v1262_v57 = vrot.slane %v1261_v46, 4  ;;  %v952_v8 = vsel %vm249_vm0, %v857_v55, 0.0  ;;  %v5964_v45 = vmul.f32 %v5770_v27, %v1249_v40  ;;  %v1628_v32 = vld [vmem:[#allocation10 + $0x18] sm:$0xff] }
 0x1b9   :  { %v5966_v50 = vadd.f32 %v4595_v10, %v950_v59  ;;  %v1193_v36 = vmul.f32 %v1152_v58, %v5958_v16  ;;  %v953_v7 = vadd.f32 %v952_v8, %v951_v62  ;;  %v1654_v14 = vrot.slane %v5904_v26, 4  ;;  %v4596_v40 = vld [vmem:[#allocation5 + $0xf8] sm:$0xff]  ;;  %v1625_v8 = vld [vmem:[#allocation10] sm:$0xff] }
 0x1ba   :  { %v1312_v20 = vadd.f32 %v1311_v44, %v1310_v37  ;;  %v1322_v48 = vsel %vm249_vm0, %v1192_v29, 0.0  ;;  %v1263_v11 = vadd.f32 %v1262_v57, %v1261_v46  ;;  %v1392_v1 = vmul.f32 %v5774_v25, %v1258_v51  ;;  %v7315_v59 = vld [vmem:[#allocation29_spill] sm:$0xff] }
 0x1bb   :  { %v1194_v31 = vmul.f32 %v1159_v4, %v5966_v50  ;;  %v1323_v27 = vsel %vm249_vm0, %v1193_v36, 0.0  ;;  %v5974_v39 = vadd.f32 %v4596_v40, %v953_v7  ;;  %v7314_v47 = vrot.slane %v5719_v52, 7  ;;  %v7316_v44 = vld [vmem:[#allocation33_spill] sm:$0xff]  ;;  %v1626_v4 = vld [vmem:[#allocation10 + $0x8] sm:$0xff] }
 0x1bc   :  { %v1320_v26 = vrot.slane %v1319_v23, 1  ;;  %v1264_v37 = vrot.slane %v1263_v11, 2  ;;  %v1324_v38 = vadd.f32 %v1323_v27, %v1322_v48  ;;  %v5982_v41 = vmul.f32 %v7315_v59, %v1303_v33 }
 0x1bd   :  { %v5979_v58 = vsel %vm1646_vm4, %v7314_v47, %v1396_v49  ;;  %v1657_v25 = vrot.slane %v5964_v45, 3  ;;  %v1195_v15 = vmul.f32 %v1163_v54, %v5974_v39  ;;  %v5986_v28 = vand.u32 4294901760, %v1628_v32 }
 0x1be   :  { %v5989_v29 = vmul.f32 %v7316_v44, %v1312_v20  ;;  %v1265_v46 = vadd.f32 %v1264_v37, %v1263_v11  ;;  %v1325_v52 = vrot.slane %v1324_v38, 4  ;;  %v1660_v55 = vrot.slane %v1392_v1, 2 }
 0x1bf   :  { %v1331_v53 = vsel %vm249_vm0, %v1194_v31, 0.0  ;;  %v1332_v49 = vsel %vm249_vm0, %v1195_v15, 0.0  ;;  %v5994_v51 = vsub.f32 %v1628_v32, %v5986_v28  ;;  %4102 = vmatprep.subr.mxu0 %v5986_v28  ;;  %v1321_v17 = vadd.f32 %v1320_v26, %v1319_v23 }
 0x1c0   :  { %v1266_v62 = vrot.slane %v1265_v46, 1  ;;  %v1326_v33 = vadd.f32 %v1325_v52, %v1324_v38  ;;  %v1333_v57 = vadd.f32 %v1332_v49, %v1331_v53  ;;  %4103 = vmatpush3.msra.mxu0 %v5986_v28  ;;  %v1656_v10 = vsel %vm1655_vm7, %v1654_v14, %v5881_v63  ;;  %v7317_v52 = vld [vmem:[#allocation60_spill] sm:$0xff] }
 0x1c1   :  { %v5999_v45 = vand.u32 4294901760, %v5994_v51  ;;  %v6003_v36 = vand.u32 4294901760, %v1627_v5  ;;  %v6010_v54 = vand.u32 4294901760, %v1626_v4  ;;  %v6012_v32 = vand.u32 4294901760, %v1625_v8 }
 0x1c2   :  { %v1267_v7 = vadd.f32 %v1266_v62, %v1265_v46  ;;  %v1327_v20 = vrot.slane %v1326_v33, 2  ;;  %v1334_v48 = vrot.slane %v1333_v57, 4  ;;  %v1659_v38 = vsel %vm1658_vm8, %v1657_v25, %v1656_v10 }
 0x1c3   :  { %v1801_v23 = vsub.f32 %v5994_v51, %v5999_v45  ;;  %v6008_v11 = vsub.f32 %v1627_v5, %v6003_v36  ;;  %4104 = vmatprep.subr.mxu0 %v6003_v36  ;;  %v6021_v40 = vsub.f32 %v1626_v4, %v6010_v54  ;;  %v6024_v47 = vsub.f32 %v1625_v8, %v6012_v32  ;;  %v7319_v4 = vld [vmem:[#allocation61_spill] sm:$0xff] }
 0x1c4   :  { %v1394_v63 = vmul.f32 %v5786_v0, %v1267_v7  ;;  %v1328_v14 = vadd.f32 %v1327_v20, %v1326_v33  ;;  %v1335_v1 = vadd.f32 %v1334_v48, %v1333_v57  ;;  %4105 = vmatpush3.msra.mxu0 %v6003_v36  ;;  %v1662_v59 = vsel %vm1661_vm9, %v1660_v55, %v1659_v38  ;;  %v2520_v38 = vld [vmem:[#allocation8] sm:$0xff] }
 0x1c5   :  { %v1802_v31 = vand.u32 4294901760, %v1801_v23  ;;  %v6018_v27 = vand.u32 4294901760, %v6008_v11  ;;  %4106 = vmatprep.subr.mxu0 %v6010_v54  ;;  %v6033_v44 = vand.u32 4294901760, %v6021_v40  ;;  %v6036_v46 = vand.u32 4294901760, %v6024_v47 }
 0x1c6   :  { %v1663_v26 = vrot.slane %v1394_v63, 1  ;;  %v1329_v37 = vrot.slane %v1328_v14, 1  ;;  %v1336_v0 = vrot.slane %v1335_v1, 2  ;;  %4107 = vmatpush3.msra.mxu0 %v6010_v54  ;;  %v1406_v5 = vmul.f32 %v7317_v52, %v1321_v17 }
 0x1c7   :  { %4113 = vmatprep.subr.mxu1 %v1802_v31  ;;  %v1808_v15 = vsub.f32 %v6008_v11, %v6018_v27  ;;  %4108 = vmatprep.subr.mxu0 %v6012_v32  ;;  %v1815_v33 = vsub.f32 %v6021_v40, %v6033_v44  ;;  %v1822_v57 = vsub.f32 %v6024_v47, %v6036_v46  ;;  %v1670_v17 = vrot.slane %v5982_v41, 5 }
 0x1c8   :  { %v1330_v53 = vadd.f32 %v1329_v37, %v1328_v14  ;;  %v1337_v25 = vadd.f32 %v1336_v0, %v1335_v1  ;;  %4114 = vmatpush3.msra.mxu1 %v1802_v31  ;;  %v6041_v49 = vsel %vm1664_vm10, %v1663_v26, %v1662_v59  ;;  %4109 = vmatpush3.msra.mxu0 %v6012_v32  ;;  %v1668_v20 = vrot.slane %v5884_v9, 6  ;;  %v7320_v9 = vld [vmem:[#allocation31_spill] sm:$0xff] }
 0x1c9   :  { %7318 = vst [vmem:[#allocation34_spill] sm:$0xff] %v6041_v49  ;;  %v1680_v55 = vsel %vm249_vm0, %v6041_v49, 0  ;;  %v1809_v62 = vand.u32 4294901760, %v1808_v15  ;;  %4124 = vmatprep.subr.mxu0 %v5994_v51  ;;  %v1672_v48 = vrot.slane %v5989_v29, 4  ;;  %v1816_v23 = vand.u32 4294901760, %v1815_v33  ;;  %v7322_v33 = vld [vmem:[#allocation19_spill] sm:$0xff] }
 0x1ca   :  { %v1408_v8 = vmul.f32 %v7319_v4, %v1330_v53  ;;  %v1338_v10 = vrot.slane %v1337_v25, 1  ;;  %v6052_v7 = vand.u32 4294901760, %v1680_v55  ;;  %v1823_v63 = vand.u32 4294901760, %v1822_v57  ;;  %v7323_v4 = vld [vmem:[#allocation17_spill] sm:$0xff] }
 0x1cb   :  { %4115 = vmatprep.subr.mxu1 %v1809_v62  ;;  %v1674_v14 = vrot.slane %v1406_v5, 3  ;;  %v1669_v31 = vsel %vm1649_vm5, %v1668_v20, %v5979_v58  ;;  %v6067_v53 = vmul.f32 -1e+10, %v2520_v38  ;;  %v1427_v38 = vpop.permute.xlu1 %1426 }
 0x1cc   :  { %v1339_v1 = vadd.f32 %v1338_v10, %v1337_v25  ;;  %4121 = vmatprep.mubr.f32.mxu1 %v6052_v7  ;;  %4116 = vmatpush3.msra.mxu1 %v1809_v62  ;;  %v1754_v41 = vsub.f32 %v1680_v55, %v6052_v7  ;;  %v1676_v26 = vrot.slane %v1408_v8, 2  ;;  %v1671_v37 = vsel %vm1652_vm6, %v1670_v17, %v1669_v31 }
 0x1cd   :  { %4117 = vmatprep.subr.mxu1 %v1816_v23  ;;  %v1673_v59 = vsel %vm1655_vm7, %v1672_v48, %v1671_v37  ;;  %v2529_v57 = vrot.slane %v6067_v53, %v7322_v33  ;;  %v2540_v8 = vrot.slane %v6067_v53, %v7323_v4  ;;  %v7324_v48 = vld [vmem:[#allocation18_spill] sm:$0xff] }
 0x1ce   :  { %v1410_v0 = vmul.f32 %v7320_v9, %v1339_v1  ;;  %4118 = vmatpush3.msra.mxu1 %v1816_v23  ;;  %v1755_v29 = vand.u32 4294901760, %v1754_v41  ;;  %v1675_v5 = vsel %vm1658_vm8, %v1674_v14, %v1673_v59  ;;  %v2551_v23 = vrot.slane %v6067_v53, %v7324_v48 }
 0x1cf   :  { %4119 = vmatprep.subr.mxu1 %v1823_v63  ;;  %v1677_v58 = vsel %vm1661_vm9, %v1676_v26, %v1675_v5  ;;  %2535 = vbcast.lane.b32.xlu1 %v2529_v57, 264 }
 0x1d0   :  { %v1678_v15 = vrot.slane %v1410_v0, 1  ;;  %4120 = vmatpush3.msra.mxu1 %v1823_v63  ;;  %v1756_v52 = vsub.f32 %v1754_v41, %v1755_v29  ;;  %2531 = vbcast.lane.b32.xlu0 %v2529_v57, 256 }
 0x1d1   :  { %4135 = vmatprep.subr.mxu1 %v5986_v28 }
 0x1d2   :  { %v1757_v25 = vand.u32 4294901760, %v1756_v52  ;;  %v6070_v55 = vsel %vm1664_vm10, %v1678_v15, %v1677_v58  ;;  %v6132_v15 = vpop.permute.xlu1 %1437 }
 0x1d3   :  { %7321 = vst [vmem:[#allocation36_spill] sm:$0xff] %v6070_v55  ;;  %v1682_v62 = vsel %vm249_vm0, %v6070_v55, 0  ;;  %2542 = vbcast.lane.b32.xlu1 %v2540_v8, 256 }
 0x1d4   :  { %4110 = vmatprep.mubr.f32.mxu0 %v1757_v25  ;;  %v1763_v17 = vand.u32 4294901760, %v1682_v62  ;;  %2553 = vbcast.lane.b32.xlu0 %v2551_v23, 256 }
 0x1d6   :  { %v1764_v10 = vsub.f32 %v1682_v62, %v1763_v17  ;;  %4122 = vmatmul.mubr.f32.vlgmr.msra.gmra.mxu1 %v1763_v17  ;;  %v6136_v5 = vpop.permute.xlu1 %1448 }
 0x1d7   :  { %4136 = vmatpush3.msra.mxu1 %v5986_v28  ;;  %4143 = vmatprep.mubr.f32.mxu1 %v1755_v29  ;;  %v1423_v29 = vpop.permute.xlu0 %1422 }
 0x1d8   :  { %4137 = vmatprep.subr.mxu1 %v6003_v36  ;;  %v1765_v20 = vand.u32 4294901760, %v1764_v10  ;;  %2546 = vbcast.lane.b32.xlu1 %v2540_v8, 264 }
 0x1d9   :  { %4138 = vmatpush3.msra.mxu1 %v6003_v36 }
 0x1da   :  { %4139 = vmatprep.subr.mxu1 %v6010_v54  ;;  %v1766_v63 = vsub.f32 %v1764_v10, %v1765_v20 }
 0x1db   :  { %4140 = vmatpush3.msra.mxu1 %v6010_v54  ;;  %v6130_v59 = vpop.permute.xlu0 %1433 }
 0x1dc   :  { %4141 = vmatprep.subr.mxu1 %v6012_v32  ;;  %v1767_v14 = vand.u32 4294901760, %v1766_v63  ;;  %2557 = vbcast.lane.b32.xlu1 %v2551_v23, 264 }
 0x1dd   :  { %4142 = vmatpush3.msra.mxu1 %v6012_v32 }
 0x1de   :  { %4144 = vmatmul.mubr.f32.vlgmr.msra.gmra.mxu1 %v1765_v20  ;;  %4157 = vmatprep.subr.mxu1 %v5986_v28 }
 0x1df   :  { %4111 = vmatmul.mubr.f32.vlgmr.msra.gmra.mxu0 %v1767_v14  ;;  %4158 = vmatpush3.msra.mxu1 %v5986_v28  ;;  %v7325_v28 = vld [vmem:[#allocation20_spill] sm:$0xff]  ;;  %v6134_v52 = vpop.permute.xlu0 %1444 }
 0x1e0   :  { %4125 = vmatpush3.msra.mxu0 %v5994_v51  ;;  %4165 = vmatprep.mubr.f32.mxu1 %v6052_v7  ;;  %v2562_v51 = vrot.slane %v6067_v53, %v7325_v28 }
 0x1e1   :  { %4126 = vmatprep.subr.mxu0 %v6008_v11  ;;  %4132 = vmatprep.mubr.f32.mxu0 %v1754_v41 }
 0x1e2   :  { %4159 = vmatprep.subr.mxu1 %v6003_v36  ;;  %4127 = vmatpush3.msra.mxu0 %v6008_v11 }
 0x1e3   :  { %4160 = vmatpush3.msra.mxu1 %v6003_v36  ;;  %4128 = vmatprep.subr.mxu0 %v6021_v40  ;;  %v7326_v36 = vld [vmem:[#allocation21_spill] sm:$0xff]  ;;  %v6138_v58 = vpop.permute.xlu0 %1455 }
 0x1e4   :  { %4161 = vmatprep.subr.mxu1 %v6010_v54  ;;  %4129 = vmatpush3.msra.mxu0 %v6021_v40  ;;  %v2573_v11 = vrot.slane %v6067_v53, %v7326_v36  ;;  %v2521_v40 = vld [vmem:[#allocation8 + $0x8] sm:$0xff] }
 0x1e5   :  { %4162 = vmatpush3.msra.mxu1 %v6010_v54  ;;  %4130 = vmatprep.subr.mxu0 %v6024_v47 }
 0x1e6   :  { %4163 = vmatprep.subr.mxu1 %v6012_v32  ;;  %4131 = vmatpush3.msra.mxu0 %v6024_v47  ;;  %v7329_v47 = vld [vmem:[#allocation24_spill] sm:$0xff] }
 0x1e7   :  { %4164 = vmatpush3.msra.mxu1 %v6012_v32  ;;  %4133 = vmatmul.mubr.f32.vlgmr.msra.gmra.mxu0 %v1764_v10  ;;  %v7328_v32 = vld [vmem:[#allocation23_spill] sm:$0xff]  ;;  %v6142_v25 = vpop.permute.xlu0 %1466 }
 0x1e8   :  { %4146 = vmatprep.subr.mxu0 %v5999_v45  ;;  %4166 = vmatmul.mubr.f32.vlgmr.msra.gmra.mxu1 %v1763_v17 }
 0x1e9   :  { %4147 = vmatpush3.msra.mxu0 %v5999_v45  ;;  %4154 = vmatprep.mubr.f32.mxu0 %v6052_v7  ;;  %v7327_v45 = vld [vmem:[#allocation22_spill] sm:$0xff]  ;;  %v2523_v7 = vmul.f32 -1e+10, %v2521_v40  ;;  %v4733_v40 = vmov 1966171168  }
 0x1ea   :  { %4148 = vmatprep.subr.mxu0 %v6018_v27  ;;  %2564 = vbcast.lane.b32.xlu0 %v2562_v51, 256  ;;  %v2584_v54 = vrot.slane %v6067_v53, %v7327_v45 }
 0x1eb   :  { %4149 = vmatpush3.msra.mxu0 %v6018_v27  ;;  %2568 = vbcast.lane.b32.xlu1 %v2562_v51, 264  ;;  %v2595_v27 = vrot.slane %v6067_v53, %v7328_v32  ;;  %v2628_v1 = vrot.slane %v2523_v7, %v7323_v4  ;;  %v2639_v41 = vrot.slane %v2523_v7, %v7324_v48  ;;  %v6146_v57 = vpop.permute.xlu0 %1477 }
 0x1ec   :  { %4150 = vmatprep.subr.mxu0 %v6033_v44  ;;  %v2650_v31 = vrot.slane %v2523_v7, %v7325_v28  ;;  %v2661_v26 = vrot.slane %v2523_v7, %v7326_v36  ;;  %v2672_v37 = vrot.slane %v2523_v7, %v7327_v45  ;;  %v2683_v9 = vrot.slane %v2523_v7, %v7328_v32  ;;  %v7331_v28 = vld [vmem:[#allocation16_spill] sm:$0xff] }
 0x1ed   :  { %4151 = vmatpush3.msra.mxu0 %v6033_v44  ;;  %v2606_v44 = vrot.slane %v6067_v53, %v7329_v47  ;;  %v2694_v0 = vrot.slane %v2523_v7, %v7329_v47  ;;  %v6140_v53 = vpop.permute.xlu1 %1459 }
 0x1ee   :  { %4152 = vmatprep.subr.mxu0 %v6036_v46  ;;  %2575 = vbcast.lane.b32.xlu0 %v2573_v11, 256 }
 0x1ef   :  { %4153 = vmatpush3.msra.mxu0 %v6036_v46  ;;  %2579 = vbcast.lane.b32.xlu1 %v2573_v11, 264  ;;  %v2617_v46 = vrot.slane %v2523_v7, %v7322_v33  ;;  %v6150_v8 = vpop.permute.xlu0 %1488 }
 0x1f0   :  { %4155 = vmatmul.mubr.f32.vlgmr.msra.gmra.mxu0 %v1763_v17 }
 0x1f1   :  { %v6144_v62 = vpop.permute.xlu1 %1470 }
 0x1f2   :  { %2586 = vbcast.lane.b32.xlu0 %v2584_v54, 256 }
 0x1f3   :  { %2590 = vbcast.lane.b32.xlu1 %v2584_v54, 264  ;;  %v6154_v23 = vpop.permute.xlu0 %1499 }
 0x1f4   :  { %7330 = vst [vmem:[#allocation43_spill] sm:$0xff] %v6154_v23 }
 0x1f5   :  { %v6148_v17 = vpop.permute.xlu1 %1481 }
 0x1f6   :  { %2597 = vbcast.lane.b32.xlu0 %v2595_v27, 256 }
 0x1f7   :  { %2601 = vbcast.lane.b32.xlu1 %v2595_v27, 264 }
 0x1f9   :  { %v6152_v10 = vpop.permute.xlu1 %1492 }
 0x1fa   :  { %2608 = vbcast.lane.b32.xlu0 %v2606_v44, 256 }
 0x1fb   :  { %2612 = vbcast.lane.b32.xlu1 %v2606_v44, 264  ;;  %v2216_v44 = vunpack.c.l.s4 %v4733_v40 }
 0x1fd   :  { %v6156_v14 = vpop.permute.xlu1 %1503 }
 0x1fe   :  { %2619 = vbcast.lane.b32.xlu0 %v2617_v46, 256 }
 0x1ff   :  { %2623 = vbcast.lane.b32.xlu1 %v2617_v46, 264 }
 0x202   :  { %2630 = vbcast.lane.b32.xlu0 %v2628_v1, 256 }
 0x203   :  { %2634 = vbcast.lane.b32.xlu1 %v2628_v1, 264  ;;  %v1511_v1 = vpop.permute.xlu0 %1510 }
 0x206   :  { %2641 = vbcast.lane.b32.xlu0 %v2639_v41, 256 }
 0x207   :  { %2645 = vbcast.lane.b32.xlu1 %v2639_v41, 264  ;;  %v1515_v41 = vpop.permute.xlu1 %1514  ;;  %v1522_v32 = vpop.permute.xlu0 %1521 }
 0x20a   :  { %2652 = vbcast.lane.b32.xlu0 %v2650_v31, 256 }
 0x20b   :  { %2656 = vbcast.lane.b32.xlu1 %v2650_v31, 264  ;;  %v1526_v45 = vpop.permute.xlu1 %1525 }
 0x20e   :  { %2663 = vbcast.lane.b32.xlu0 %v2661_v26, 256 }
 0x20f   :  { %2667 = vbcast.lane.b32.xlu1 %v2661_v26, 264 }
 0x212   :  { %2674 = vbcast.lane.b32.xlu0 %v2672_v37, 256 }
 0x213   :  { %2678 = vbcast.lane.b32.xlu1 %v2672_v37, 264 }
 0x216   :  { %2685 = vbcast.lane.b32.xlu0 %v2683_v9, 256 }
 0x217   :  { %2689 = vbcast.lane.b32.xlu1 %v2683_v9, 264  ;;  %v2217_v9 = vunpack.c.0.s8 %v2216_v44 }
 0x219   :  { %v6159_v48 = vsub.s32 %v2217_v9, %v7331_v28 }
 0x21a   :  { %2696 = vbcast.lane.b32.xlu0 %v2694_v0, 256 }
 0x21b   :  { %2700 = vbcast.lane.b32.xlu1 %v2694_v0, 264 }
 0x296   :  { %v4123_v63 = vpop.f32.mrf.mxu1 }
 0x298   :  { %v1860_v54 = vpop.f32.mrf.mxu1 }
 0x29e   :  { %v4145_v7 = vpop.f32.mrf.mxu1 }
 0x29f   :  { %v4112_v20 = vpop.f32.mrf.mxu0 }
 0x2a0   :  { %v1867_v27 = vadd.f32 %v4123_v63, %v4112_v20  ;;  %v2030_v0 = vpop.f32.mrf.mxu1 }
 0x2a1   :  { %v1759_v51 = vpop.f32.mrf.mxu0 }
 0x2a2   :  { %v1861_v31 = vadd.f32 %v1860_v54, %v1759_v51  ;;  %v1533_v54 = vpop.permute.xlu0 %1532 }
 0x2a7   :  { %v4134_v11 = vpop.f32.mrf.mxu0 }
 0x2a8   :  { %v1954_v26 = vadd.f32 %v4134_v11, %v1867_v27  ;;  %v4167_v49 = vpop.f32.mrf.mxu1  ;;  %v1537_v27 = vpop.permute.xlu1 %1536 }
 0x2a9   :  { %v1946_v46 = vpop.f32.mrf.mxu0 }
 0x2aa   :  { %v1947_v37 = vadd.f32 %v1946_v46, %v1861_v31  ;;  %v2039_v55 = vadd.f32 %v4145_v7, %v1954_v26  ;;  %v2202_v23 = vpop.f32.mrf.mxu1 }
 0x2ac   :  { %v2031_v20 = vadd.f32 %v2030_v0, %v1947_v37  ;;  %v7336_v0 = vld [vmem:[#allocation27_spill] sm:$0xff] }
 0x2b0   :  { %v4156_v47 = vpop.f32.mrf.mxu0 }
 0x2b1   :  { %v2128_v36 = vadd.f32 %v4156_v47, %v2039_v55  ;;  %v6165_v55 = vmul.f32 %v1511_v1, %v5780_v24  ;;  %v6168_v47 = vmul.f32 %v1515_v41, %v5790_v13  ;;  %v6181_v24 = vmul.f32 %v1427_v38, %v7336_v0 }
 0x2b2   :  { %v2121_v63 = vpop.f32.mrf.mxu0 }
 0x2b3   :  { %v2209_v40 = vadd.f32 %v4167_v49, %v2128_v36  ;;  %v2122_v4 = vadd.f32 %v2121_v63, %v2031_v20  ;;  %7332 = vst [vmem:[#allocation38_spill] sm:$0xff] %v6165_v55  ;;  %7333 = vst [vmem:[#allocation39_spill] sm:$0xff] %v6168_v47  ;;  %v6187_v20 = vpop.permute.xlu0 %1543  ;;  %v6189_v63 = vpop.permute.xlu1 %1547 }
 0x2b4   :  { %7337 = vst [vmem:[#allocation42_spill] sm:$0xff] %v6181_v24 }
 0x2b5   :  { %v2270_v51 = vrot.slane %v2209_v40, %v6159_v48  ;;  %v2203_v11 = vadd.f32 %v2202_v23, %v2122_v4  ;;  %v2263_v46 = vcombine.high %v2209_v40, %v2209_v40  ;;  %v7334_v23 = vld [vmem:[#allocation53_spill] sm:$0xff] }
 0x2b6   :  { %v6176_v26 = vmul.f32 %v1423_v29, %v7334_v23 }
 0x2b7   :  { %v2278_v44 = vcombine.high %v2270_v51, %v2270_v51  ;;  %v2286_v7 = vrot.slane %v2270_v51, %v6159_v48  ;;  %v2221_v31 = vrot.slane %v2203_v11, %v6159_v48  ;;  %v6184_v13 = vrot.slane %v2263_v46, %v6159_v48  ;;  %v7338_v46 = vld [vmem:[#allocation45_spill] sm:$0xff] }
 0x2b8   :  { %7335 = vst [vmem:[#allocation41_spill] sm:$0xff] %v6176_v26  ;;  %v2214_v0 = vcombine.high %v2203_v11, %v2203_v11  ;;  %v1555_v11 = vpop.permute.xlu0 %1554 }
 0x2b9   :  { %v2347_v49 = vrot.slane %v2286_v7, %v7322_v33  ;;  %v6172_v36 = vrot.slane %v2278_v44, %v6159_v48  ;;  %v2237_v4 = vrot.slane %v2221_v31, %v6159_v48  ;;  %v2308_v41 = vcombine.high %v2286_v7, %v2286_v7  ;;  %v7340_v7 = vld [vmem:[#allocation50_spill] sm:$0xff] }
 0x2ba   :  { %v6201_v23 = vmul.f32 %v1526_v45, %v7340_v7  ;;  %v6216_v45 = vmul.f32 %v1533_v54, %v5710_v60  ;;  %v6231_v54 = vmul.f32 %v1555_v11, %v5853_v35  ;;  %v7348_v11 = vld [vmem:[#allocation47_spill] sm:$0xff] }
 0x2bb   :  { %v2409_v37 = vmul.f32 %v2347_v49, %v6168_v47  ;;  %v2408_v9 = vmul.f32 %v2347_v49, %v6165_v55  ;;  %v2315_v1 = vrot.slane %v2237_v4, %v7322_v33  ;;  %v2351_v51 = vrot.slane %v6172_v36, %v7322_v33 }
 0x2bc   :  { %v6198_v49 = vmul.f32 %v1522_v32, %v7338_v46  ;;  %7341 = vst [vmem:[#allocation56_spill] sm:$0xff] %v6201_v23  ;;  %v2229_v55 = vcombine.high %v2221_v31, %v2221_v31  ;;  %v6213_v46 = vmul.f32 %v1537_v27, %v5712_v6  ;;  %7343 = vst [vmem:[#allocation25_spill] sm:$0xff] %v6216_v45  ;;  %v1559_v31 = vpop.permute.xlu1 %1558 }
 0x2bd   :  { %v2475_v29 = vsel %vm249_vm0, %v2409_v37, 0.0  ;;  %v2472_v40 = vsel %vm249_vm0, %v2408_v9, 0.0  ;;  %v2393_v38 = vmul.f32 %v2315_v1, %v6181_v24  ;;  %v2392_v44 = vmul.f32 %v2315_v1, %v6176_v26  ;;  %7344 = vst [vmem:[#allocation54_spill] sm:$0xff] %v6231_v54 }
 0x2be   :  { %2476 = vadd.xlane.f32.xlu1 %v2475_v29  ;;  %2473 = vadd.xlane.f32.xlu0 %v2472_v40  ;;  %7339 = vst [vmem:[#allocation44_spill] sm:$0xff] %v6198_v49  ;;  %v2355_v37 = vrot.slane %v2308_v41, %v7322_v33  ;;  %v6206_v9 = vrot.slane %v6184_v13, %v6159_v48  ;;  %7342 = vst [vmem:[#allocation46_spill] sm:$0xff] %v6213_v46  ;;  %v7384_v26 = vlaneseq }
 0x2bf   :  { %v2427_v29 = vsel %vm249_vm0, %v2393_v38, 0.0  ;;  %v2424_v40 = vsel %vm249_vm0, %v2392_v44, 0.0  ;;  %v2411_v1 = vmul.f32 %v2351_v51, %v6201_v23  ;;  %v2410_v32 = vmul.f32 %v2351_v51, %v6198_v49 }
 0x2c0   :  { %v6219_v41 = vrot.slane %v2214_v0, %v6159_v48  ;;  %v2413_v38 = vmul.f32 %v2355_v37, %v6213_v46  ;;  %v2363_v44 = vrot.slane %v6206_v9, %v7322_v33  ;;  %v2259_v7 = vcombine.high %v2237_v4, %v2237_v4 }
 0x2c1   :  { %v2481_v51 = vsel %vm249_vm0, %v2411_v1, 0.0  ;;  %v2478_v6 = vsel %vm249_vm0, %v2410_v32, 0.0  ;;  %v2412_v27 = vmul.f32 %v2355_v37, %v6216_v45  ;;  %v6228_v60 = vrot.slane %v2229_v55, %v6159_v48 }
 0x2c2   :  { %2428 = vadd.xlane.f32.xlu1 %v2427_v29  ;;  %2425 = vadd.xlane.f32.xlu0 %v2424_v40  ;;  %v6234_v0 = vmul.f32 %v1559_v31, %v5859_v56  ;;  %v2487_v29 = vsel %vm249_vm0, %v2413_v38, 0.0  ;;  %v2416_v40 = vmul.f32 %v2363_v44, %v6231_v54  ;;  %v2323_v37 = vrot.slane %v2259_v7, %v7322_v33  ;;  %v7346_v56 = vld [vmem:[#allocation37_spill] sm:$0xff] }
 0x2c3   :  { %v2484_v1 = vsel %vm249_vm0, %v2412_v27, 0.0  ;;  %v2319_v55 = vrot.slane %v6228_v60, %v7322_v33  ;;  %v6245_v35 = vrot.slane %v6219_v41, %v6159_v48  ;;  %v6249_v32 = vmul.f32 %v6130_v59, %v7346_v56 }
 0x2c4   :  { %7345 = vst [vmem:[#allocation48_spill] sm:$0xff] %v6234_v0  ;;  %v2417_v4 = vmul.f32 %v2363_v44, %v6234_v0  ;;  %v6253_v31 = vmul.f32 %v6136_v5, %v7348_v11  ;;  %v2279_v38 = vcombine.high %v6184_v13, %v6184_v13  ;;  %v2496_v7 = vsel %vm249_vm0, %v2416_v40, 0.0  ;;  %v7350_v5 = vld [vmem:[#allocation35_spill] sm:$0xff] }
 0x2c5   :  { %7347 = vst [vmem:[#allocation30_spill] sm:$0xff] %v6249_v32  ;;  %v2394_v27 = vmul.f32 %v2319_v55, %v6249_v32  ;;  %v2331_v59 = vrot.slane %v6245_v35, %v7322_v33  ;;  %v6271_v13 = vmul.f32 %v6144_v62, %v5758_v61  ;;  %v1570_v62 = vpop.permute.xlu1 %1569  ;;  %v2895_v32 = vand.u32 127, %v7384_v26 }
 0x2c6   :  { %2482 = vadd.xlane.f32.xlu1 %v2481_v51  ;;  %2479 = vadd.xlane.f32.xlu0 %v2478_v6  ;;  %7349 = vst [vmem:[#allocation49_spill] sm:$0xff] %v6253_v31  ;;  %v2499_v44 = vsel %vm249_vm0, %v2417_v4, 0.0  ;;  %v2310_v51 = vcombine.high %v6172_v36, %v6172_v36  ;;  %v2397_v6 = vmul.f32 %v2323_v37, %v6253_v31  ;;  %v4734_v4 = vmov 0  }
 0x2c7   :  { %7352 = vst [vmem:[#allocation59_spill] sm:$0xff] %v6271_v13  ;;  %4181 = vset.pattern.permute.xlu0 %v4734_v4  ;;  %4180 = vset.pattern.permute.xlu1 %v4734_v4  ;;  %v6275_v40 = vrot.slane %v2279_v38, %v6159_v48  ;;  %v2430_v56 = vsel %vm249_vm0, %v2394_v27, 0.0  ;;  %v2401_v11 = vmul.f32 %v2331_v59, %v6271_v13  ;;  %v2900_v0 = vadd.s32 4294967288, %v2895_v32 }
 0x2c8   :  { %v2359_v36 = vrot.slane %v2310_v51, %v7322_v33  ;;  %v2230_v4 = vcombine.high %v6219_v41, %v6219_v41  ;;  %v6580_v45 = vsub.s32 %v2895_v32, %v7331_v28 }
 0x2c9   :  { %v2367_v51 = vrot.slane %v6275_v40, %v7322_v33  ;;  %v6583_v46 = vsub.s32 %v2900_v0, %v7331_v28 }
 0x2ca   :  { %2488 = vadd.xlane.f32.xlu1 %v2487_v29  ;;  %2485 = vadd.xlane.f32.xlu0 %v2484_v1  ;;  %v6267_v29 = vmul.f32 %v6132_v15, %v7350_v5  ;;  %v2439_v1 = vsel %vm249_vm0, %v2397_v6, 0.0  ;;  %v2451_v6 = vsel %vm249_vm0, %v2401_v11, 0.0  ;;  %v6298_v5 = vmul.f32 %v1570_v62, %v5918_v2  ;;  %v1566_v11 = vpop.permute.xlu0 %1565 }
 0x2cc   :  { %7351 = vst [vmem:[#allocation51_spill] sm:$0xff] %v6267_v29  ;;  %v2395_v15 = vmul.f32 %v2319_v55, %v6267_v29  ;;  %7356 = vst [vmem:[#allocation62_spill] sm:$0xff] %v6298_v5 }
 0x2ce   :  { %2500 = vadd.xlane.f32.xlu1 %v2499_v44  ;;  %2497 = vadd.xlane.f32.xlu0 %v2496_v7  ;;  %v7353_v44 = vld [vmem:[#allocation40_spill] sm:$0xff]  ;;  %v6287_v7 = vmul.f32 %v6189_v63, %v5811_v19  ;;  %v2433_v55 = vsel %vm249_vm0, %v2395_v15, 0.0 }
 0x2cf   :  { %v6283_v61 = vmul.f32 %v6134_v52, %v7353_v44  ;;  %v2309_v52 = vcombine.high %v6206_v9, %v6206_v9  ;;  %v7357_v19 = vld [vmem:[#allocation32_spill] sm:$0xff] }
 0x2d0   :  { %7355 = vst [vmem:[#allocation26_spill] sm:$0xff] %v6287_v7  ;;  %v2415_v27 = vmul.f32 %v2359_v36, %v6287_v7  ;;  %v6302_v63 = vmul.f32 %v6142_v25, %v7357_v19  ;;  %v6315_v25 = vmul.f32 %v6187_v20, %v5800_v12  ;;  %v6327_v12 = vmul.f32 %v1566_v11, %v5889_v21  ;;  %v7362_v20 = vld [vmem:[#allocation28_spill] sm:$0xff] }
 0x2d1   :  { %7354 = vst [vmem:[#allocation52_spill] sm:$0xff] %v6283_v61  ;;  %v2396_v38 = vmul.f32 %v2323_v37, %v6283_v61  ;;  %v1581_v37 = vpop.permute.xlu1 %1580  ;;  %v2371_v44 = vrot.slane %v2309_v52, %v7322_v33  ;;  %v2260_v21 = vcombine.high %v6245_v35, %v6245_v35 }
 0x2d2   :  { %2440 = vadd.xlane.f32.xlu1 %v2439_v1  ;;  %2431 = vadd.xlane.f32.xlu0 %v2430_v56  ;;  %7358 = vst [vmem:[#allocation55_spill] sm:$0xff] %v6302_v63  ;;  %v2419_v1 = vmul.f32 %v2367_v51, %v6298_v5  ;;  %v2261_v56 = vcombine.high %v6228_v60, %v6228_v60  ;;  %v2493_v9 = vsel %vm249_vm0, %v2415_v27, 0.0  ;;  %7359 = vst [vmem:[#allocation57_spill] sm:$0xff] %v6315_v25  ;;  %v1577_v27 = vpop.permute.xlu0 %1576 }
 0x2d3   :  { %v2436_v2 = vsel %vm249_vm0, %v2396_v38, 0.0  ;;  %v2400_v15 = vmul.f32 %v2331_v59, %v6302_v63  ;;  %v6318_v41 = vmul.f32 %v1581_v37, %v5958_v16  ;;  %v2414_v62 = vmul.f32 %v2359_v36, %v6315_v25  ;;  %7361 = vst [vmem:[#allocation33_spill] sm:$0xff] %v6327_v12 }
 0x2d4   :  { %v2505_v60 = vsel %vm249_vm0, %v2419_v1, 0.0  ;;  %v2327_v59 = vrot.slane %v2261_v56, %v7322_v33  ;;  %v6331_v16 = vmul.f32 %v6140_v53, %v7362_v20  ;;  %v2418_v19 = vmul.f32 %v2367_v51, %v6327_v12 }
 0x2d5   :  { %7360 = vst [vmem:[#allocation29_spill] sm:$0xff] %v6318_v41  ;;  %v2421_v38 = vmul.f32 %v2371_v44, %v6318_v41  ;;  %v1592_v52 = vpop.permute.xlu1 %1591  ;;  %v2490_v36 = vsel %vm249_vm0, %v2414_v62, 0.0  ;;  %v6345_v53 = vmul.f32 %v6148_v17, %v5841_v3  ;;  %v2339_v35 = vrot.slane %v2260_v21, %v7322_v33 }
 0x2d6   :  { %2452 = vadd.xlane.f32.xlu1 %v2451_v6  ;;  %2434 = vadd.xlane.f32.xlu0 %v2433_v55  ;;  %v2448_v6 = vsel %vm249_vm0, %v2400_v15, 0.0  ;;  %v2258_v55 = vrot.slane %v2230_v4, %v6159_v48  ;;  %7363 = vst [vmem:[#allocation60_spill] sm:$0xff] %v6331_v16  ;;  %v2399_v1 = vmul.f32 %v2327_v59, %v6331_v16  ;;  %v2502_v51 = vsel %vm249_vm0, %v2418_v19, 0.0  ;;  %v7366_v15 = vld [vmem:[#allocation58_spill] sm:$0xff] }
 0x2d7   :  { %v2511_v37 = vsel %vm249_vm0, %v2421_v38, 0.0  ;;  %v6341_v4 = vmul.f32 %v1577_v27, %v5951_v43  ;;  %7365 = vst [vmem:[#allocation31_spill] sm:$0xff] %v6345_v53  ;;  %v2311_v43 = vcombine.high %v6275_v40, %v6275_v40  ;;  %v6362_v3 = vmul.f32 %v6152_v10, %v5891_v34  ;;  %v1588_v34 = vpop.permute.xlu0 %1587 }
 0x2d8   :  { %v2335_v48 = vrot.slane %v2258_v55, %v7322_v33  ;;  %v6373_v20 = vmul.f32 %v6146_v57, %v5832_v18  ;;  %v6376_v10 = vmul.f32 %v1592_v52, %v5974_v39  ;;  %v6385_v18 = vmul.f32 %v6150_v8, %v5873_v22 }
 0x2d9   :  { %7364 = vst [vmem:[#allocation61_spill] sm:$0xff] %v6341_v4  ;;  %v6347_v56 = vpop.permute.xlu1 %2535  ;;  %v2420_v11 = vmul.f32 %v2371_v44, %v6341_v4  ;;  %7368 = vst [vmem:[#allocation16_spill] sm:$0xff] %v6362_v3  ;;  %v2405_v40 = vmul.f32 %v2339_v35, %v6362_v3  ;;  %v2375_v38 = vrot.slane %v2311_v43, %v7322_v33 }
 0x2da   :  { %2494 = vadd.xlane.f32.xlu1 %v2493_v9  ;;  %2437 = vadd.xlane.f32.xlu0 %v2436_v2  ;;  %v2445_v9 = vsel %vm249_vm0, %v2399_v1, 0.0  ;;  %v2403_v2 = vmul.f32 %v2335_v48, %v6345_v53  ;;  %7369 = vst [vmem:[#allocation53_spill] sm:$0xff] %v6373_v20  ;;  %7370 = vst [vmem:[#allocation27_spill] sm:$0xff] %v6376_v10  ;;  %v2402_v19 = vmul.f32 %v2335_v48, %v6373_v20 }
 0x2db   :  { %v2508_v17 = vsel %vm249_vm0, %v2420_v11, 0.0  ;;  %v2463_v27 = vsel %vm249_vm0, %v2405_v40, 0.0  ;;  %7371 = vst [vmem:[#allocation45_spill] sm:$0xff] %v6385_v18  ;;  %v6389_v39 = vmul.f32 %v6156_v14, %v5942_v30  ;;  %v2532_v57 = vpop.permute.xlu0 %2531  ;;  %v2404_v21 = vmul.f32 %v2339_v35, %v6385_v18 }
 0x2dc   :  { %v2454_v1 = vsel %vm249_vm0, %v2402_v19, 0.0  ;;  %v6398_v22 = vmul.f32 %v1588_v34, %v5966_v50 }
 0x2dd   :  { %v6366_v62 = vpop.permute.xlu1 %2542  ;;  %7372 = vst [vmem:[#allocation50_spill] sm:$0xff] %v6389_v39 }
 0x2de   :  { %2506 = vadd.xlane.f32.xlu1 %v2505_v60  ;;  %2449 = vadd.xlane.f32.xlu0 %v2448_v6  ;;  %v6358_v60 = vmul.f32 %v6138_v58, %v7366_v15  ;;  %v2457_v6 = vsel %vm249_vm0, %v2403_v2, 0.0  ;;  %v2262_v58 = vcombine.high %v2258_v55, %v2258_v55  ;;  %7373 = vst [vmem:[#allocation37_spill] sm:$0xff] %v6398_v22 }
 0x2df   :  { %v6400_v8 = vpop.permute.xlu0 %2553  ;;  %v2422_v11 = vmul.f32 %v2375_v38, %v6398_v22 }
 0x2e0   :  { %7367 = vst [vmem:[#allocation19_spill] sm:$0xff] %v6358_v60  ;;  %v2398_v44 = vmul.f32 %v2327_v59, %v6358_v60  ;;  %v2343_v55 = vrot.slane %v2262_v58, %v7322_v33 }
 0x2e1   :  { %v6391_v52 = vpop.permute.xlu1 %2546  ;;  %v2514_v35 = vsel %vm249_vm0, %v2422_v11, 0.0 }
 0x2e2   :  { %2512 = vadd.xlane.f32.xlu1 %v2511_v37  ;;  %2491 = vadd.xlane.f32.xlu0 %v2490_v36  ;;  %v2442_v59 = vsel %vm249_vm0, %v2398_v44, 0.0  ;;  %v2423_v36 = vmul.f32 %v2375_v38, %v6376_v10  ;;  %v2407_v48 = vmul.f32 %v2343_v55, %v6389_v39 }
 0x2e3   :  { %v6413_v43 = vpop.permute.xlu0 %2564 }
 0x2e4   :  { %v2517_v37 = vsel %vm249_vm0, %v2423_v36, 0.0  ;;  %v2469_v14 = vsel %vm249_vm0, %v2407_v48, 0.0 }
 0x2e5   :  { %v6402_v30 = vpop.permute.xlu1 %2557 }
 0x2e6   :  { %2446 = vadd.xlane.f32.xlu1 %v2445_v9  ;;  %2503 = vadd.xlane.f32.xlu0 %v2502_v51  ;;  %v2460_v51 = vsel %vm249_vm0, %v2404_v21, 0.0  ;;  %v7374_v9 = vld [vmem:[#allocation43_spill] sm:$0xff] }
 0x2e7   :  { %v6409_v2 = vmul.f32 %v7374_v9, %v5922_v42  ;;  %v6418_v44 = vpop.permute.xlu0 %2575 }
 0x2e9   :  { %7375 = vst [vmem:[#allocation47_spill] sm:$0xff] %v6409_v2  ;;  %v2406_v50 = vmul.f32 %v2343_v55, %v6409_v2  ;;  %v6415_v15 = vpop.permute.xlu1 %2568 }
 0x2ea   :  { %2458 = vadd.xlane.f32.xlu1 %v2457_v6  ;;  %2509 = vadd.xlane.f32.xlu0 %v2508_v17 }
 0x2eb   :  { %v2466_v17 = vsel %vm249_vm0, %v2406_v50, 0.0  ;;  %v6422_v40 = vpop.permute.xlu0 %2586 }
 0x2ed   :  { %v6420_v6 = vpop.permute.xlu1 %2579 }
 0x2ee   :  { %2464 = vadd.xlane.f32.xlu1 %v2463_v27  ;;  %2443 = vadd.xlane.f32.xlu0 %v2442_v59 }
 0x2ef   :  { %v6426_v38 = vpop.permute.xlu0 %2597 }
 0x2f1   :  { %v6424_v42 = vpop.permute.xlu1 %2590 }
 0x2f2   :  { %2518 = vadd.xlane.f32.xlu1 %v2517_v37  ;;  %2455 = vadd.xlane.f32.xlu0 %v2454_v1 }
 0x2f3   :  { %v6430_v34 = vpop.permute.xlu0 %2608 }
 0x2f5   :  { %v6428_v58 = vpop.permute.xlu1 %2601 }
 0x2f6   :  { %2470 = vadd.xlane.f32.xlu1 %v2469_v14  ;;  %2461 = vadd.xlane.f32.xlu0 %v2460_v51 }
 0x2f7   :  { %v2620_v27 = vpop.permute.xlu0 %2619 }
 0x2f9   :  { %v6432_v59 = vpop.permute.xlu1 %2612 }
 0x2fa   :  { %2515 = vadd.xlane.f32.xlu0 %v2514_v35 }
 0x2fb   :  { %v2631_v19 = vpop.permute.xlu0 %2630 }
 0x2fd   :  { %v2624_v36 = vpop.permute.xlu1 %2623 }
 0x2fe   :  { %2467 = vadd.xlane.f32.xlu0 %v2466_v17 }
 0x2ff   :  { %v2642_v37 = vpop.permute.xlu0 %2641 }
 0x301   :  { %v2635_v55 = vpop.permute.xlu1 %2634 }
 0x303   :  { %v6434_v48 = vpop.permute.xlu0 %2652 }
 0x305   :  { %v2646_v1 = vpop.permute.xlu1 %2645 }
 0x307   :  { %v2664_v14 = vpop.permute.xlu0 %2663 }
 0x309   :  { %v2657_v21 = vpop.permute.xlu1 %2656 }
 0x30b   :  { %v6436_v11 = vpop.permute.xlu0 %2674 }
 0x30d   :  { %v2668_v51 = vpop.permute.xlu1 %2667 }
 0x30f   :  { %v6440_v35 = vpop.permute.xlu0 %2685 }
 0x311   :  { %v6438_v9 = vpop.permute.xlu1 %2678 }
 0x313   :  { %v6444_v17 = vpop.permute.xlu0 %2696 }
 0x315   :  { %v6442_v50 = vpop.permute.xlu1 %2689 }
 0x319   :  { %v6446_v22 = vpop.permute.xlu1 %2700 }
 0x347   :  { %v2477_v10 = vpop.xlane.xlu1 %2476  ;;  %v2474_v2 = vpop.xlane.xlu0 %2473 }
 0x348   :  { %v6448_v39 = vadd.f32 %v2624_v36, %v2477_v10  ;;  %v6450_v18 = vadd.f32 %v2620_v27, %v2474_v2 }
 0x34a   :  { %2850 = vperm.xlu0 %4181, %v6448_v39   ;;  %2847 = vperm.xlu1 %4180, %v6450_v18  }
 0x34b   :  { %v2429_v3 = vpop.xlane.xlu1 %2428  ;;  %v2426_v20 = vpop.xlane.xlu0 %2425 }
 0x34c   :  { %v6455_v53 = vadd.f32 %v6347_v56, %v2429_v3  ;;  %v6457_v63 = vadd.f32 %v2532_v57, %v2426_v20 }
 0x34e   :  { %2802 = vperm.xlu1 %4180, %v6455_v53   ;;  %2799 = vperm.xlu0 %4181, %v6457_v63  }
 0x34f   :  { %v2483_v13 = vpop.xlane.xlu1 %2482  ;;  %v2480_v10 = vpop.xlane.xlu0 %2479 }
 0x350   :  { %v6461_v36 = vadd.f32 %v2635_v55, %v2483_v13  ;;  %v6463_v2 = vadd.f32 %v2631_v19, %v2480_v10 }
 0x352   :  { %2856 = vperm.xlu0 %4181, %v6461_v36   ;;  %2853 = vperm.xlu1 %4180, %v6463_v2  }
 0x353   :  { %v2489_v27 = vpop.xlane.xlu1 %2488  ;;  %v2486_v60 = vpop.xlane.xlu0 %2485 }
 0x354   :  { %v6467_v56 = vadd.f32 %v2646_v1, %v2489_v27  ;;  %v6469_v3 = vadd.f32 %v2642_v37, %v2486_v60 }
 0x356   :  { %2862 = vperm.xlu0 %4181, %v6467_v56   ;;  %2859 = vperm.xlu1 %4180, %v6469_v3  }
 0x357   :  { %v2501_v20 = vpop.xlane.xlu1 %2500  ;;  %v2498_v57 = vpop.xlane.xlu0 %2497 }
 0x358   :  { %v6473_v13 = vadd.f32 %v2668_v51, %v2501_v20  ;;  %v6475_v19 = vadd.f32 %v2664_v14, %v2498_v57 }
 0x35a   :  { %2874 = vperm.xlu0 %4181, %v6473_v13   ;;  %2871 = vperm.xlu1 %4180, %v6475_v19  }
 0x35b   :  { %v2441_v55 = vpop.xlane.xlu1 %2440  ;;  %v2432_v10 = vpop.xlane.xlu0 %2431 }
 0x35c   :  { %v6480_v1 = vadd.f32 %v6366_v62, %v2432_v10  ;;  %v6488_v20 = vadd.f32 %v6402_v30, %v2441_v55 }
 0x35e   :  { %2805 = vperm.xlu1 %4180, %v6480_v1  }
 0x35f   :  { %v2453_v60 = vpop.xlane.xlu1 %2452  ;;  %v2435_v37 = vpop.xlane.xlu0 %2434 }
 0x360   :  { %v6484_v27 = vadd.f32 %v6391_v52, %v2435_v37  ;;  %v6496_v16 = vadd.f32 %v6420_v6, %v2453_v60 }
 0x362   :  { %2808 = vperm.xlu0 %4181, %v6484_v27  }
 0x363   :  { %v2495_v14 = vpop.xlane.xlu1 %2494  ;;  %v2438_v51 = vpop.xlane.xlu0 %2437 }
 0x364   :  { %v6491_v57 = vadd.f32 %v6400_v8, %v2438_v51  ;;  %v6503_v8 = vadd.f32 %v2657_v21, %v2495_v14 }
 0x366   :  { %2814 = vperm.xlu0 %4181, %v6488_v20   ;;  %2811 = vperm.xlu1 %4180, %v6491_v57  }
 0x367   :  { %v2507_v62 = vpop.xlane.xlu1 %2506  ;;  %v2450_v10 = vpop.xlane.xlu0 %2449 }
 0x368   :  { %v6499_v52 = vadd.f32 %v6418_v44, %v2450_v10  ;;  %v6511_v44 = vadd.f32 %v6438_v9, %v2507_v62 }
 0x36a   :  { %2826 = vperm.xlu0 %4181, %v6496_v16   ;;  %2823 = vperm.xlu1 %4180, %v6499_v52  }
 0x36b   :  { %v2513_v30 = vpop.xlane.xlu1 %2512  ;;  %v2492_v55 = vpop.xlane.xlu0 %2491 }
 0x36c   :  { %v6506_v37 = vadd.f32 %v6434_v48, %v2492_v55  ;;  %v6519_v48 = vadd.f32 %v6442_v50, %v2513_v30 }
 0x36e   :  { %2868 = vperm.xlu0 %4181, %v6503_v8   ;;  %2865 = vperm.xlu1 %4180, %v6506_v37  }
 0x36f   :  { %v2447_v6 = vpop.xlane.xlu1 %2446  ;;  %v2504_v60 = vpop.xlane.xlu0 %2503 }
 0x370   :  { %v6514_v51 = vadd.f32 %v6436_v11, %v2504_v60  ;;  %v6527_v11 = vadd.f32 %v6415_v15, %v2447_v6 }
 0x372   :  { %2880 = vperm.xlu0 %4181, %v6511_v44   ;;  %2877 = vperm.xlu1 %4180, %v6514_v51  }
 0x373   :  { %v2459_v21 = vpop.xlane.xlu1 %2458  ;;  %v2510_v14 = vpop.xlane.xlu0 %2509 }
 0x374   :  { %v6522_v10 = vadd.f32 %v6440_v35, %v2510_v14  ;;  %v6535_v35 = vadd.f32 %v6424_v42, %v2459_v21 }
 0x376   :  { %2886 = vperm.xlu0 %4181, %v6519_v48   ;;  %2883 = vperm.xlu1 %4180, %v6522_v10   ;;  %7376 = vst [vmem:[#allocation35_spill] sm:$0xff] %v6535_v35 }
 0x377   :  { %v2465_v9 = vpop.xlane.xlu1 %2464  ;;  %v2444_v62 = vpop.xlane.xlu0 %2443 }
 0x378   :  { %v6530_v55 = vadd.f32 %v6413_v43, %v2444_v62  ;;  %v6543_v43 = vadd.f32 %v6428_v58, %v2465_v9 }
 0x37a   :  { %2820 = vperm.xlu0 %4181, %v6527_v11   ;;  %2817 = vperm.xlu1 %4180, %v6530_v55   ;;  %7378 = vst [vmem:[#allocation32_spill] sm:$0xff] %v6543_v43 }
 0x37b   :  { %v2519_v50 = vpop.xlane.xlu1 %2518  ;;  %v2456_v30 = vpop.xlane.xlu0 %2455 }
 0x37c   :  { %v6538_v60 = vadd.f32 %v6422_v40, %v2456_v30  ;;  %v6555_v62 = vadd.f32 %v6446_v22, %v2519_v50 }
 0x37e   :  { %7377 = vst [vmem:[#allocation40_spill] sm:$0xff] %v6538_v60  ;;  %2832 = vperm.xlu0 %4181, %v6535_v35   ;;  %2829 = vperm.xlu1 %4180, %v6538_v60   ;;  %7381 = vst [vmem:[#allocation43_spill] sm:$0xff] %v6555_v62 }
 0x37f   :  { %v2462_v15 = vpop.xlane.xlu0 %2461  ;;  %v2471_v14 = vpop.xlane.xlu1 %2470 }
 0x380   :  { %v6546_v6 = vadd.f32 %v6426_v38, %v2462_v15  ;;  %v6551_v40 = vadd.f32 %v6432_v59, %v2471_v14 }
 0x382   :  { %7379 = vst [vmem:[#allocation28_spill] sm:$0xff] %v6546_v6  ;;  %2838 = vperm.xlu0 %4181, %v6543_v43   ;;  %2835 = vperm.xlu1 %4180, %v6546_v6   ;;  %7380 = vst [vmem:[#allocation58_spill] sm:$0xff] %v6551_v40 }
 0x383   :  { %v2516_v42 = vpop.xlane.xlu0 %2515 }
 0x384   :  { %v6563_v38 = vadd.f32 %v6444_v17, %v2516_v42 }
 0x386   :  { %2844 = vperm.xlu0 %4181, %v6551_v40   ;;  %7383 = vst [vmem:[#allocation64_spill] sm:$0xff] %v6563_v38 }
 0x387   :  { %v2468_v21 = vpop.xlane.xlu0 %2467 }
 0x388   :  { %v6558_v58 = vadd.f32 %v6430_v34, %v2468_v21 }
 0x38a   :  { %7382 = vst [vmem:[#allocation63_spill] sm:$0xff] %v6558_v58  ;;  %2892 = vperm.xlu0 %4181, %v6555_v62   ;;  %2841 = vperm.xlu1 %4180, %v6558_v58  }
 0x38e   :  { %2889 = vperm.xlu1 %4180, %v6563_v38  }
 0x3c5   :  { %v2848_v59 = vpop.permute.xlu1 %2847  ;;  %v2851_v9 = vpop.permute.xlu0 %2850 }
 0x3c6   :  { %v2973_v26 = vrot.slane %v2848_v59, %v6580_v45  ;;  %v2977_v62 = vrot.slane %v2851_v9, %v6583_v46 }
 0x3c9   :  { %v2803_v30 = vpop.permute.xlu1 %2802  ;;  %v2800_v15 = vpop.permute.xlu0 %2799 }
 0x3ca   :  { %v2904_v38 = vrot.slane %v2803_v30, %v6583_v46  ;;  %v2899_v43 = vrot.slane %v2800_v15, %v6580_v45  ;;  %v2978_v15 = vsel %vm2905_vm11, %v2977_v62, %v2973_v26 }
 0x3cd   :  { %v2854_v14 = vpop.permute.xlu1 %2853  ;;  %v2857_v4 = vpop.permute.xlu0 %2856 }
 0x3ce   :  { %v2982_v32 = vrot.slane %v2854_v14, %v6580_v45  ;;  %v2986_v6 = vrot.slane %v2857_v4, %v6583_v46  ;;  %v2906_v14 = vsel %vm2905_vm11, %v2904_v38, %v2899_v43 }
 0x3d0   :  { %v2987_v4 = vsel %vm2905_vm11, %v2986_v6, %v2982_v32 }
 0x3d1   :  { %v2860_v22 = vpop.permute.xlu1 %2859  ;;  %v2863_v50 = vpop.permute.xlu0 %2862  ;;  %v3049_v32 = vsel %vm1646_vm4, %v2987_v4, %v2978_v15 }
 0x3d5   :  { %v6566_v41 = vpop.permute.xlu1 %2871  ;;  %v6568_v34 = vpop.permute.xlu0 %2874 }
 0x3d9   :  { %v2806_v21 = vpop.permute.xlu1 %2805 }
 0x3da   :  { %v2910_v28 = vrot.slane %v2806_v21, %v6580_v45  ;;  %v2991_v21 = vrot.slane %v2860_v22, %v6580_v45 }
 0x3dd   :  { %v2809_v12 = vpop.permute.xlu0 %2808 }
 0x3de   :  { %v2914_v47 = vrot.slane %v2809_v12, %v6583_v46 }
 0x3e0   :  { %v2915_v59 = vsel %vm2905_vm11, %v2914_v47, %v2910_v28 }
 0x3e1   :  { %v2812_v5 = vpop.permute.xlu1 %2811  ;;  %v2815_v61 = vpop.permute.xlu0 %2814 }
 0x3e2   :  { %v2919_v0 = vrot.slane %v2812_v5, %v6580_v45  ;;  %v2923_v12 = vrot.slane %v2815_v61, %v6583_v46  ;;  %v2995_v5 = vrot.slane %v2863_v50, %v6583_v46  ;;  %v3042_v61 = vsel %vm1646_vm4, %v2915_v59, %v2906_v14 }
 0x3e4   :  { %v2924_v47 = vsel %vm2905_vm11, %v2923_v12, %v2919_v0 }
 0x3e5   :  { %v2824_v17 = vpop.permute.xlu1 %2823  ;;  %v2827_v42 = vpop.permute.xlu0 %2826 }
 0x3e6   :  { %v2937_v6 = vrot.slane %v2824_v17, %v6580_v45  ;;  %v2941_v38 = vrot.slane %v2827_v42, %v6583_v46 }
 0x3e8   :  { %v2942_v12 = vsel %vm2905_vm11, %v2941_v38, %v2937_v6 }
 0x3e9   :  { %v2866_v31 = vpop.permute.xlu1 %2865  ;;  %v2869_v24 = vpop.permute.xlu0 %2868 }
 0x3ed   :  { %v6571_v29 = vpop.permute.xlu1 %2877  ;;  %v6573_v54 = vpop.permute.xlu0 %2880 }
 0x3f1   :  { %v6575_v25 = vpop.permute.xlu1 %2883  ;;  %v6577_v7 = vpop.permute.xlu0 %2886 }
 0x3f5   :  { %v2818_v49 = vpop.permute.xlu1 %2817  ;;  %v2821_v23 = vpop.permute.xlu0 %2820 }
 0x3f6   :  { %v2928_v9 = vrot.slane %v2818_v49, %v6580_v45  ;;  %v2932_v30 = vrot.slane %v2821_v23, %v6583_v46  ;;  %v3000_v49 = vrot.slane %v2866_v31, %v6580_v45  ;;  %v3004_v23 = vrot.slane %v2869_v24, %v6583_v46 }
 0x3f7   :  { %v3043_v31 = vsel %vm1649_vm5, %v2924_v47, %v3042_v61  ;;  %v2996_v24 = vsel %vm2905_vm11, %v2995_v5, %v2991_v21 }
 0x3f8   :  { %v2933_v28 = vsel %vm2905_vm11, %v2932_v30, %v2928_v9  ;;  %v3005_v42 = vsel %vm2905_vm11, %v3004_v23, %v3000_v49  ;;  %v3050_v30 = vsel %vm1649_vm5, %v2996_v24, %v3049_v32 }
 0x3f9   :  { %v2830_v40 = vpop.permute.xlu1 %2829  ;;  %v2833_v58 = vpop.permute.xlu0 %2832  ;;  %v3044_v17 = vsel %vm1652_vm6, %v2933_v28, %v3043_v31  ;;  %v3051_v14 = vsel %vm1652_vm6, %v3005_v42, %v3050_v30 }
 0x3fa   :  { %v2946_v62 = vrot.slane %v2830_v40, %v6580_v45  ;;  %v2950_v43 = vrot.slane %v2833_v58, %v6583_v46  ;;  %v3009_v40 = vrot.slane %v6566_v41, %v6580_v45  ;;  %v3013_v58 = vrot.slane %v6568_v34, %v6583_v46 }
 0x3fb   :  { %v3027_v41 = vrot.slane %v6575_v25, %v6580_v45  ;;  %v3031_v34 = vrot.slane %v6577_v7, %v6583_v46 }
 0x3fc   :  { %v2951_v0 = vsel %vm2905_vm11, %v2950_v43, %v2946_v62  ;;  %v3014_v61 = vsel %vm2905_vm11, %v3013_v58, %v3009_v40  ;;  %v7385_v40 = vld [vmem:[#allocation17_spill] sm:$0xff] }
 0x3fd   :  { %v2839_v35 = vpop.permute.xlu0 %2838  ;;  %v2836_v60 = vpop.permute.xlu1 %2835  ;;  %v3032_v47 = vsel %vm2905_vm11, %v3031_v34, %v3027_v41  ;;  %v3052_v6 = vsel %vm1655_vm7, %v3014_v61, %v3051_v14  ;;  %v7390_v61 = vld [vmem:[#allocation23_spill] sm:$0xff] }
 0x3fe   :  { %v2955_v22 = vrot.slane %v2836_v60, %v6580_v45  ;;  %v2959_v50 = vrot.slane %v2839_v35, %v6583_v46  ;;  %v3018_v35 = vrot.slane %v6571_v29, %v6580_v45  ;;  %v3022_v60 = vrot.slane %v6573_v54, %v6583_v46 }
 0x3ff   :  { %v3045_v54 = vsel %vm1655_vm7, %v2942_v12, %v3044_v17 }
 0x400   :  { %v2960_v59 = vsel %vm2905_vm11, %v2959_v50, %v2955_v22  ;;  %v3046_v21 = vsel %vm1658_vm8, %v2951_v0, %v3045_v54  ;;  %v3023_v25 = vsel %vm2905_vm11, %v3022_v60, %v3018_v35  ;;  %v7386_v35 = vld [vmem:[#allocation18_spill] sm:$0xff] }
 0x401   :  { %v2845_v26 = vpop.permute.xlu0 %2844  ;;  %v3047_v5 = vsel %vm1661_vm9, %v2960_v59, %v3046_v21  ;;  %v3053_v38 = vsel %vm1658_vm8, %v3023_v25, %v3052_v6  ;;  %v7387_v59 = vld [vmem:[#allocation20_spill] sm:$0xff]  ;;  %v7389_v21 = vld [vmem:[#allocation22_spill] sm:$0xff] }
 0x402   :  { %v2968_v29 = vrot.slane %v2845_v26, %v6583_v46  ;;  %v3054_v50 = vsel %vm1661_vm9, %v3032_v47, %v3053_v38 }
 0x405   :  { %v2842_v9 = vpop.permute.xlu1 %2841  ;;  %v2893_v4 = vpop.permute.xlu0 %2892 }
 0x406   :  { %v2964_v15 = vrot.slane %v2842_v9, %v6580_v45  ;;  %v3040_v28 = vrot.slane %v2893_v4, %v6583_v46 }
 0x408   :  { %v2969_v7 = vsel %vm2905_vm11, %v2968_v29, %v2964_v15  ;;  %v7388_v15 = vld [vmem:[#allocation21_spill] sm:$0xff] }
 0x409   :  { %v2890_v49 = vpop.permute.xlu1 %2889  ;;  %v3048_v23 = vsel %vm1664_vm10, %v2969_v7, %v3047_v5 }
 0x40a   :  { %v3036_v62 = vrot.slane %v2890_v49, %v6580_v45  ;;  %v3058_v43 = vsel %vm1340_vm1, %v3048_v23, -inf }
 0x40b   :  { %3059 = vmax.xlane.f32.xlu1 %v3058_v43 }
 0x40c   :  { %v3041_v22 = vsel %vm2905_vm11, %v3040_v28, %v3036_v62 }
 0x40d   :  { %v3055_v26 = vsel %vm1664_vm10, %v3041_v22, %v3054_v50 }
 0x40e   :  { %v3061_v32 = vsel %vm1340_vm1, %v3055_v26, -inf }
 0x40f   :  { %3062 = vmax.xlane.f32.xlu0 %v3061_v32 }
 0x494   :  { %v6684_v23 = vpop.xlane.xlu1 %3059 }
 0x495   :  { %v3073_v50 = vrot.slane %v6684_v23, %v7385_v40 }
 0x498   :  { %v6655_v31 = vpop.xlane.xlu0 %3062 }
 0x499   :  { %v3101_v24 = vrot.slane %v6655_v31, %v7322_v33  ;;  %v3105_v58 = vrot.slane %v6655_v31, %v7385_v40  ;;  %v3109_v60 = vrot.slane %v6655_v31, %v7386_v35  ;;  %v3113_v9 = vrot.slane %v6655_v31, %v7387_v59 }
 0x49a   :  { %v3117_v54 = vrot.slane %v6655_v31, %v7388_v15 }
 0x49b   :  { %v3162_v17 = vsub.f32 %v6450_v18, %v3101_v24  ;;  %v3163_v42 = vsub.f32 %v6448_v39, %v3101_v24  ;;  %v3164_v0 = vsub.f32 %v6463_v2, %v3105_v58  ;;  %v3165_v41 = vsub.f32 %v6461_v36, %v3105_v58 }
 0x49c   :  { %v3166_v30 = vsub.f32 %v6469_v3, %v3109_v60  ;;  %v3167_v18 = vsub.f32 %v6467_v56, %v3109_v60  ;;  %v3168_v2 = vsub.f32 %v6506_v37, %v3113_v9  ;;  %v3169_v36 = vsub.f32 %v6503_v8, %v3113_v9 }
 0x49d   :  { %v3210_v12 = vmul.f32 1.442695, %v3162_v17  ;;  %v3212_v34 = vmul.f32 1.442695, %v3163_v42  ;;  %v3214_v29 = vmul.f32 1.442695, %v3164_v0  ;;  %v3121_v3 = vrot.slane %v6655_v31, %v7389_v21 }
 0x49e   :  { %v3216_v39 = vmul.f32 1.442695, %v3165_v41  ;;  %v3218_v14 = vmul.f32 1.442695, %v3166_v30  ;;  %v3220_v4 = vmul.f32 1.442695, %v3167_v18  ;;  %v3170_v25 = vsub.f32 %v6475_v19, %v3117_v54 }
 0x49f   :  { %4406 = vpow2.f32 %v3210_v12  ;;  %v3222_v56 = vmul.f32 1.442695, %v3168_v2  ;;  %v3171_v7 = vsub.f32 %v6473_v13, %v3117_v54  ;;  %v3224_v5 = vmul.f32 1.442695, %v3169_v36 }
 0x4a0   :  { %4408 = vpow2.f32 %v3212_v34  ;;  %v3125_v37 = vrot.slane %v6655_v31, %v7390_v61  ;;  %v3172_v47 = vsub.f32 %v6514_v51, %v3121_v3  ;;  %v3226_v8 = vmul.f32 1.442695, %v3170_v25 }
 0x4a1   :  { %4410 = vpow2.f32 %v3214_v29  ;;  %v3173_v28 = vsub.f32 %v6511_v44, %v3121_v3  ;;  %v3228_v19 = vmul.f32 1.442695, %v3171_v7  ;;  %v3069_v13 = vrot.slane %v6684_v23, %v7322_v33 }
 0x4a2   :  { %4412 = vpow2.f32 %v3216_v39  ;;  %v3174_v51 = vsub.f32 %v6522_v10, %v3125_v37  ;;  %v3230_v43 = vmul.f32 1.442695, %v3172_v47  ;;  %v3175_v38 = vsub.f32 %v6519_v48, %v3125_v37 }
 0x4a3   :  { %4414 = vpow2.f32 %v3218_v14  ;;  %v3232_v44 = vmul.f32 1.442695, %v3173_v28  ;;  %v3147_v26 = vsub.f32 %v6455_v53, %v3069_v13  ;;  %v3146_v24 = vsub.f32 %v6457_v63, %v3069_v13  ;;  %v7393_v13 = vld [vmem:[#allocation24_spill] sm:$0xff] }
 0x4a4   :  { %4416 = vpow2.f32 %v3220_v4  ;;  %v3234_v10 = vmul.f32 1.442695, %v3174_v51  ;;  %v3236_v48 = vmul.f32 1.442695, %v3175_v38  ;;  %v3077_v17 = vrot.slane %v6684_v23, %v7386_v35 }
 0x4a5   :  { %4418 = vpow2.f32 %v3222_v56  ;;  %v3148_v42 = vsub.f32 %v6480_v1, %v3073_v50  ;;  %v3180_v53 = vmul.f32 1.442695, %v3147_v26  ;;  %v3149_v0 = vsub.f32 %v6484_v27, %v3073_v50  ;;  %v7395_v26 = vld [vmem:[#allocation32_spill] sm:$0xff] }
 0x4a6   :  { %4420 = vpow2.f32 %v3224_v5  ;;  %v3178_v63 = vmul.f32 1.442695, %v3146_v24  ;;  %v3081_v41 = vrot.slane %v6684_v23, %v7387_v59  ;;  %v3150_v34 = vsub.f32 %v6491_v57, %v3077_v17  ;;  %v7391_v5 = vld [vmem:[#allocation40_spill] sm:$0xff] }
 0x4a7   :  { %4422 = vpow2.f32 %v3226_v8  ;;  %v3182_v1 = vmul.f32 1.442695, %v3148_v42  ;;  %v3151_v30 = vsub.f32 %v6488_v20, %v3077_v17  ;;  %v3184_v27 = vmul.f32 1.442695, %v3149_v0  ;;  %v7392_v8 = vld [vmem:[#allocation35_spill] sm:$0xff] }
 0x4a8   :  { %4424 = vpow2.f32 %v3228_v19  ;;  %v3085_v18 = vrot.slane %v6684_v23, %v7388_v15  ;;  %v3152_v39 = vsub.f32 %v6530_v55, %v3081_v41  ;;  %v3186_v57 = vmul.f32 1.442695, %v3150_v34  ;;  %v7396_v17 = vld [vmem:[#allocation63_spill] sm:$0xff] }
 0x4a9   :  { %4426 = vpow2.f32 %v3230_v43  ;;  %v3153_v2 = vsub.f32 %v6527_v11, %v3081_v41  ;;  %v3188_v20 = vmul.f32 1.442695, %v3151_v30  ;;  %v3089_v36 = vrot.slane %v6684_v23, %v7389_v21  ;;  %v7394_v43 = vld [vmem:[#allocation28_spill] sm:$0xff] }
 0x4aa   :  { %4428 = vpow2.f32 %v3232_v44  ;;  %v3154_v4 = vsub.f32 %v6499_v52, %v3085_v18  ;;  %v3190_v55 = vmul.f32 1.442695, %v3152_v39  ;;  %v3155_v25 = vsub.f32 %v6496_v16, %v3085_v18 }
 0x4ab   :  { %4430 = vpow2.f32 %v3234_v10  ;;  %v3192_v11 = vmul.f32 1.442695, %v3153_v2  ;;  %v3093_v7 = vrot.slane %v6684_v23, %v7390_v61  ;;  %v3156_v37 = vsub.f32 %v7391_v5, %v3089_v36 }
 0x4ac   :  { %v6682_v49 = vpop.eup %4406  ;;  %4432 = vpow2.f32 %v3236_v48  ;;  %v3194_v52 = vmul.f32 1.442695, %v3154_v4  ;;  %v3157_v28 = vsub.f32 %v7392_v8, %v3089_v36  ;;  %v3196_v16 = vmul.f32 1.442695, %v3155_v25 }
 0x4ad   :  { %v6687_v62 = vpop.eup %4408  ;;  %3323 = vperm.xlu1 %4180, %v6682_v49   ;;  %4434 = vpow2.f32 %v3180_v53  ;;  %v3097_v51 = vrot.slane %v6684_v23, %v7393_v13  ;;  %v3158_v38 = vsub.f32 %v7394_v43, %v3093_v7  ;;  %v3198_v44 = vmul.f32 1.442695, %v3156_v37 }
 0x4ae   :  { %3326 = vperm.xlu0 %4181, %v6687_v62   ;;  %v6694_v6 = vpop.eup %4410  ;;  %4436 = vpow2.f32 %v3178_v63  ;;  %v3159_v10 = vsub.f32 %v7395_v26, %v3093_v7  ;;  %v3200_v24 = vmul.f32 1.442695, %v3157_v28  ;;  %v3129_v53 = vrot.slane %v6655_v31, %v7393_v13  ;;  %v7398_v63 = vld [vmem:[#allocation58_spill] sm:$0xff] }
 0x4af   :  { %v6697_v22 = vpop.eup %4412  ;;  %4438 = vpow2.f32 %v3182_v1  ;;  %v3160_v42 = vsub.f32 %v7396_v17, %v3097_v51  ;;  %v3202_v23 = vmul.f32 1.442695, %v3158_v38  ;;  %v3161_v41 = vsub.f32 %v7398_v63, %v3097_v51 }
 0x4b0   :  { %v6704_v32 = vpop.eup %4414  ;;  %4440 = vpow2.f32 %v3184_v27  ;;  %v3204_v34 = vmul.f32 1.442695, %v3159_v10  ;;  %v7400_v27 = vld [vmem:[#allocation64_spill] sm:$0xff] }
 0x4b1   :  { %3329 = vperm.xlu1 %4180, %v6694_v6   ;;  %v6707_v58 = vpop.eup %4416  ;;  %4442 = vpow2.f32 %v3186_v57  ;;  %v3206_v30 = vmul.f32 1.442695, %v3160_v42  ;;  %v3176_v18 = vsub.f32 %v7400_v27, %v3129_v53  ;;  %v3208_v31 = vmul.f32 1.442695, %v3161_v41  ;;  %v7402_v57 = vld [vmem:[#allocation43_spill] sm:$0xff] }
 0x4b2   :  { %3332 = vperm.xlu0 %4181, %v6697_v22   ;;  %v6714_v60 = vpop.eup %4418  ;;  %4444 = vpow2.f32 %v3188_v20  ;;  %v3177_v2 = vsub.f32 %v7402_v57, %v3129_v53 }
 0x4b3   :  { %v6717_v12 = vpop.eup %4420  ;;  %4446 = vpow2.f32 %v3190_v55  ;;  %v3238_v36 = vmul.f32 1.442695, %v3176_v18 }
 0x4b4   :  { %v6724_v9 = vpop.eup %4422  ;;  %4448 = vpow2.f32 %v3192_v11  ;;  %v3240_v55 = vmul.f32 1.442695, %v3177_v2 }
 0x4b5   :  { %3335 = vperm.xlu1 %4180, %v6704_v32   ;;  %v6727_v29 = vpop.eup %4424  ;;  %4450 = vpow2.f32 %v3194_v52 }
 0x4b6   :  { %3338 = vperm.xlu0 %4181, %v6707_v58   ;;  %v6734_v54 = vpop.eup %4426  ;;  %4452 = vpow2.f32 %v3196_v16 }
 0x4b7   :  { %v6737_v14 = vpop.eup %4428  ;;  %4454 = vpow2.f32 %v3198_v44 }
 0x4b8   :  { %v6744_v3 = vpop.eup %4430  ;;  %4456 = vpow2.f32 %v3200_v24 }
 0x4b9   :  { %3341 = vperm.xlu1 %4180, %v6714_v60   ;;  %v6747_v56 = vpop.eup %4432  ;;  %4458 = vpow2.f32 %v3202_v23 }
 0x4ba   :  { %3344 = vperm.xlu0 %4181, %v6717_v12   ;;  %v6754_v47 = vpop.eup %4434  ;;  %4460 = vpow2.f32 %v3204_v34 }
 0x4bb   :  { %v6757_v19 = vpop.eup %4436  ;;  %4462 = vpow2.f32 %v3206_v30 }
 0x4bc   :  { %v6764_v50 = vpop.eup %4438  ;;  %4464 = vpow2.f32 %v3208_v31 }
 0x4bd   :  { %3347 = vperm.xlu1 %4180, %v6724_v9   ;;  %v6767_v48 = vpop.eup %4440  ;;  %4466 = vpow2.f32 %v3238_v36 }
 0x4be   :  { %3350 = vperm.xlu0 %4181, %v6727_v29   ;;  %v6774_v0 = vpop.eup %4442  ;;  %4468 = vpow2.f32 %v3240_v55 }
 0x4bf   :  { %7397 = vst [vmem:[#allocation17_spill] sm:$0xff] %v6774_v0  ;;  %v6777_v1 = vpop.eup %4444 }
 0x4c0   :  { %7399 = vst [vmem:[#allocation18_spill] sm:$0xff] %v6777_v1  ;;  %v6782_v39 = vpop.eup %4446 }
 0x4c1   :  { %3353 = vperm.xlu1 %4180, %v6734_v54   ;;  %7401 = vst [vmem:[#allocation20_spill] sm:$0xff] %v6782_v39  ;;  %v6785_v20 = vpop.eup %4448 }
 0x4c2   :  { %3356 = vperm.xlu0 %4181, %v6737_v14   ;;  %7403 = vst [vmem:[#allocation21_spill] sm:$0xff] %v6785_v20  ;;  %v6789_v4 = vpop.eup %4450 }
 0x4c3   :  { %7404 = vst [vmem:[#allocation22_spill] sm:$0xff] %v6789_v4  ;;  %v6791_v25 = vpop.eup %4452 }
 0x4c4   :  { %7405 = vst [vmem:[#allocation23_spill] sm:$0xff] %v6791_v25  ;;  %v6795_v11 = vpop.eup %4454 }
 0x4c5   :  { %3359 = vperm.xlu1 %4180, %v6744_v3   ;;  %7406 = vst [vmem:[#allocation40_spill] sm:$0xff] %v6795_v11  ;;  %v6797_v7 = vpop.eup %4456 }
 0x4c6   :  { %3362 = vperm.xlu0 %4181, %v6747_v56   ;;  %7407 = vst [vmem:[#allocation35_spill] sm:$0xff] %v6797_v7  ;;  %v6801_v5 = vpop.eup %4458 }
 0x4c7   :  { %7408 = vst [vmem:[#allocation24_spill] sm:$0xff] %v6801_v5  ;;  %v6803_v37 = vpop.eup %4460 }
 0x4c8   :  { %7409 = vst [vmem:[#allocation28_spill] sm:$0xff] %v6803_v37  ;;  %v6807_v52 = vpop.eup %4462 }
 0x4c9   :  { %3278 = vperm.xlu1 %4180, %v6754_v47   ;;  %7410 = vst [vmem:[#allocation32_spill] sm:$0xff] %v6807_v52  ;;  %v6809_v8 = vpop.eup %4464 }
 0x4ca   :  { %3275 = vperm.xlu0 %4181, %v6757_v19   ;;  %7411 = vst [vmem:[#allocation63_spill] sm:$0xff] %v6809_v8  ;;  %v6813_v28 = vpop.eup %4466 }
 0x4cb   :  { %7412 = vst [vmem:[#allocation58_spill] sm:$0xff] %v6813_v28  ;;  %v6815_v16 = vpop.eup %4468 }
 0x4cc   :  { %7413 = vst [vmem:[#allocation64_spill] sm:$0xff] %v6815_v16 }
 0x4cd   :  { %3281 = vperm.xlu1 %4180, %v6764_v50  }
 0x4ce   :  { %3284 = vperm.xlu0 %4181, %v6767_v48  }
 0x4d1   :  { %3287 = vperm.xlu1 %4180, %v6774_v0  }
 0x4d2   :  { %3290 = vperm.xlu0 %4181, %v6777_v1  }
 0x4d5   :  { %3293 = vperm.xlu1 %4180, %v6782_v39  }
 0x4d6   :  { %3296 = vperm.xlu0 %4181, %v6785_v20  }
 0x4d9   :  { %3299 = vperm.xlu1 %4180, %v6789_v4  }
 0x4da   :  { %3302 = vperm.xlu0 %4181, %v6791_v25  }
 0x4dd   :  { %3305 = vperm.xlu1 %4180, %v6795_v11  }
 0x4de   :  { %3308 = vperm.xlu0 %4181, %v6797_v7  }
 0x4e1   :  { %3311 = vperm.xlu1 %4180, %v6801_v5  }
 0x4e2   :  { %3314 = vperm.xlu0 %4181, %v6803_v37  }
 0x4e5   :  { %3317 = vperm.xlu1 %4180, %v6807_v52  }
 0x4e6   :  { %3320 = vperm.xlu0 %4181, %v6809_v8  }
 0x4e9   :  { %3365 = vperm.xlu1 %4180, %v6813_v28  }
 0x4ea   :  { %3368 = vperm.xlu0 %4181, %v6815_v16  }
 0x528   :  { %v6819_v51 = vpop.permute.xlu1 %3323 }
 0x529   :  { %v6821_v43 = vpop.permute.xlu0 %3326  ;;  %v3445_v4 = vrot.slane %v6819_v51, %v6580_v45 }
 0x52c   :  { %v3330_v38 = vpop.permute.xlu1 %3329 }
 0x52d   :  { %v3333_v44 = vpop.permute.xlu0 %3332  ;;  %v3454_v52 = vrot.slane %v3330_v38, %v6580_v45 }
 0x52e   :  { %v3458_v8 = vrot.slane %v3333_v44, %v6583_v46 }
 0x530   :  { %v3336_v26 = vpop.permute.xlu1 %3335 }
 0x531   :  { %v3339_v10 = vpop.permute.xlu0 %3338  ;;  %v3463_v5 = vrot.slane %v3336_v26, %v6580_v45 }
 0x532   :  { %v3467_v37 = vrot.slane %v3339_v10, %v6583_v46 }
 0x534   :  { %v6823_v24 = vpop.permute.xlu1 %3341 }
 0x535   :  { %v6825_v17 = vpop.permute.xlu0 %3344 }
 0x538   :  { %v6827_v42 = vpop.permute.xlu1 %3347 }
 0x539   :  { %v6829_v23 = vpop.permute.xlu0 %3350 }
 0x53c   :  { %v6831_v53 = vpop.permute.xlu1 %3353 }
 0x53d   :  { %v6833_v63 = vpop.permute.xlu0 %3356 }
 0x540   :  { %v6835_v41 = vpop.permute.xlu1 %3359 }
 0x541   :  { %v6837_v34 = vpop.permute.xlu0 %3362 }
 0x544   :  { %v3279_v30 = vpop.permute.xlu1 %3278 }
 0x545   :  { %v3276_v27 = vpop.permute.xlu0 %3275  ;;  %v3377_v38 = vrot.slane %v3279_v30, %v6583_v46 }
 0x546   :  { %v3373_v44 = vrot.slane %v3276_v27, %v6580_v45 }
 0x548   :  { %v3282_v18 = vpop.permute.xlu1 %3281 }
 0x549   :  { %v3285_v31 = vpop.permute.xlu0 %3284  ;;  %v3382_v11 = vrot.slane %v3282_v18, %v6580_v45  ;;  %v3449_v18 = vrot.slane %v6821_v43, %v6583_v46  ;;  %v3472_v43 = vrot.slane %v6823_v24, %v6580_v45  ;;  %v3499_v24 = vrot.slane %v6835_v41, %v6580_v45 }
 0x54a   :  { %v3386_v7 = vrot.slane %v3285_v31, %v6583_v46  ;;  %v3459_v31 = vsel %vm2905_vm11, %v3458_v8, %v3454_v52 }
 0x54c   :  { %v3288_v57 = vpop.permute.xlu1 %3287  ;;  %v3387_v0 = vsel %vm2905_vm11, %v3386_v7, %v3382_v11  ;;  %v3378_v11 = vsel %vm2905_vm11, %v3377_v38, %v3373_v44  ;;  %v3485_v7 = vrot.slane %v6829_v23, %v6583_v46  ;;  %v3503_v23 = vrot.slane %v6837_v34, %v6583_v46 }
 0x54d   :  { %v3291_v2 = vpop.permute.xlu0 %3290  ;;  %v3391_v39 = vrot.slane %v3288_v57, %v6580_v45  ;;  %v3468_v57 = vsel %vm2905_vm11, %v3467_v37, %v3463_v5  ;;  %v3481_v5 = vrot.slane %v6827_v42, %v6580_v45  ;;  %v3490_v37 = vrot.slane %v6831_v53, %v6580_v45 }
 0x54e   :  { %v3395_v20 = vrot.slane %v3291_v2, %v6583_v46 }
 0x550   :  { %v3294_v36 = vpop.permute.xlu1 %3293  ;;  %v3396_v52 = vsel %vm2905_vm11, %v3395_v20, %v3391_v39  ;;  %v3514_v39 = vsel %vm1646_vm4, %v3387_v0, %v3378_v11 }
 0x551   :  { %v3297_v55 = vpop.permute.xlu0 %3296  ;;  %v3400_v26 = vrot.slane %v3294_v36, %v6580_v45  ;;  %v3476_v36 = vrot.slane %v6825_v17, %v6583_v46  ;;  %v3515_v17 = vsel %vm1649_vm5, %v3396_v52, %v3514_v39 }
 0x552   :  { %v3404_v10 = vrot.slane %v3297_v55, %v6583_v46 }
 0x554   :  { %v3300_v16 = vpop.permute.xlu1 %3299 }
 0x555   :  { %v3303_v28 = vpop.permute.xlu0 %3302  ;;  %v3409_v2 = vrot.slane %v3300_v16, %v6580_v45  ;;  %v3494_v16 = vrot.slane %v6833_v63, %v6583_v46  ;;  %v3450_v63 = vsel %vm2905_vm11, %v3449_v18, %v3445_v4 }
 0x556   :  { %v3413_v51 = vrot.slane %v3303_v28, %v6583_v46 }
 0x558   :  { %v3306_v25 = vpop.permute.xlu1 %3305  ;;  %v3414_v20 = vsel %vm2905_vm11, %v3413_v51, %v3409_v2  ;;  %v3521_v2 = vsel %vm1646_vm4, %v3459_v31, %v3450_v63 }
 0x559   :  { %v3309_v1 = vpop.permute.xlu0 %3308  ;;  %v3418_v30 = vrot.slane %v3306_v25, %v6580_v45 }
 0x55a   :  { %v3422_v27 = vrot.slane %v3309_v1, %v6583_v46  ;;  %v3405_v1 = vsel %vm2905_vm11, %v3404_v10, %v3400_v26  ;;  %v3477_v26 = vsel %vm2905_vm11, %v3476_v36, %v3472_v43  ;;  %v3504_v36 = vsel %vm2905_vm11, %v3503_v23, %v3499_v24 }
 0x55b   :  { %v3516_v53 = vsel %vm1652_vm6, %v3405_v1, %v3515_v17 }
 0x55c   :  { %v3312_v55 = vpop.permute.xlu1 %3311  ;;  %v3423_v42 = vsel %vm2905_vm11, %v3422_v27, %v3418_v30  ;;  %v3517_v41 = vsel %vm1655_vm7, %v3414_v20, %v3516_v53  ;;  %v3486_v27 = vsel %vm2905_vm11, %v3485_v7, %v3481_v5  ;;  %v3522_v30 = vsel %vm1649_vm5, %v3468_v57, %v3521_v2 }
 0x55d   :  { %v3315_v8 = vpop.permute.xlu0 %3314  ;;  %v3427_v28 = vrot.slane %v3312_v55, %v6580_v45  ;;  %v3518_v34 = vsel %vm1658_vm8, %v3423_v42, %v3517_v41  ;;  %v3495_v55 = vsel %vm2905_vm11, %v3494_v16, %v3490_v37  ;;  %v3523_v18 = vsel %vm1652_vm6, %v3477_v26, %v3522_v30 }
 0x55e   :  { %v3431_v25 = vrot.slane %v3315_v8, %v6583_v46  ;;  %v3524_v5 = vsel %vm1655_vm7, %v3486_v27, %v3523_v18  ;;  %v7414_v18 = vld [vmem:[#allocation17_spill] sm:$0xff] }
 0x55f   :  { %v3525_v1 = vsel %vm1658_vm8, %v3495_v55, %v3524_v5 }
 0x560   :  { %v3318_v44 = vpop.permute.xlu1 %3317  ;;  %v3432_v0 = vsel %vm2905_vm11, %v3431_v25, %v3427_v28  ;;  %v3526_v7 = vsel %vm1661_vm9, %v3504_v36, %v3525_v1  ;;  %v7415_v36 = vld [vmem:[#allocation18_spill] sm:$0xff]  ;;  %v7419_v1 = vld [vmem:[#allocation23_spill] sm:$0xff] }
 0x561   :  { %v3321_v38 = vpop.permute.xlu0 %3320  ;;  %v3436_v10 = vrot.slane %v3318_v44, %v6580_v45  ;;  %v3519_v4 = vsel %vm1661_vm9, %v3432_v0, %v3518_v34 }
 0x562   :  { %v3440_v51 = vrot.slane %v3321_v38, %v6583_v46 }
 0x564   :  { %v3366_v52 = vpop.permute.xlu1 %3365  ;;  %v3441_v8 = vsel %vm2905_vm11, %v3440_v51, %v3436_v10 }
 0x565   :  { %v3369_v43 = vpop.permute.xlu0 %3368  ;;  %v3508_v31 = vrot.slane %v3366_v52, %v6580_v45  ;;  %v3520_v28 = vsel %vm1664_vm10, %v3441_v8, %v3519_v4 }
 0x566   :  { %v3512_v57 = vrot.slane %v3369_v43, %v6583_v46  ;;  %v3530_v11 = vsel %vm1340_vm1, %v3520_v28, 0.0 }
 0x567   :  { %3531 = vadd.xlane.f32.xlu1 %v3530_v11 }
 0x568   :  { %v3513_v25 = vsel %vm2905_vm11, %v3512_v57, %v3508_v31  ;;  %v7418_v57 = vld [vmem:[#allocation22_spill] sm:$0xff] }
 0x569   :  { %v3527_v37 = vsel %vm1664_vm10, %v3513_v25, %v3526_v7 }
 0x56a   :  { %v3533_v39 = vsel %vm1340_vm1, %v3527_v37, 0.0  ;;  %v7420_v37 = vld [vmem:[#allocation40_spill] sm:$0xff] }
 0x56b   :  { %3534 = vadd.xlane.f32.xlu0 %v3533_v39 }
 0x5f0   :  { %v3532_v41 = vpop.xlane.xlu1 %3531 }
 0x5f1   :  { %v3541_v51 = vrot.slane %v3532_v41, %v7322_v33  ;;  %v3545_v27 = vrot.slane %v3532_v41, %v7385_v40 }
 0x5f4   :  { %v6913_v45 = vpop.xlane.xlu0 %3534 }
 0x5f5   :  { %v3573_v20 = vrot.slane %v6913_v45, %v7322_v33  ;;  %v3577_v46 = vrot.slane %v6913_v45, %v7385_v40  ;;  %v3581_v16 = vrot.slane %v6913_v45, %v7386_v35  ;;  %v3585_v24 = vrot.slane %v6913_v45, %v7387_v59 }
 0x5f6   :  { %v3589_v17 = vrot.slane %v6913_v45, %v7388_v15  ;;  %v3593_v44 = vrot.slane %v6913_v45, %v7389_v21  ;;  %v3597_v38 = vrot.slane %v6913_v45, %v7390_v61  ;;  %v3549_v33 = vrot.slane %v3532_v41, %v7386_v35 }
 0x5f7   :  { %4470 = vrcp.f32 %v3573_v20  ;;  %v3553_v40 = vrot.slane %v3532_v41, %v7387_v59  ;;  %v3557_v35 = vrot.slane %v3532_v41, %v7388_v15  ;;  %v3561_v59 = vrot.slane %v3532_v41, %v7389_v21  ;;  %v7421_v20 = vld [vmem:[#allocation35_spill] sm:$0xff] }
 0x5f8   :  { %4472 = vrcp.f32 %v3577_v46  ;;  %v3565_v15 = vrot.slane %v3532_v41, %v7390_v61  ;;  %v3569_v21 = vrot.slane %v3532_v41, %v7393_v13  ;;  %v3601_v61 = vrot.slane %v6913_v45, %v7393_v13  ;;  %v7422_v45 = vld [vmem:[#allocation24_spill] sm:$0xff] }
 0x5f9   :  { %4474 = vrcp.f32 %v3581_v16 }
 0x5fa   :  { %4476 = vrcp.f32 %v3585_v24  ;;  %v7423_v24 = vld [vmem:[#allocation28_spill] sm:$0xff] }
 0x5fb   :  { %4478 = vrcp.f32 %v3589_v17 }
 0x5fc   :  { %4480 = vrcp.f32 %v3593_v44  ;;  %v7424_v44 = vld [vmem:[#allocation32_spill] sm:$0xff] }
 0x5fd   :  { %4482 = vrcp.f32 %v3597_v38 }
 0x5fe   :  { %4484 = vrcp.f32 %v3541_v51  ;;  %v7428_v51 = vld [vmem:[#allocation34_spill] sm:$0xff] }
 0x5ff   :  { %4486 = vrcp.f32 %v3545_v27 }
 0x600   :  { %4488 = vrcp.f32 %v3549_v33  ;;  %v7430_v33 = vld [vmem:[#allocation39_spill] sm:$0xff] }
 0x601   :  { %4490 = vrcp.f32 %v3553_v40 }
 0x602   :  { %4492 = vrcp.f32 %v3557_v35 }
 0x603   :  { %4494 = vrcp.f32 %v3561_v59  ;;  %v7433_v59 = vld [vmem:[#allocation44_spill] sm:$0xff] }
 0x604   :  { %v4471_v42 = vpop.eup %4470  ;;  %4496 = vrcp.f32 %v3565_v15 }
 0x605   :  { %v3644_v23 = vmul.f32 %v4471_v42, %v6687_v62  ;;  %v3643_v53 = vmul.f32 %v4471_v42, %v6682_v49  ;;  %v4473_v0 = vpop.eup %4472  ;;  %4498 = vrcp.f32 %v3569_v21 }
 0x606   :  { %v3647_v10 = vmul.f32 %v4473_v0, %v6697_v22  ;;  %v3646_v63 = vmul.f32 %v4473_v0, %v6694_v6  ;;  %v4475_v26 = vpop.eup %4474  ;;  %4500 = vrcp.f32 %v3601_v61 }
 0x607   :  { %3753 = vperm.xlu0 %4181, %v3644_v23   ;;  %3748 = vperm.xlu1 %4180, %v3643_v53   ;;  %v3650_v49 = vmul.f32 %v4475_v26, %v6707_v58  ;;  %v3649_v62 = vmul.f32 %v4475_v26, %v6704_v32  ;;  %v4477_v2 = vpop.eup %4476  ;;  %v7425_v53 = vld [vmem:[#allocation63_spill] sm:$0xff]  ;;  %v7427_v26 = vld [vmem:[#allocation64_spill] sm:$0xff] }
 0x608   :  { %v3653_v22 = vmul.f32 %v4477_v2, %v6717_v12  ;;  %v3652_v6 = vmul.f32 %v4477_v2, %v6714_v60  ;;  %v4479_v34 = vpop.eup %4478 }
 0x609   :  { %v3656_v58 = vmul.f32 %v4479_v34, %v6727_v29  ;;  %v3655_v32 = vmul.f32 %v4479_v34, %v6724_v9  ;;  %v4481_v30 = vpop.eup %4480 }
 0x60a   :  { %v3659_v12 = vmul.f32 %v4481_v30, %v6737_v14  ;;  %v3658_v60 = vmul.f32 %v4481_v30, %v6734_v54  ;;  %v4483_v55 = vpop.eup %4482 }
 0x60b   :  { %3763 = vperm.xlu0 %4181, %v3647_v10   ;;  %3758 = vperm.xlu1 %4180, %v3646_v63   ;;  %v3662_v29 = vmul.f32 %v4483_v55, %v6747_v56  ;;  %v3661_v9 = vmul.f32 %v4483_v55, %v6744_v3  ;;  %v4485_v52 = vpop.eup %4484  ;;  %v7426_v10 = vld [vmem:[#allocation58_spill] sm:$0xff] }
 0x60c   :  { %v3620_v14 = vmul.f32 %v4485_v52, %v6754_v47  ;;  %v3619_v54 = vmul.f32 %v4485_v52, %v6757_v19  ;;  %v4487_v8 = vpop.eup %4486 }
 0x60d   :  { %v3622_v56 = vmul.f32 %v4487_v8, %v6764_v50  ;;  %v3623_v3 = vmul.f32 %v4487_v8, %v6767_v48  ;;  %v4489_v4 = vpop.eup %4488  ;;  %v7416_v50 = vld [vmem:[#allocation20_spill] sm:$0xff]  ;;  %v7417_v48 = vld [vmem:[#allocation21_spill] sm:$0xff] }
 0x60e   :  { %v3625_v47 = vmul.f32 %v4489_v4, %v7414_v18  ;;  %v3626_v19 = vmul.f32 %v4489_v4, %v7415_v36  ;;  %v4491_v43 = vpop.eup %4490  ;;  %v7434_v4 = vld [vmem:[#allocation46_spill] sm:$0xff]  ;;  %v7435_v18 = vld [vmem:[#allocation25_spill] sm:$0xff] }
 0x60f   :  { %3773 = vperm.xlu0 %4181, %v3650_v49   ;;  %3768 = vperm.xlu1 %4180, %v3649_v62   ;;  %v3628_v31 = vmul.f32 %v4491_v43, %v7416_v50  ;;  %v3629_v28 = vmul.f32 %v4491_v43, %v7417_v48  ;;  %v4493_v5 = vpop.eup %4492  ;;  %v7429_v49 = vld [vmem:[#allocation36_spill] sm:$0xff] }
 0x610   :  { %v3631_v11 = vmul.f32 %v4493_v5, %v7418_v57  ;;  %v3632_v25 = vmul.f32 %v4493_v5, %v7419_v1  ;;  %v4495_v7 = vpop.eup %4494 }
 0x611   :  { %v3634_v39 = vmul.f32 %v4495_v7, %v7420_v37  ;;  %v3635_v46 = vmul.f32 %v4495_v7, %v7421_v20  ;;  %v4497_v13 = vpop.eup %4496  ;;  %v7437_v37 = vld [vmem:[#allocation57_spill] sm:$0xff] }
 0x612   :  { %v3637_v16 = vmul.f32 %v4497_v13, %v7422_v45  ;;  %v3638_v17 = vmul.f32 %v4497_v13, %v7423_v24  ;;  %v4499_v42 = vpop.eup %4498 }
 0x613   :  { %3783 = vperm.xlu0 %4181, %v3653_v22   ;;  %3778 = vperm.xlu1 %4180, %v3652_v6   ;;  %v3640_v23 = vmul.f32 %v4499_v42, %v7424_v44  ;;  %v3641_v0 = vmul.f32 %v4499_v42, %v7425_v53  ;;  %v4501_v38 = vpop.eup %4500  ;;  %v7440_v44 = vld [vmem:[#allocation51_spill] sm:$0xff]  ;;  %v7441_v53 = vld [vmem:[#allocation30_spill] sm:$0xff] }
 0x614   :  { %v3664_v63 = vmul.f32 %v4501_v38, %v7426_v10  ;;  %v3665_v41 = vmul.f32 %v4501_v38, %v7427_v26  ;;  %v7442_v38 = vld [vmem:[#allocation41_spill] sm:$0xff] }
 0x617   :  { %3793 = vperm.xlu0 %4181, %v3656_v58   ;;  %3788 = vperm.xlu1 %4180, %v3655_v32   ;;  %v7431_v32 = vld [vmem:[#allocation38_spill] sm:$0xff] }
 0x61b   :  { %3803 = vperm.xlu0 %4181, %v3659_v12   ;;  %3798 = vperm.xlu1 %4180, %v3658_v60  }
 0x61f   :  { %3813 = vperm.xlu0 %4181, %v3662_v29   ;;  %3808 = vperm.xlu1 %4180, %v3661_v9   ;;  %v7432_v9 = vld [vmem:[#allocation56_spill] sm:$0xff] }
 0x623   :  { %3673 = vperm.xlu1 %4180, %v3620_v14   ;;  %3668 = vperm.xlu0 %4181, %v3619_v54  }
 0x627   :  { %3678 = vperm.xlu1 %4180, %v3622_v56   ;;  %3683 = vperm.xlu0 %4181, %v3623_v3  }
 0x62b   :  { %3688 = vperm.xlu1 %4180, %v3625_v47   ;;  %3693 = vperm.xlu0 %4181, %v3626_v19  }
 0x62f   :  { %3698 = vperm.xlu1 %4180, %v3628_v31   ;;  %3703 = vperm.xlu0 %4181, %v3629_v28  }
 0x633   :  { %3708 = vperm.xlu1 %4180, %v3631_v11   ;;  %3713 = vperm.xlu0 %4181, %v3632_v25   ;;  %v7436_v25 = vld [vmem:[#allocation26_spill] sm:$0xff] }
 0x637   :  { %3718 = vperm.xlu1 %4180, %v3634_v39   ;;  %3723 = vperm.xlu0 %4181, %v3635_v46  }
 0x63b   :  { %3728 = vperm.xlu1 %4180, %v3637_v16   ;;  %3733 = vperm.xlu0 %4181, %v3638_v17   ;;  %v7438_v16 = vld [vmem:[#allocation48_spill] sm:$0xff]  ;;  %v7439_v17 = vld [vmem:[#allocation54_spill] sm:$0xff] }
 0x63f   :  { %3738 = vperm.xlu1 %4180, %v3640_v23   ;;  %3743 = vperm.xlu0 %4181, %v3641_v0  }
 0x643   :  { %3818 = vperm.xlu1 %4180, %v3664_v63   ;;  %3823 = vperm.xlu0 %4181, %v3665_v41   ;;  %v7443_v63 = vld [vmem:[#allocation42_spill] sm:$0xff] }
 0x647   :  { %4034 = vrot.lane.b32.xlu1 %v7428_v51, %s4735_s2  ;;  %4036 = vrot.lane.b32.xlu0 %v7429_v49, %s4735_s2 }
 0x682   :  { %v3754_v62 = vpop.permute.xlu0 %3753  ;;  %v3749_v2 = vpop.permute.xlu1 %3748 }
 0x683   :  { %v3843_v58 = vmul.f32 %v3754_v62, %v7430_v33  ;;  %v3842_v30 = vmul.f32 %v3749_v2, %v7431_v32  ;;  %v7444_v32 = vld [vmem:[#allocation49_spill] sm:$0xff] }
 0x685   :  { %v3931_v60 = vsel %vm249_vm0, %v3843_v58, 0.0  ;;  %v3930_v55 = vsel %vm249_vm0, %v3842_v30, 0.0 }
 0x686   :  { %v3764_v27 = vpop.permute.xlu0 %3763  ;;  %v3759_v22 = vpop.permute.xlu1 %3758  ;;  %v3932_v54 = vadd.f32 %v3931_v60, %v3930_v55  ;;  %v7446_v55 = vld [vmem:[#allocation62_spill] sm:$0xff] }
 0x687   :  { %v3845_v52 = vmul.f32 %v3764_v27, %v7432_v9  ;;  %v3844_v14 = vmul.f32 %v3759_v22, %v7433_v59 }
 0x688   :  { %v3933_v36 = vrot.slane %v3932_v54, 4 }
 0x689   :  { %v3940_v56 = vsel %vm249_vm0, %v3845_v52, 0.0  ;;  %v3939_v3 = vsel %vm249_vm0, %v3844_v14, 0.0  ;;  %v7447_v52 = vld [vmem:[#allocation33_spill] sm:$0xff] }
 0x68a   :  { %v3774_v6 = vpop.permute.xlu0 %3773  ;;  %v3769_v34 = vpop.permute.xlu1 %3768  ;;  %v3941_v19 = vadd.f32 %v3940_v56, %v3939_v3  ;;  %v3934_v48 = vadd.f32 %v3933_v36, %v3932_v54 }
 0x68b   :  { %v3847_v21 = vmul.f32 %v3774_v6, %v7434_v4  ;;  %v3846_v47 = vmul.f32 %v3769_v34, %v7435_v18 }
 0x68c   :  { %v3942_v28 = vrot.slane %v3941_v19, 4  ;;  %v3935_v1 = vrot.slane %v3934_v48, 2 }
 0x68d   :  { %v3949_v50 = vsel %vm249_vm0, %v3847_v21, 0.0  ;;  %v3948_v31 = vsel %vm249_vm0, %v3846_v47, 0.0  ;;  %v7448_v21 = vld [vmem:[#allocation29_spill] sm:$0xff] }
 0x68e   :  { %v3784_v40 = vpop.permute.xlu0 %3783  ;;  %v3779_v12 = vpop.permute.xlu1 %3778  ;;  %v3950_v5 = vadd.f32 %v3949_v50, %v3948_v31  ;;  %v3943_v20 = vadd.f32 %v3942_v28, %v3941_v19  ;;  %v3936_v41 = vadd.f32 %v3935_v1, %v3934_v48  ;;  %v7449_v47 = vld [vmem:[#allocation61_spill] sm:$0xff]  ;;  %v7450_v48 = vld [vmem:[#allocation60_spill] sm:$0xff] }
 0x68f   :  { %v3849_v7 = vmul.f32 %v3784_v40, %v7436_v25  ;;  %v3848_v39 = vmul.f32 %v3779_v12, %v7437_v37  ;;  %v7445_v40 = vld [vmem:[#allocation52_spill] sm:$0xff] }
 0x690   :  { %v3951_v46 = vrot.slane %v3950_v5, 4  ;;  %v3944_v62 = vrot.slane %v3943_v20, 2  ;;  %v3937_v3 = vrot.slane %v3936_v41, 1 }
 0x691   :  { %v3958_v51 = vsel %vm249_vm0, %v3849_v7, 0.0  ;;  %v3957_v49 = vsel %vm249_vm0, %v3848_v39, 0.0 }
 0x692   :  { %v3794_v35 = vpop.permute.xlu0 %3793  ;;  %v3789_v29 = vpop.permute.xlu1 %3788  ;;  %v3952_v2 = vadd.f32 %v3951_v46, %v3950_v5  ;;  %v3959_v60 = vadd.f32 %v3958_v51, %v3957_v49  ;;  %v7451_v5 = vld [vmem:[#allocation19_spill] sm:$0xff] }
 0x693   :  { %v3851_v24 = vmul.f32 %v3794_v35, %v7438_v16  ;;  %v3850_v42 = vmul.f32 %v3789_v29, %v7439_v17 }
 0x694   :  { %v3960_v1 = vrot.slane %v3959_v60, 4 }
 0x695   :  { %v3967_v33 = vsel %vm249_vm0, %v3851_v24, 0.0  ;;  %v3966_v58 = vsel %vm249_vm0, %v3850_v42, 0.0  ;;  %v7452_v42 = vld [vmem:[#allocation59_spill] sm:$0xff] }
 0x696   :  { %v3804_v8 = vpop.permute.xlu0 %3803  ;;  %v3799_v15 = vpop.permute.xlu1 %3798  ;;  %v3968_v4 = vadd.f32 %v3967_v33, %v3966_v58 }
 0x697   :  { %v3853_v35 = vmul.f32 %v3804_v8, %v7446_v55  ;;  %v3852_v59 = vmul.f32 %v3799_v15, %v7447_v52  ;;  %v7011_v15 = vadd.f32 %v3944_v62, %v3943_v20 }
 0x698   :  { %v3969_v39 = vrot.slane %v3968_v4, 4 }
 0x699   :  { %v3976_v25 = vsel %vm249_vm0, %v3853_v35, 0.0  ;;  %v3975_v7 = vsel %vm249_vm0, %v3852_v59, 0.0 }
 0x69a   :  { %v3814_v43 = vpop.permute.xlu0 %3813  ;;  %v3809_v61 = vpop.permute.xlu1 %3808 }
 0x69b   :  { %v3855_v18 = vmul.f32 %v3814_v43, %v7448_v21  ;;  %v3854_v36 = vmul.f32 %v3809_v61, %v7449_v47 }
 0x69d   :  { %v3985_v46 = vsel %vm249_vm0, %v3855_v18, 0.0 }
 0x69e   :  { %v3669_v57 = vpop.permute.xlu0 %3668  ;;  %v3674_v11 = vpop.permute.xlu1 %3673 }
 0x69f   :  { %v3826_v10 = vmul.f32 %v3669_v57, %v7442_v38  ;;  %v3827_v26 = vmul.f32 %v3674_v11, %v7443_v63  ;;  %v3953_v11 = vrot.slane %v3952_v2, 2  ;;  %v3961_v38 = vadd.f32 %v3960_v1, %v3959_v60 }
 0x6a1   :  { %v3858_v29 = vsel %vm249_vm0, %v3826_v10, 0.0  ;;  %v3859_v9 = vsel %vm249_vm0, %v3827_v26, 0.0  ;;  %v3977_v10 = vadd.f32 %v3976_v25, %v3975_v7  ;;  %v7023_v26 = vadd.f32 %v3953_v11, %v3952_v2 }
 0x6a2   :  { %v3684_v13 = vpop.permute.xlu0 %3683  ;;  %v3679_v45 = vpop.permute.xlu1 %3678  ;;  %v3860_v8 = vadd.f32 %v3859_v9, %v3858_v29  ;;  %v3962_v2 = vrot.slane %v3961_v38, 2 }
 0x6a3   :  { %v3829_v23 = vmul.f32 %v3684_v13, %v7440_v44  ;;  %v3828_v0 = vmul.f32 %v3679_v45, %v7441_v53  ;;  %v3984_v13 = vsel %vm249_vm0, %v3854_v36, 0.0  ;;  %v3978_v55 = vrot.slane %v3977_v10, 4 }
 0x6a4   :  { %v3861_v24 = vrot.slane %v3860_v8, 4  ;;  %v3955_v9 = vrot.slane %v7023_v26, 1 }
 0x6a5   :  { %v3868_v27 = vsel %vm249_vm0, %v3829_v23, 0.0  ;;  %v3867_v22 = vsel %vm249_vm0, %v3828_v0, 0.0  ;;  %v7453_v23 = vld [vmem:[#allocation55_spill] sm:$0xff]  ;;  %v7021_v0 = vadd.f32 %v3937_v3, %v3936_v41 }
 0x6a6   :  { %v3694_v6 = vpop.permute.xlu0 %3693  ;;  %v3689_v34 = vpop.permute.xlu1 %3688  ;;  %v3869_v14 = vadd.f32 %v3868_v27, %v3867_v22  ;;  %v3946_v27 = vrot.slane %v7011_v15, 1  ;;  %v3970_v22 = vadd.f32 %v3969_v39, %v3968_v4 }
 0x6a7   :  { %v3831_v30 = vmul.f32 %v3694_v6, %v7444_v32  ;;  %v3830_v12 = vmul.f32 %v3689_v34, %v7445_v40  ;;  %v3986_v6 = vadd.f32 %v3985_v46, %v3984_v13  ;;  %v3862_v32 = vadd.f32 %v3861_v24, %v3860_v8  ;;  %v7457_v8 = vld [vmem:[#allocation45_spill] sm:$0xff] }
 0x6a8   :  { %v3870_v37 = vrot.slane %v3869_v14, 4 }
 0x6a9   :  { %v3877_v54 = vsel %vm249_vm0, %v3831_v30, 0.0  ;;  %v3876_v56 = vsel %vm249_vm0, %v3830_v12, 0.0  ;;  %v7454_v30 = vld [vmem:[#allocation31_spill] sm:$0xff]  ;;  %v7455_v12 = vld [vmem:[#allocation53_spill] sm:$0xff]  ;;  %v3863_v47 = vrot.slane %v3862_v32, 2 }
 0x6aa   :  { %v3704_v19 = vpop.permute.xlu0 %3703  ;;  %v3699_v50 = vpop.permute.xlu1 %3698  ;;  %v3878_v31 = vadd.f32 %v3877_v54, %v3876_v56  ;;  %v3871_v51 = vadd.f32 %v3870_v37, %v3869_v14  ;;  %v3971_v54 = vrot.slane %v3970_v22, 2  ;;  %v3987_v56 = vrot.slane %v3986_v6, 4 }
 0x6ab   :  { %v3833_v28 = vmul.f32 %v3704_v19, %v7450_v48  ;;  %v3832_v57 = vmul.f32 %v3699_v50, %v7451_v5  ;;  %v7456_v19 = vld [vmem:[#allocation16_spill] sm:$0xff]  ;;  %v7035_v48 = vadd.f32 %v3962_v2, %v3961_v38 }
 0x6ac   :  { %v3879_v17 = vrot.slane %v3878_v31, 4  ;;  %v3872_v52 = vrot.slane %v3871_v51, 2  ;;  %v7039_v37 = vadd.f32 %v3971_v54, %v3970_v22 }
 0x6ad   :  { %v3886_v43 = vsel %vm249_vm0, %v3833_v28, 0.0  ;;  %v3885_v61 = vsel %vm249_vm0, %v3832_v57, 0.0  ;;  %v3979_v28 = vadd.f32 %v3978_v55, %v3977_v10 }
 0x6ae   :  { %v3887_v45 = vadd.f32 %v3886_v43, %v3885_v61  ;;  %v3714_v16 = vpop.permute.xlu0 %3713  ;;  %v3709_v20 = vpop.permute.xlu1 %3708  ;;  %v3880_v41 = vadd.f32 %v3879_v17, %v3878_v31  ;;  %v3873_v11 = vadd.f32 %v3872_v52, %v3871_v51  ;;  %v3988_v43 = vadd.f32 %v3987_v56, %v3986_v6  ;;  %v7459_v17 = vld [vmem:[#allocation47_spill] sm:$0xff] }
 0x6af   :  { %v3835_v44 = vmul.f32 %v3714_v16, %v7452_v42  ;;  %v3834_v53 = vmul.f32 %v3709_v20, %v7453_v23  ;;  %v7458_v20 = vld [vmem:[#allocation50_spill] sm:$0xff] }
 0x6b0   :  { %v3888_v63 = vrot.slane %v3887_v45, 4  ;;  %v3881_v36 = vrot.slane %v3880_v41, 2  ;;  %v3874_v10 = vrot.slane %v3873_v11, 1 }
 0x6b1   :  { %v3895_v49 = vsel %vm249_vm0, %v3835_v44, 0.0  ;;  %v3894_v62 = vsel %vm249_vm0, %v3834_v53, 0.0  ;;  %v3980_v44 = vrot.slane %v3979_v28, 2 }
 0x6b2   :  { %v3896_v34 = vadd.f32 %v3895_v49, %v3894_v62  ;;  %v3724_v33 = vpop.permute.xlu0 %3723  ;;  %v3719_v58 = vpop.permute.xlu1 %3718  ;;  %v3889_v35 = vadd.f32 %v3888_v63, %v3887_v45  ;;  %v3864_v45 = vadd.f32 %v3863_v47, %v3862_v32  ;;  %v3882_v16 = vadd.f32 %v3881_v36, %v3880_v41 }
 0x6b3   :  { %v3837_v40 = vmul.f32 %v3724_v33, %v7454_v30  ;;  %v3836_v60 = vmul.f32 %v3719_v58, %v7455_v12  ;;  %v3989_v62 = vrot.slane %v3988_v43, 2  ;;  %v7460_v30 = vld [vmem:[#allocation27_spill] sm:$0xff]  ;;  %v7461_v12 = vld [vmem:[#allocation37_spill] sm:$0xff]  ;;  %v3981_v2 = vadd.f32 %v3980_v44, %v3979_v28 }
 0x6b4   :  { %v3897_v29 = vrot.slane %v3896_v34, 4  ;;  %v3890_v5 = vrot.slane %v3889_v35, 2  ;;  %v3865_v32 = vrot.slane %v3864_v45, 1  ;;  %v3883_v41 = vrot.slane %v3882_v16, 1 }
 0x6b5   :  { %v3904_v59 = vsel %vm249_vm0, %v3837_v40, 0.0  ;;  %v3903_v14 = vsel %vm249_vm0, %v3836_v60, 0.0  ;;  %v3875_v52 = vadd.f32 %v3874_v10, %v3873_v11  ;;  %v3990_v47 = vadd.f32 %v3989_v62, %v3988_v43 }
 0x6b6   :  { %v3898_v3 = vadd.f32 %v3897_v29, %v3896_v34  ;;  %v3905_v4 = vadd.f32 %v3904_v59, %v3903_v14  ;;  %v3734_v21 = vpop.permute.xlu0 %3733  ;;  %v3729_v18 = vpop.permute.xlu1 %3728  ;;  %v3891_v23 = vadd.f32 %v3890_v5, %v3889_v35  ;;  %v3866_v36 = vadd.f32 %v3865_v32, %v3864_v45 }
 0x6b7   :  { %v3839_v50 = vmul.f32 %v3734_v21, %v7456_v19  ;;  %v3838_v31 = vmul.f32 %v3729_v18, %v7457_v8  ;;  %v3964_v18 = vrot.slane %v7035_v48, 1  ;;  %v3884_v19 = vadd.f32 %v3883_v41, %v3882_v16 }
 0x6b8   :  { %v3906_v57 = vrot.slane %v3905_v4, 4  ;;  %v3899_v1 = vrot.slane %v3898_v3, 2  ;;  %v3892_v55 = vrot.slane %v3891_v23, 1  ;;  %v3947_v5 = vadd.f32 %v3946_v27, %v7011_v15 }
 0x6b9   :  { %v3913_v25 = vsel %vm249_vm0, %v3839_v50, 0.0  ;;  %v3912_v7 = vsel %vm249_vm0, %v3838_v31, 0.0  ;;  %v3982_v11 = vrot.slane %v3981_v2, 1  ;;  %v3956_v43 = vadd.f32 %v3955_v9, %v7023_v26 }
 0x6ba   :  { %v3907_v61 = vadd.f32 %v3906_v57, %v3905_v4  ;;  %v3914_v39 = vadd.f32 %v3913_v25, %v3912_v7  ;;  %v3744_v46 = vpop.permute.xlu0 %3743  ;;  %v3739_v13 = vpop.permute.xlu1 %3738  ;;  %v3900_v63 = vadd.f32 %v3899_v1, %v3898_v3  ;;  %v3893_v50 = vadd.f32 %v3892_v55, %v3891_v23 }
 0x6bb   :  { %v3841_v24 = vmul.f32 %v3744_v46, %v7458_v20  ;;  %v3840_v42 = vmul.f32 %v3739_v13, %v7459_v17  ;;  %v3973_v57 = vrot.slane %v7039_v37, 1  ;;  %v4018_v25 = vsel %vm1646_vm4, %v3875_v52, %v3866_v36 }
 0x6bc   :  { %v3908_v53 = vrot.slane %v3907_v61, 2  ;;  %v3915_v38 = vrot.slane %v3914_v39, 4  ;;  %v3901_v59 = vrot.slane %v3900_v63, 1  ;;  %v3991_v46 = vrot.slane %v3990_v47, 1 }
 0x6bd   :  { %v3922_v51 = vsel %vm249_vm0, %v3841_v24, 0.0  ;;  %v3921_v49 = vsel %vm249_vm0, %v3840_v42, 0.0  ;;  %v4019_v13 = vsel %vm1649_vm5, %v3884_v19, %v4018_v25  ;;  %v3965_v16 = vadd.f32 %v3964_v18, %v7035_v48 }
 0x6be   :  { %v3909_v22 = vadd.f32 %v3908_v53, %v3907_v61  ;;  %v3916_v6 = vadd.f32 %v3915_v38, %v3914_v39  ;;  %v3923_v34 = vadd.f32 %v3922_v51, %v3921_v49  ;;  %v3824_v33 = vpop.permute.xlu0 %3823  ;;  %v3819_v58 = vpop.permute.xlu1 %3818  ;;  %v3902_v1 = vadd.f32 %v3901_v59, %v3900_v63 }
 0x6bf   :  { %v3857_v40 = vmul.f32 %v3824_v33, %v7460_v30  ;;  %v3856_v60 = vmul.f32 %v3819_v58, %v7461_v12  ;;  %v4020_v20 = vsel %vm1652_vm6, %v3893_v50, %v4019_v13  ;;  %v4025_v24 = vsel %vm1646_vm4, %v3947_v5, %v7021_v0 }
 0x6c0   :  { %v3917_v35 = vrot.slane %v3916_v6, 2  ;;  %v3924_v29 = vrot.slane %v3923_v34, 4  ;;  %v3910_v56 = vrot.slane %v3909_v22, 1  ;;  %v3974_v17 = vadd.f32 %v3973_v57, %v7039_v37 }
 0x6c1   :  { %v3994_v14 = vsel %vm249_vm0, %v3857_v40, 0.0  ;;  %v3993_v54 = vsel %vm249_vm0, %v3856_v60, 0.0  ;;  %v4021_v42 = vsel %vm1655_vm7, %v3902_v1, %v4020_v20  ;;  %v3983_v44 = vadd.f32 %v3982_v11, %v3981_v2 }
 0x6c2   :  { %v3918_v3 = vadd.f32 %v3917_v35, %v3916_v6  ;;  %v3925_v4 = vadd.f32 %v3924_v29, %v3923_v34  ;;  %v3995_v21 = vadd.f32 %v3994_v14, %v3993_v54  ;;  %v3911_v7 = vadd.f32 %v3910_v56, %v3909_v22  ;;  %v4035_v51 = vpop.permute.xlu1 %4034  ;;  %v4037_v34 = vpop.permute.xlu0 %4036 }
 0x6c3   :  { %v4026_v53 = vsel %vm1649_vm5, %v3956_v43, %v4025_v24  ;;  %v3992_v38 = vadd.f32 %v3991_v46, %v3990_v47 }
 0x6c4   :  { %v3919_v8 = vrot.slane %v3918_v3, 1  ;;  %v3926_v31 = vrot.slane %v3925_v4, 2  ;;  %v3996_v28 = vrot.slane %v3995_v21, 4  ;;  %v4022_v9 = vsel %vm1658_vm8, %v3911_v7, %v4021_v42 }
 0x6c5   :  { %v4027_v63 = vsel %vm1652_vm6, %v3965_v16, %v4026_v53 }
 0x6c6   :  { %v3927_v61 = vadd.f32 %v3926_v31, %v3925_v4  ;;  %v3997_v39 = vadd.f32 %v3996_v28, %v3995_v21  ;;  %v3920_v45 = vadd.f32 %v3919_v8, %v3918_v3  ;;  %v4028_v37 = vsel %vm1655_vm7, %v3974_v17, %v4027_v63 }
 0x6c7   :  { %v4029_v22 = vsel %vm1658_vm8, %v3983_v44, %v4028_v37 }
 0x6c8   :  { %v3928_v15 = vrot.slane %v3927_v61, 1  ;;  %v3998_v27 = vrot.slane %v3997_v39, 2  ;;  %v4023_v48 = vsel %vm1661_vm9, %v3920_v45, %v4022_v9  ;;  %v4030_v6 = vsel %vm1661_vm9, %v3992_v38, %v4029_v22 }
 0x6ca   :  { %v3999_v23 = vadd.f32 %v3998_v27, %v3997_v39  ;;  %v3929_v26 = vadd.f32 %v3928_v15, %v3927_v61 }
 0x6cc   :  { %v4000_v10 = vrot.slane %v3999_v23, 1  ;;  %v4024_v0 = vsel %vm1664_vm10, %v3929_v26, %v4023_v48 }
 0x6cd   :  { %v4040_v49 = vsel %vm249_vm0, %v4024_v0, %v4035_v51 }
 0x6ce   :  { %v4001_v62 = vadd.f32 %v4000_v10, %v3999_v23  ;;  %4043 = vst.msk [vmem:[#allocation11] sm:$0xff] %vm4042_vm12, %v4040_v49 }
 0x6d0   :  { %v4031_v33 = vsel %vm1664_vm10, %v4001_v62, %v4030_v6 }
 0x6d1   :  { %v4041_v58 = vsel %vm249_vm0, %v4031_v33, %v4037_v34 }
 0x6d2   :  { %4044 = vst.msk [vmem:[#allocation11 + $0x8] sm:$0xff] %vm4042_vm12, %v4041_v58 }
 0x6d3   :  { %4708 = shalt.err (!%p4705_p1)
}
 0x6d4   :  { %4056 = dma.vmem_to_hbm [thread:$0]  %s4051_s17, 256, %s7089_s5, [#allocation4], %s4727_s23, %s4727_s23, %s4728_s24  }
 0x6d5   :  { %4723 = dma.done.wait [#allocation4], 256  }
 0x6d6   :  { %4724 = vsyncadd [#allocation4], 4294967040 }
 0x6d7   :  { %4060 = vsyncpa [#allocation3], 1 }
 0x6d8   :  { %4061 = vsyncpa [#allocation6], 1 }
 0x6d9   :  { %4062 = vsyncpa [#allocation9], 1 }
 0x6da   :  { %4063 = vsyncpa [#allocation4], 1 }

</bundles_post_ra>
